<compile_context>
chip_gen: v6e
topology: v6e:2x2x1
jax: 0.10.0
libtpu: 0.0.40
codegen_flags: <defaults>
</compile_context>

<pallas_src>
import jax
import jax.numpy as jnp
from jax.experimental import pallas as pl
from jax.experimental.pallas import tpu as pltpu

B = 2              # batch
H = 32             # hidden_dimension
NPTS = 128         # number of grid points (tutorial uses circle_grid(500); kept = lane width)
SGRID = 20         # stride points per axis: domain [1,1], start [0,0], jumps [0.05,0.05]
S = SGRID * SGRID  # 400 == FeedForward output_dimensions
FILTER_DIM = (0.15, 0.15)
KH = 20            # kernel-net hidden width (PINA default kernel: 2 -> 20 -> 20 -> 1, ReLU)
NF = 2             # input_numb_field: one kernel net per field

TS = 40            # anchors per processing group -> TS*NPTS = 5120 lanes per MXU stream
NG = S // TS       # 10 groups
assert NG * TS == S
assert (TS * NG) % 8 == 0 and TS % 8 == 0   # full-sublane-tile kv stores


# ----------------------------------------------------------------------------
# Fused kernel (one field per grid program): FeedForward + transposed conv + sigmoid
# ----------------------------------------------------------------------------
def _decoder_kernel(w_ref,
                    fw1_ref, fb1_ref, fw2_ref, fb2_ref, fw3_ref, fb3_ref,
                    uxw_ref, uyw_ref, mkw_ref,
                    k1_ref, kb1_ref, k2t_ref, kb2_ref, k3_ref, kb3_ref,
                    out_ref, kw_ref):
    # ---- FeedForward: H -> 120 -> tanh -> 240 -> tanh -> S (f32, tiny; recomputed
    #      per field program so the parallel grid axis needs no cross-core traffic)
    h = jnp.tanh(jnp.dot(w_ref[...], fw1_ref[...],
                         preferred_element_type=jnp.float32) + fb1_ref[...])
    h = jnp.tanh(jnp.dot(h, fw2_ref[...],
                         preferred_element_type=jnp.float32) + fb2_ref[...])
    x = jnp.dot(h, fw3_ref[...],
                preferred_element_type=jnp.float32) + fb3_ref[...]        # [B, S]

    # ---- this field's kernel-net weights (hoisted out of the group loop) -------
    k1 = k1_ref[0]                                   # [KH, 2]
    k1x = k1[:, 0:1]                                 # [KH, 1]
    k1y = k1[:, 1:2]                                 # [KH, 1]
    kb1 = kb1_ref[0]                                 # [KH, 1]
    k2tb = k2t_ref[0].astype(jnp.bfloat16)           # [KH, KH]  (= W2^T)
    kb2 = kb2_ref[0]                                 # [KH, 1]
    k3b = k3_ref[0].astype(jnp.bfloat16)             # [1, KH]
    kb3 = kb3_ref[0]                                 # [1, 1]

    # ---- continuous-filter values, TS anchors per step --------------------------
    # (anchor, point) pairs live on the lane axis (TS*NPTS = 5120 lanes); the MLP
    # over the KH channels runs on the MXU as bf16 [KH,KH] @ [KH, 5120] streams.
    @pl.loop(0, NG)
    def _(g):
        ux = uxw_ref[pl.ds(g, 1), :]                 # [1, TS*NPTS]
        uy = uyw_ref[pl.ds(g, 1), :]
        mk = mkw_ref[pl.ds(g, 1), :]
        h1 = jnp.maximum(k1x * ux + k1y * uy + kb1, 0.0)          # [KH, TS*NPTS] (VPU)
        h2 = jnp.maximum(
            jnp.dot(k2tb, h1.astype(jnp.bfloat16),
                    preferred_element_type=jnp.float32) + kb2, 0.0)
        kv = (jnp.dot(k3b, h2.astype(jnp.bfloat16),
                      preferred_element_type=jnp.float32) + kb3) * mk     # [1, TS*NPTS]
        # lane-block -> sublane reshape: one full [TS, 128] tile store per group
        # (anchor s = g*TS + t lands at scratch row s, matching x's column order).
        row = pl.multiple_of(g * TS, 8)
        kw_ref[pl.ds(row, TS), :] = kv.reshape(TS, NPTS)

    # ---- single K=S contraction on the MXU (bf16 operands, f32 accumulate) ------
    o = jnp.dot(x.astype(jnp.bfloat16), kw_ref[...].astype(jnp.bfloat16),
                preferred_element_type=jnp.float32)               # [B, NPTS]

    # numerically stable sigmoid (exp on EUP, reciprocal on EUP)
    z = jnp.exp(-jnp.abs(o))
    r = pl.reciprocal(1.0 + z, approx=False)
    out_ref[0, :, :] = jnp.where(o >= 0.0, r, z * r)


def _full_spec(a):
    zeros = (0,) * a.ndim
    return pl.BlockSpec(a.shape, lambda f, _z=zeros: _z)


def _field_spec(a):
    zeros = (0,) * (a.ndim - 1)
    return pl.BlockSpec((1,) + a.shape[1:], lambda f, _z=zeros: (f,) + _z)


# ----------------------------------------------------------------------------
# Decoder forward
# ----------------------------------------------------------------------------
@jax.jit
def decoder_forward(weights, grid_pts, stride_pts, ff_params, knet_params):
    # ---- geometry preprocessing (layout plumbing only; cheap XLA elementwise) ---
    gx = grid_pts[:, 0]
    gy = grid_pts[:, 1]
    sx = stride_pts[0]
    sy = stride_pts[1]
    relx = gx[None, :] - sx[:, None]                  # [S, NPTS]  point - anchor
    rely = gy[None, :] - sy[:, None]
    inside = ((relx >= 0.0) & (relx <= FILTER_DIM[0]) &
              (rely >= 0.0) & (rely <= FILTER_DIM[1])).astype(jnp.float32)
    ux = relx * (1.0 / FILTER_DIM[0])                 # window -> unit square
    uy = rely * (1.0 / FILTER_DIM[1])

    def widen(a):                                     # [S, NPTS] -> [NG, TS*NPTS]
        # row g, lanes t*NPTS + n  <->  anchor s = g*TS + t, point n (group-contiguous)
        return a.reshape(NG, TS * NPTS)

    uxw, uyw, mkw = widen(ux), widen(uy), widen(inside)

    args = (weights, *ff_params, uxw, uyw, mkw, *knet_params)
    shared = args[:10]          # latent code, FF weights, geometry  (same for all fields)
    per_field = args[10:]       # stacked per-field kernel-net weights

    out = pl.pallas_call(
        _decoder_kernel,
        out_shape=jax.ShapeDtypeStruct((NF, B, NPTS), jnp.float32),
        grid=(NF,),
        in_specs=[_full_spec(a) for a in shared] + [_field_spec(a) for a in per_field],
        out_specs=pl.BlockSpec((1, B, NPTS), lambda f: (f, 0, 0)),
        scratch_shapes=[pltpu.VMEM((S, NPTS), jnp.float32)],
        compiler_params=pltpu.CompilerParams(dimension_semantics=("parallel",)),
    )(*args)
    return jnp.transpose(out, (1, 0, 2))              # [B, NF, NPTS]


# ----------------------------------------------------------------------------
# Deterministic parameter / input construction
# ----------------------------------------------------------------------------
def init_params(key):
    keys = jax.random.split(key, 5)

    def lin(k, fan_in, fan_out):
        w = jax.random.normal(k, (fan_in, fan_out), jnp.float32) / jnp.sqrt(
            jnp.float32(fan_in))
        b = jnp.zeros((1, fan_out), jnp.float32)
        return w, b

    w1, b1 = lin(keys[0], H, 120)
    w2, b2 = lin(keys[1], 120, 240)
    w3, b3 = lin(keys[2], 240, S)
    ff = (w1, b1, w2, b2, w3, b3)

    def kernel_net(k):
        k1, k2, k3 = jax.random.split(k, 3)
        kw1 = jax.random.normal(k1, (2, KH), jnp.float32) * 0.5
        kb1 = jnp.zeros((KH,), jnp.float32)
        kw2 = jax.random.normal(k2, (KH, KH), jnp.float32) / jnp.sqrt(jnp.float32(KH))
        kb2 = jnp.zeros((KH,), jnp.float32)
        kw3 = jax.random.normal(k3, (KH,), jnp.float32) / jnp.sqrt(jnp.float32(KH))
        kb3 = jnp.zeros((1,), jnp.float32)
        return kw1, kb1, kw2, kb2, kw3, kb3

    nets = [kernel_net(keys[3]), kernel_net(keys[4])]

    # Per-field kernel nets in channels-on-sublanes layout, stacked on a leading
    # field axis that the grid BlockSpecs slice:
    #   h1[j] = relu(W1[0,j]*ux + W1[1,j]*uy + b1[j])
    #   h2[k] = relu(sum_j W2[j,k]*h1[j] + b2[k])
    #   kval  = sum_k W3[k]*h2[k] + b3
    kn_w1 = jnp.stack([n[0].T for n in nets])             # [NF, KH, 2]
    kn_b1 = jnp.stack([n[1][:, None] for n in nets])      # [NF, KH, 1]
    kn_w2t = jnp.stack([n[2].T for n in nets])            # [NF, KH, KH]
    kn_b2 = jnp.stack([n[3][:, None] for n in nets])      # [NF, KH, 1]
    kn_w3 = jnp.stack([n[4][None, :] for n in nets])      # [NF, 1, KH]
    kn_b3 = jnp.stack([n[5][None, :] for n in nets])      # [NF, 1, 1]
    knet = (kn_w1, kn_b1, kn_w2t, kn_b2, kn_w3, kn_b3)
    return ff, knet


def circle_grid(n, key):
    """Points inside a unit-diameter circle centered at (0.5, 0.5). Returns [n, 2]."""
    k1, k2 = jax.random.split(key)
    r = 0.5 * jnp.sqrt(jax.random.uniform(k1, (n,), jnp.float32))
    theta = jax.random.uniform(k2, (n,), jnp.float32) * 2.0 * jnp.pi
    x = 0.5 + r * jnp.cos(theta)
    y = 0.5 + r * jnp.sin(theta)
    return jnp.stack([x, y], axis=-1)


def stride_positions():
    """400 filter anchors: start [0,0], jumps [0.05,0.05], domain [1,1]. Returns [2, S]."""
    xs = jnp.arange(SGRID, dtype=jnp.float32) * 0.05
    px, py = jnp.meshgrid(xs, xs, indexing="ij")
    return jnp.stack([px.reshape(-1), py.reshape(-1)], axis=0)


if __name__ == "__main__":
    key = jax.random.PRNGKey(0)
    k_params, k_grid, k_latent = jax.random.split(key, 3)

    ff_params, knet_params = init_params(k_params)
    grid_pts = circle_grid(NPTS, k_grid)          # [NPTS, 2]
    stride_pts = stride_positions()               # [2, S]
    weights = jax.random.normal(k_latent, (B, H), jnp.float32)

    out = decoder_forward(weights, grid_pts, stride_pts, ff_params, knet_params)
    out = jax.block_until_ready(out)

    assert out.shape == (B, NF, NPTS), out.shape
    assert bool(jnp.all(jnp.isfinite(out)))
    assert bool(jnp.all((out >= 0.0) & (out <= 1.0)))   # sigmoid range
    print("KERNEL_OK")
</pallas_src>

<mosaic_0001>
module attributes {stable_mosaic.version = 11 : i64} {
  func.func @_decoder_kernel(%arg0: i32, %arg1: memref<2x32xf32, #tpu.memory_space<vmem>>, %arg2: memref<32x120xf32, #tpu.memory_space<vmem>>, %arg3: memref<1x120xf32, #tpu.memory_space<vmem>>, %arg4: memref<120x240xf32, #tpu.memory_space<vmem>>, %arg5: memref<1x240xf32, #tpu.memory_space<vmem>>, %arg6: memref<240x400xf32, #tpu.memory_space<vmem>>, %arg7: memref<1x400xf32, #tpu.memory_space<vmem>>, %arg8: memref<10x5120xf32, #tpu.memory_space<vmem>>, %arg9: memref<10x5120xf32, #tpu.memory_space<vmem>>, %arg10: memref<10x5120xf32, #tpu.memory_space<vmem>>, %arg11: memref<1x20x2xf32, #tpu.memory_space<vmem>>, %arg12: memref<1x20x1xf32, #tpu.memory_space<vmem>>, %arg13: memref<1x20x20xf32, #tpu.memory_space<vmem>>, %arg14: memref<1x20x1xf32, #tpu.memory_space<vmem>>, %arg15: memref<1x1x20xf32, #tpu.memory_space<vmem>>, %arg16: memref<1x1x1xf32, #tpu.memory_space<vmem>>, %arg17: memref<1x2x128xf32, #tpu.memory_space<vmem>>, %arg18: memref<400x128xf32, #tpu.memory_space<vmem>>) attributes {dimension_semantics = [#tpu.dimension_semantics<parallel>], iteration_bounds = array<i64: 2>, scalar_prefetch = 0 : i64, scratch_operands = 1 : i64, tpu.core_type = #tpu.core_type<tc>, window_params = [{pipeline_mode = #tpu.pipeline_mode<synchronous>, transform_indices = @transform_0, window_bounds = array<i64: 2, 32>}, {pipeline_mode = #tpu.pipeline_mode<synchronous>, transform_indices = @transform_1, window_bounds = array<i64: 32, 120>}, {pipeline_mode = #tpu.pipeline_mode<synchronous>, transform_indices = @transform_2, window_bounds = array<i64: 1, 120>}, {pipeline_mode = #tpu.pipeline_mode<synchronous>, transform_indices = @transform_3, window_bounds = array<i64: 120, 240>}, {pipeline_mode = #tpu.pipeline_mode<synchronous>, transform_indices = @transform_4, window_bounds = array<i64: 1, 240>}, {pipeline_mode = #tpu.pipeline_mode<synchronous>, transform_indices = @transform_5, window_bounds = array<i64: 240, 400>}, {pipeline_mode = #tpu.pipeline_mode<synchronous>, transform_indices = @transform_6, window_bounds = array<i64: 1, 400>}, {pipeline_mode = #tpu.pipeline_mode<synchronous>, transform_indices = @transform_7, window_bounds = array<i64: 10, 5120>}, {pipeline_mode = #tpu.pipeline_mode<synchronous>, transform_indices = @transform_8, window_bounds = array<i64: 10, 5120>}, {pipeline_mode = #tpu.pipeline_mode<synchronous>, transform_indices = @transform_9, window_bounds = array<i64: 10, 5120>}, {transform_indices = @transform_10, window_bounds = array<i64: 1, 20, 2>}, {transform_indices = @transform_11, window_bounds = array<i64: 1, 20, 1>}, {transform_indices = @transform_12, window_bounds = array<i64: 1, 20, 20>}, {transform_indices = @transform_13, window_bounds = array<i64: 1, 20, 1>}, {transform_indices = @transform_14, window_bounds = array<i64: 1, 1, 20>}, {transform_indices = @transform_15, window_bounds = array<i64: 1, 1, 1>}, {transform_indices = @transform_16, window_bounds = array<i64: 1, 2, 128>}]} {
    %c0 = arith.constant 0 : index
    %c0_0 = arith.constant 0 : index
    %0 = vector.load %arg1[%c0, %c0_0] : memref<2x32xf32, #tpu.memory_space<vmem>>, vector<2x32xf32>
    %c0_1 = arith.constant 0 : index
    %c0_2 = arith.constant 0 : index
    %1 = vector.load %arg2[%c0_1, %c0_2] : memref<32x120xf32, #tpu.memory_space<vmem>>, vector<32x120xf32>
    %cst = arith.constant dense<0.000000e+00> : vector<2x120xf32>
    %2 = tpu.matmul %0, %1, %cst {dimension_numbers = #tpu.dot_dimension_numbers<[1], [0], [0], [1], [0, 0, 1, 1], [], []>} : vector<2x32xf32>, vector<32x120xf32>, vector<2x120xf32> -> vector<2x120xf32>
    %c0_3 = arith.constant 0 : index
    %c0_4 = arith.constant 0 : index
    %3 = vector.load %arg3[%c0_3, %c0_4] : memref<1x120xf32, #tpu.memory_space<vmem>>, vector<1x120xf32>
    %4 = vector.broadcast %3 : vector<1x120xf32> to vector<2x120xf32>
    %5 = arith.addf %2, %4 : vector<2x120xf32>
    %6 = math.tanh %5 : vector<2x120xf32>
    %c0_5 = arith.constant 0 : index
    %c0_6 = arith.constant 0 : index
    %7 = vector.load %arg4[%c0_5, %c0_6] : memref<120x240xf32, #tpu.memory_space<vmem>>, vector<120x240xf32>
    %cst_7 = arith.constant dense<0.000000e+00> : vector<2x240xf32>
    %8 = tpu.matmul %6, %7, %cst_7 {dimension_numbers = #tpu.dot_dimension_numbers<[1], [0], [0], [1], [0, 0, 1, 1], [], []>} : vector<2x120xf32>, vector<120x240xf32>, vector<2x240xf32> -> vector<2x240xf32>
    %c0_8 = arith.constant 0 : index
    %c0_9 = arith.constant 0 : index
    %9 = vector.load %arg5[%c0_8, %c0_9] : memref<1x240xf32, #tpu.memory_space<vmem>>, vector<1x240xf32>
    %10 = vector.broadcast %9 : vector<1x240xf32> to vector<2x240xf32>
    %11 = arith.addf %8, %10 : vector<2x240xf32>
    %12 = math.tanh %11 : vector<2x240xf32>
    %c0_10 = arith.constant 0 : index
    %c0_11 = arith.constant 0 : index
    %13 = vector.load %arg6[%c0_10, %c0_11] : memref<240x400xf32, #tpu.memory_space<vmem>>, vector<240x400xf32>
    %cst_12 = arith.constant dense<0.000000e+00> : vector<2x400xf32>
    %14 = tpu.matmul %12, %13, %cst_12 {dimension_numbers = #tpu.dot_dimension_numbers<[1], [0], [0], [1], [0, 0, 1, 1], [], []>} : vector<2x240xf32>, vector<240x400xf32>, vector<2x400xf32> -> vector<2x400xf32>
    %c0_13 = arith.constant 0 : index
    %c0_14 = arith.constant 0 : index
    %15 = vector.load %arg7[%c0_13, %c0_14] : memref<1x400xf32, #tpu.memory_space<vmem>>, vector<1x400xf32>
    %16 = vector.broadcast %15 : vector<1x400xf32> to vector<2x400xf32>
    %17 = arith.addf %14, %16 : vector<2x400xf32>
    %c0_15 = arith.constant 0 : index
    %c0_16 = arith.constant 0 : index
    %c0_17 = arith.constant 0 : index
    %18 = vector.load %arg11[%c0_15, %c0_16, %c0_17] : memref<1x20x2xf32, #tpu.memory_space<vmem>>, vector<1x20x2xf32>
    %19 = vector.shape_cast %18 : vector<1x20x2xf32> to vector<20x2xf32>
    %20 = vector.extract_strided_slice %19 {offsets = [0, 0], sizes = [20, 1], strides = [1, 1]} : vector<20x2xf32> to vector<20x1xf32>
    %21 = vector.extract_strided_slice %19 {offsets = [0, 1], sizes = [20, 1], strides = [1, 1]} : vector<20x2xf32> to vector<20x1xf32>
    %c0_18 = arith.constant 0 : index
    %c0_19 = arith.constant 0 : index
    %c0_20 = arith.constant 0 : index
    %22 = vector.load %arg12[%c0_18, %c0_19, %c0_20] : memref<1x20x1xf32, #tpu.memory_space<vmem>>, vector<1x20x1xf32>
    %23 = vector.shape_cast %22 : vector<1x20x1xf32> to vector<20x1xf32>
    %c0_21 = arith.constant 0 : index
    %c0_22 = arith.constant 0 : index
    %c0_23 = arith.constant 0 : index
    %24 = vector.load %arg13[%c0_21, %c0_22, %c0_23] : memref<1x20x20xf32, #tpu.memory_space<vmem>>, vector<1x20x20xf32>
    %25 = vector.shape_cast %24 : vector<1x20x20xf32> to vector<20x20xf32>
    %26 = arith.truncf %25 : vector<20x20xf32> to vector<20x20xbf16>
    %c0_24 = arith.constant 0 : index
    %c0_25 = arith.constant 0 : index
    %c0_26 = arith.constant 0 : index
    %27 = vector.load %arg14[%c0_24, %c0_25, %c0_26] : memref<1x20x1xf32, #tpu.memory_space<vmem>>, vector<1x20x1xf32>
    %28 = vector.shape_cast %27 : vector<1x20x1xf32> to vector<20x1xf32>
    %c0_27 = arith.constant 0 : index
    %c0_28 = arith.constant 0 : index
    %c0_29 = arith.constant 0 : index
    %29 = vector.load %arg15[%c0_27, %c0_28, %c0_29] : memref<1x1x20xf32, #tpu.memory_space<vmem>>, vector<1x1x20xf32>
    %30 = vector.shape_cast %29 : vector<1x1x20xf32> to vector<1x20xf32>
    %31 = arith.truncf %30 : vector<1x20xf32> to vector<1x20xbf16>
    %c0_30 = arith.constant 0 : index
    %c0_31 = arith.constant 0 : index
    %c0_32 = arith.constant 0 : index
    %32 = vector.load %arg16[%c0_30, %c0_31, %c0_32] : memref<1x1x1xf32, #tpu.memory_space<vmem>>, vector<1x1x1xf32>
    %33 = vector.shape_cast %32 : vector<1x1x1xf32> to vector<1x1xf32>
    %c0_i32 = arith.constant 0 : i32
    %c10_i32 = arith.constant 10 : i32
    %34 = arith.addi %c0_i32, %c10_i32 : i32
    %c1_i32 = arith.constant 1 : i32
    scf.for %arg19 = %c0_i32 to %34 step %c1_i32  : i32 {
      %c1_i32_43 = arith.constant 1 : i32
      %53 = arith.muli %arg19, %c1_i32_43 : i32
      %c0_i32_44 = arith.constant 0 : i32
      %54 = arith.addi %c0_i32_44, %53 : i32
      %55 = arith.index_cast %54 : i32 to index
      %c0_45 = arith.constant 0 : index
      %56 = vector.load %arg8[%55, %c0_45] : memref<10x5120xf32, #tpu.memory_space<vmem>>, vector<1x5120xf32>
      %57 = arith.index_cast %54 : i32 to index
      %c0_46 = arith.constant 0 : index
      %58 = vector.load %arg9[%57, %c0_46] : memref<10x5120xf32, #tpu.memory_space<vmem>>, vector<1x5120xf32>
      %59 = arith.index_cast %54 : i32 to index
      %c0_47 = arith.constant 0 : index
      %60 = vector.load %arg10[%59, %c0_47] : memref<10x5120xf32, #tpu.memory_space<vmem>>, vector<1x5120xf32>
      %61 = vector.broadcast %20 : vector<20x1xf32> to vector<20x5120xf32>
      %62 = vector.broadcast %56 : vector<1x5120xf32> to vector<20x5120xf32>
      %63 = arith.mulf %61, %62 : vector<20x5120xf32>
      %64 = vector.broadcast %21 : vector<20x1xf32> to vector<20x5120xf32>
      %65 = vector.broadcast %58 : vector<1x5120xf32> to vector<20x5120xf32>
      %66 = arith.mulf %64, %65 : vector<20x5120xf32>
      %67 = arith.addf %63, %66 : vector<20x5120xf32>
      %68 = vector.broadcast %23 : vector<20x1xf32> to vector<20x5120xf32>
      %69 = arith.addf %67, %68 : vector<20x5120xf32>
      %cst_48 = arith.constant 0.000000e+00 : f32
      %70 = vector.broadcast %cst_48 : f32 to vector<20x5120xf32>
      %71 = arith.maximumf %69, %70 : vector<20x5120xf32>
      %72 = arith.truncf %71 : vector<20x5120xf32> to vector<20x5120xbf16>
      %cst_49 = arith.constant dense<0.000000e+00> : vector<20x5120xf32>
      %73 = tpu.matmul %26, %72, %cst_49 {dimension_numbers = #tpu.dot_dimension_numbers<[1], [0], [0], [1], [0, 0, 1, 1], [], []>} : vector<20x20xbf16>, vector<20x5120xbf16>, vector<20x5120xf32> -> vector<20x5120xf32>
      %74 = vector.broadcast %28 : vector<20x1xf32> to vector<20x5120xf32>
      %75 = arith.addf %73, %74 : vector<20x5120xf32>
      %cst_50 = arith.constant 0.000000e+00 : f32
      %76 = vector.broadcast %cst_50 : f32 to vector<20x5120xf32>
      %77 = arith.maximumf %75, %76 : vector<20x5120xf32>
      %78 = arith.truncf %77 : vector<20x5120xf32> to vector<20x5120xbf16>
      %cst_51 = arith.constant dense<0.000000e+00> : vector<1x5120xf32>
      %79 = tpu.matmul %31, %78, %cst_51 {dimension_numbers = #tpu.dot_dimension_numbers<[1], [0], [0], [1], [0, 0, 1, 1], [], []>} : vector<1x20xbf16>, vector<20x5120xbf16>, vector<1x5120xf32> -> vector<1x5120xf32>
      %80 = vector.broadcast %33 : vector<1x1xf32> to vector<1x5120xf32>
      %81 = arith.addf %79, %80 : vector<1x5120xf32>
      %82 = arith.mulf %81, %60 : vector<1x5120xf32>
      %c40_i32 = arith.constant 40 : i32
      %83 = arith.muli %54, %c40_i32 : i32
      %84 = tpu.assume_multiple %83, 8 : i32
      %85 = vector.shape_cast %82 : vector<1x5120xf32> to vector<40x128xf32>
      %86 = arith.index_cast %84 : i32 to index
      %c0_52 = arith.constant 0 : index
      %87 = vector.load %arg18[%86, %c0_52] : memref<400x128xf32, #tpu.memory_space<vmem>>, vector<40x128xf32>
      tpu.vector_store %arg18[%86, %c0_52], %85 {strides = array<i32>} : memref<400x128xf32, #tpu.memory_space<vmem>>, vector<40x128xf32>,
    }
    %c10_i32_33 = arith.constant 10 : i32
    %35 = arith.truncf %17 : vector<2x400xf32> to vector<2x400xbf16>
    %c0_34 = arith.constant 0 : index
    %c0_35 = arith.constant 0 : index
    %36 = vector.load %arg18[%c0_34, %c0_35] : memref<400x128xf32, #tpu.memory_space<vmem>>, vector<400x128xf32>
    %37 = arith.truncf %36 : vector<400x128xf32> to vector<400x128xbf16>
    %cst_36 = arith.constant dense<0.000000e+00> : vector<2x128xf32>
    %38 = tpu.matmul %35, %37, %cst_36 {dimension_numbers = #tpu.dot_dimension_numbers<[1], [0], [0], [1], [0, 0, 1, 1], [], []>} : vector<2x400xbf16>, vector<400x128xbf16>, vector<2x128xf32> -> vector<2x128xf32>
    %39 = math.absf %38 : vector<2x128xf32>
    %cst_37 = arith.constant 0.000000e+00 : f32
    %40 = vector.broadcast %cst_37 : f32 to vector<2x128xf32>
    %41 = arith.subf %40, %39 : vector<2x128xf32>
    %42 = math.exp %41 : vector<2x128xf32>
    %cst_38 = arith.constant 1.000000e+00 : f32
    %43 = vector.broadcast %cst_38 : f32 to vector<2x128xf32>
    %44 = arith.addf %43, %42 : vector<2x128xf32>
    %45 = tpu.reciprocal %44 : vector<2x128xf32> -> vector<2x128xf32>
    %cst_39 = arith.constant 0.000000e+00 : f32
    %46 = vector.broadcast %cst_39 : f32 to vector<2x128xf32>
    %47 = arith.cmpf oge, %38, %46 : vector<2x128xf32>
    %48 = arith.mulf %42, %45 : vector<2x128xf32>
    %49 = arith.select %47, %45, %48 : vector<2x128xi1>, vector<2x128xf32>
    %c0_40 = arith.constant 0 : index
    %c0_41 = arith.constant 0 : index
    %c0_42 = arith.constant 0 : index
    %50 = vector.load %arg17[%c0_40, %c0_41, %c0_42] : memref<1x2x128xf32, #tpu.memory_space<vmem>>, vector<1x2x128xf32>
    %51 = vector.shape_cast %50 : vector<1x2x128xf32> to vector<2x128xf32>
    %52 = vector.shape_cast %49 : vector<2x128xf32> to vector<1x2x128xf32>
    tpu.vector_store %arg17[%c0_40, %c0_41, %c0_42], %52 {strides = array<i32>} : memref<1x2x128xf32, #tpu.memory_space<vmem>>, vector<1x2x128xf32>,
    return
  }
  func.func @transform_0(%arg0: i32) -> (i32, i32) {
    %c0_i32 = arith.constant 0 : i32
    %c0_i32_0 = arith.constant 0 : i32
    %c0_i32_1 = arith.constant 0 : i32
    return %c0_i32, %c0_i32_0 : i32, i32
  }
  func.func @transform_1(%arg0: i32) -> (i32, i32) {
    %c0_i32 = arith.constant 0 : i32
    %c0_i32_0 = arith.constant 0 : i32
    %c0_i32_1 = arith.constant 0 : i32
    return %c0_i32, %c0_i32_0 : i32, i32
  }
  func.func @transform_2(%arg0: i32) -> (i32, i32) {
    %c0_i32 = arith.constant 0 : i32
    %c0_i32_0 = arith.constant 0 : i32
    %c0_i32_1 = arith.constant 0 : i32
    return %c0_i32, %c0_i32_0 : i32, i32
  }
  func.func @transform_3(%arg0: i32) -> (i32, i32) {
    %c0_i32 = arith.constant 0 : i32
    %c0_i32_0 = arith.constant 0 : i32
    %c0_i32_1 = arith.constant 0 : i32
    return %c0_i32, %c0_i32_0 : i32, i32
  }
  func.func @transform_4(%arg0: i32) -> (i32, i32) {
    %c0_i32 = arith.constant 0 : i32
    %c0_i32_0 = arith.constant 0 : i32
    %c0_i32_1 = arith.constant 0 : i32
    return %c0_i32, %c0_i32_0 : i32, i32
  }
  func.func @transform_5(%arg0: i32) -> (i32, i32) {
    %c0_i32 = arith.constant 0 : i32
    %c0_i32_0 = arith.constant 0 : i32
    %c0_i32_1 = arith.constant 0 : i32
    return %c0_i32, %c0_i32_0 : i32, i32
  }
  func.func @transform_6(%arg0: i32) -> (i32, i32) {
    %c0_i32 = arith.constant 0 : i32
    %c0_i32_0 = arith.constant 0 : i32
    %c0_i32_1 = arith.constant 0 : i32
    return %c0_i32, %c0_i32_0 : i32, i32
  }
  func.func @transform_7(%arg0: i32) -> (i32, i32) {
    %c0_i32 = arith.constant 0 : i32
    %c0_i32_0 = arith.constant 0 : i32
    %c0_i32_1 = arith.constant 0 : i32
    return %c0_i32, %c0_i32_0 : i32, i32
  }
  func.func @transform_8(%arg0: i32) -> (i32, i32) {
    %c0_i32 = arith.constant 0 : i32
    %c0_i32_0 = arith.constant 0 : i32
    %c0_i32_1 = arith.constant 0 : i32
    return %c0_i32, %c0_i32_0 : i32, i32
  }
  func.func @transform_9(%arg0: i32) -> (i32, i32) {
    %c0_i32 = arith.constant 0 : i32
    %c0_i32_0 = arith.constant 0 : i32
    %c0_i32_1 = arith.constant 0 : i32
    return %c0_i32, %c0_i32_0 : i32, i32
  }
  func.func @transform_10(%arg0: i32) -> (i32, i32, i32) {
    %c0_i32 = arith.constant 0 : i32
    %c0_i32_0 = arith.constant 0 : i32
    %c0_i32_1 = arith.constant 0 : i32
    return %arg0, %c0_i32, %c0_i32_0 : i32, i32, i32
  }
  func.func @transform_11(%arg0: i32) -> (i32, i32, i32) {
    %c0_i32 = arith.constant 0 : i32
    %c0_i32_0 = arith.constant 0 : i32
    %c0_i32_1 = arith.constant 0 : i32
    return %arg0, %c0_i32, %c0_i32_0 : i32, i32, i32
  }
  func.func @transform_12(%arg0: i32) -> (i32, i32, i32) {
    %c0_i32 = arith.constant 0 : i32
    %c0_i32_0 = arith.constant 0 : i32
    %c0_i32_1 = arith.constant 0 : i32
    return %arg0, %c0_i32, %c0_i32_0 : i32, i32, i32
  }
  func.func @transform_13(%arg0: i32) -> (i32, i32, i32) {
    %c0_i32 = arith.constant 0 : i32
    %c0_i32_0 = arith.constant 0 : i32
    %c0_i32_1 = arith.constant 0 : i32
    return %arg0, %c0_i32, %c0_i32_0 : i32, i32, i32
  }
  func.func @transform_14(%arg0: i32) -> (i32, i32, i32) {
    %c0_i32 = arith.constant 0 : i32
    %c0_i32_0 = arith.constant 0 : i32
    %c0_i32_1 = arith.constant 0 : i32
    return %arg0, %c0_i32, %c0_i32_0 : i32, i32, i32
  }
  func.func @transform_15(%arg0: i32) -> (i32, i32, i32) {
    %c0_i32 = arith.constant 0 : i32
    %c0_i32_0 = arith.constant 0 : i32
    %c0_i32_1 = arith.constant 0 : i32
    return %arg0, %c0_i32, %c0_i32_0 : i32, i32, i32
  }
  func.func @transform_16(%arg0: i32) -> (i32, i32, i32) {
    %c0_i32 = arith.constant 0 : i32
    %c0_i32_0 = arith.constant 0 : i32
    %c0_i32_1 = arith.constant 0 : i32
    return %arg0, %c0_i32, %c0_i32_0 : i32, i32, i32
  }
}

</mosaic_0001>

<bundles_post_ra>
// kernel: decoder_forward.1
= control target key start
LH: loop header
LB: loop body
LE: loop exit
PB: predicated region body
PF: predicated region fallthrough
CT: control target
= control target key end

     0   :  { %s5889_s21 = smov 0   ;;  %s7892_s0 = inlined_call_operand.vmem [shape: f32[2,32], index: 0, kind: input, shape index: {}]   ;;  %s7893_s1 = inlined_call_operand.vmem [shape: f32[32,120], index: 1, kind: input, shape index: {}]   ;;  %s7894_s2 = inlined_call_operand.vmem [shape: f32[1,120], index: 2, kind: input, shape index: {}]   ;;  %s7895_s3 = inlined_call_operand.vmem [shape: f32[120,240], index: 3, kind: input, shape index: {}]   ;;  %s7896_s4 = inlined_call_operand.vmem [shape: f32[1,240], index: 4, kind: input, shape index: {}]   ;;  %s7897_s5 = inlined_call_operand.vmem [shape: f32[240,400], index: 5, kind: input, shape index: {}]   ;;  %s7898_s6 = inlined_call_operand.vmem [shape: f32[1,400], index: 6, kind: input, shape index: {}]   ;;  %s7899_s7 = inlined_call_operand.vmem [shape: f32[10,5120], index: 7, kind: input, shape index: {}]   ;;  %s7900_s8 = inlined_call_operand.vmem [shape: f32[10,5120], index: 8, kind: input, shape index: {}]   ;;  %s7901_s9 = inlined_call_operand.vmem [shape: f32[10,5120], index: 9, kind: input, shape index: {}]   ;;  %s7902_s10 = inlined_call_operand.vmem [shape: f32[2,20,2], index: 10, kind: input, shape index: {}]   ;;  %s7903_s11 = inlined_call_operand.vmem [shape: f32[2,20,1], index: 11, kind: input, shape index: {}]   ;;  %s7904_s12 = inlined_call_operand.vmem [shape: f32[2,20,20], index: 12, kind: input, shape index: {}]   ;;  %s7905_s13 = inlined_call_operand.vmem [shape: f32[2,20,1], index: 13, kind: input, shape index: {}]   ;;  %s7906_s14 = inlined_call_operand.vmem [shape: f32[2,1,20], index: 14, kind: input, shape index: {}]   ;;  %s7907_s15 = inlined_call_operand.vmem [shape: f32[2,1,1], index: 15, kind: input, shape index: {}]   ;;  %s7908_s16 = inlined_call_operand.vmem [shape: f32[2,2,128], index: 16, kind: output, shape index: {}]  }
   0x1   :  { %7981 = sst [smem:[#allocation70_spill]] %s7892_s0 }
   0x2   :  { %7982 = sst [smem:[#allocation71_spill]] %s7893_s1 }
   0x3   :  { %7983 = sst [smem:[#allocation72_spill]] %s7894_s2 }
   0x4   :  { %7984 = sst [smem:[#allocation73_spill]] %s7895_s3 }
   0x5   :  { %7985 = sst [smem:[#allocation74_spill]] %s7896_s4 }
   0x6 LB: > { %s5550_s22 = sadd.s32 4294967295, %s5792_s21   ;;  %p5554_p0 = scmp.ge.s32.totalorder %s5792_s21, 1  ;;  %s5792_s21 = sphi %s5889_s21, %s26_s21  }
   0x7   : > { %p508_p1 = scmp.lt.s32.totalorder %s5792_s21, 3 }
   0x9   : > { %p509_p2 = pnand %p5554_p0, %p508_p1 }
   0xb   : > { %512 = sbr.rel (%p509_p2) target bundleno = 1677 (0x68d), region = 84 }
  0x10   : > { %p578_p3 = scmp.lt.s32.totalorder %s5550_s22, 1  ;;  %s7986_s1 = sld [smem:[#allocation71_spill]]  ;;  %v5798_v1 = vmov 0.0   ;;  %vm5799_vm0 = vmmov 0   ;;  %vm621_vm1 = vcmask 261120   ;;  %v876_v36 = vld [vmem:[%s7897_s5 + $0x1e8] sm:$0xff] }
  0x11   : > { %5732 = vmatprep.subr.mxu0 %v5798_v1  ;;  %5740 = vmatprep.mubr.msk.f32.mxu0 %vm5799_vm0, %v5798_v1  ;;  %s7987_s3 = sld [smem:[#allocation73_spill]]  ;;  %v878_v37 = vld [vmem:[%s7897_s5 + $0x1f8] sm:$0xff]  ;;  %v875_v38 = vld [vmem:[%s7897_s5 + $0x1e0] sm:$0xff]  ;;  %v872_v39 = vld [vmem:[%s7897_s5 + $0x1c8] sm:$0xff]  ;;  %vm738_vm2 = vcmask 982016   ;;  %vm957_vm3 = vcmask 916480  }
  0x12   : > { %s8132_s22 = smov (!%p578_p3, %s5550_s22), 1  ;;  %s7988_s20 = sld [smem:[#allocation70_spill]]  ;;  %806 = vmatprep.mubr.f32.mxu1 %v5798_v1  ;;  %v871_v40 = vld [vmem:[%s7897_s5 + $0x1c0] sm:$0xff]  ;;  %v868_v41 = vld [vmem:[%s7897_s5 + $0x1a8] sm:$0xff] }
  0x13   : > { %s5559_s28 = sshll.u32 %s8132_s22, 1  ;;  %v867_v42 = vld [vmem:[%s7897_s5 + $0x1a0] sm:$0xff]  ;;  %v864_v43 = vld [vmem:[%s7897_s5 + $0x188] sm:$0xff]  ;;  %s7989_s2 = sld [smem:[#allocation72_spill]] }
  0x14   : > { %s5945_s30 = scalar_lea.vmem %s7908_s16, %s5559_s28  ;;  %v863_v44 = vld [vmem:[%s7897_s5 + $0x180] sm:$0xff]  ;;  %v860_v45 = vld [vmem:[%s7897_s5 + $0x168] sm:$0xff]  ;;  %s7992_s4 = sld [smem:[#allocation74_spill]] }
  0x15   : > { %v859_v46 = vld [vmem:[%s7897_s5 + $0x160] sm:$0xff]  ;;  %v856_v47 = vld [vmem:[%s7897_s5 + $0x148] sm:$0xff]  ;;  %s5743_s27 = smul.u32 24, %s8132_s22  ;;  %s600_s29 = scalar_lea.vmem %s7906_s14, %s8132_s22 }
  0x16   : > { %v613_v0 = vld [vmem:[%s7986_s1 + $0x18] sm:$0xff]  ;;  %v612_v2 = vld [vmem:[%s7986_s1 + $0x10] sm:$0xff]  ;;  %v611_v7 = vld [vmem:[%s7986_s1 + $0x8] sm:$0xff]  ;;  %s603_s18 = scalar_lea.vmem %s7907_s15, %s8132_s22 }
  0x17   : > { %v725_v3 = vld [vmem:[%s7987_s3 + $0xe8] sm:$0xff]  ;;  %5733 = vmatpush3.msra.mxu0 %v613_v0  ;;  %v724_v4 = vld [vmem:[%s7987_s3 + $0xe0] sm:$0xff]  ;;  %v723_v5 = vld [vmem:[%s7987_s3 + $0xd8] sm:$0xff]  ;;  %s592_s17 = scalar_lea.vmem %s7904_s12, %s5743_s27  ;;  %s587_s24 = scalar_lea.vmem %s7903_s11, %s5743_s27 }
  0x18   : > { %744 = vmatprep.subr.mxu1 %v725_v3  ;;  %v722_v6 = vld [vmem:[%s7987_s3 + $0xd0] sm:$0xff]  ;;  %5734 = vmatprep.subr.mxu0 %v5798_v1  ;;  %v721_v8 = vld [vmem:[%s7987_s3 + $0xc8] sm:$0xff]  ;;  %v720_v9 = vld [vmem:[%s7987_s3 + $0xc0] sm:$0xff] }
  0x19   : > { %745 = vmatpush1.msra.mxu1 %v724_v4  ;;  %5735 = vmatpush3.msra.mxu0 %v612_v2  ;;  %v610_v10 = vld [vmem:[%s7986_s1] sm:$0xff]  ;;  %v719_v11 = vld [vmem:[%s7987_s3 + $0xb8] sm:$0xff]  ;;  %v718_v13 = vld [vmem:[%s7987_s3 + $0xb0] sm:$0xff]  ;;  %s597_s1 = scalar_lea.vmem %s7905_s13, %s5743_s27 }
  0x1a   : > { %746 = vmatprep.subr.mxu1 %v723_v5  ;;  %5736 = vmatprep.subr.mxu0 %v5798_v1  ;;  %v609_v12 = vld [vmem:[%s7988_s20] sm:$0x3]  ;;  %v717_v14 = vld [vmem:[%s7987_s3 + $0xa8] sm:$0xff]  ;;  %v715_v16 = vld [vmem:[%s7987_s3 + $0x98] sm:$0xff]  ;;  %s582_s20 = scalar_lea.vmem %s7902_s10, %s5743_s27 }
  0x1b   : > { %747 = vmatpush1.msra.mxu1 %v722_v6  ;;  %5737 = vmatpush3.msra.mxu0 %v611_v7  ;;  %v716_v15 = vld [vmem:[%s7987_s3 + $0xa0] sm:$0xff]  ;;  %v714_v17 = vld [vmem:[%s7987_s3 + $0x90] sm:$0xff]  ;;  %v713_v18 = vld [vmem:[%s7987_s3 + $0x88] sm:$0xff] }
  0x1c   : > { %748 = vmatprep.subr.mxu1 %v721_v8  ;;  %5738 = vmatprep.subr.mxu0 %v5798_v1  ;;  %v712_v19 = vld [vmem:[%s7987_s3 + $0x80] sm:$0xff]  ;;  %v711_v20 = vld [vmem:[%s7987_s3 + $0x78] sm:$0xff]  ;;  %v710_v21 = vld [vmem:[%s7987_s3 + $0x70] sm:$0xff] }
  0x1d   : > { %749 = vmatpush1.msra.mxu1 %v720_v9  ;;  %5739 = vmatpush3.msra.mxu0 %v610_v10  ;;  %v709_v22 = vld [vmem:[%s7987_s3 + $0x68] sm:$0xff]  ;;  %v708_v23 = vld [vmem:[%s7987_s3 + $0x60] sm:$0xff]  ;;  %v707_v24 = vld [vmem:[%s7987_s3 + $0x58] sm:$0xff] }
  0x1e   : > { %750 = vmatprep.subr.mxu1 %v719_v11  ;;  %5741 = vmatmul.mubr.msk.f32.vlgmr.msra.gmra.mxu0 %vm621_vm1, %v609_v12  ;;  %v706_v25 = vld [vmem:[%s7987_s3 + $0x50] sm:$0xff]  ;;  %v705_v26 = vld [vmem:[%s7987_s3 + $0x48] sm:$0xff]  ;;  %v704_v27 = vld [vmem:[%s7987_s3 + $0x40] sm:$0xff] }
  0x1f   : > { %751 = vmatpush1.msra.mxu1 %v718_v13  ;;  %v703_v28 = vld [vmem:[%s7987_s3 + $0x38] sm:$0xff]  ;;  %v702_v29 = vld [vmem:[%s7987_s3 + $0x30] sm:$0xff]  ;;  %v701_v30 = vld [vmem:[%s7987_s3 + $0x28] sm:$0xff]  ;;  %961 = vmatprep.subr.mxu0 %v876_v36 }
  0x20   : > { %752 = vmatprep.subr.mxu1 %v717_v14  ;;  %v700_v31 = vld [vmem:[%s7987_s3 + $0x20] sm:$0xff]  ;;  %v699_v32 = vld [vmem:[%s7987_s3 + $0x18] sm:$0xff]  ;;  %v698_v33 = vld [vmem:[%s7987_s3 + $0x10] sm:$0xff]  ;;  %962 = vmatpush1.msra.mxu0 %v875_v38 }
  0x21   : > { %753 = vmatpush1.msra.mxu1 %v716_v15  ;;  %v697_v34 = vld [vmem:[%s7987_s3 + $0x8] sm:$0xff]  ;;  %v696_v35 = vld [vmem:[%s7987_s3] sm:$0xff]  ;;  %963 = vmatprep.subr.mxu0 %v872_v39  ;;  %v841_v36 = vld [vmem:[%s7897_s5 + $0xd0] sm:$0xff] }
  0x22   : > { %754 = vmatprep.subr.mxu1 %v715_v16  ;;  %964 = vmatpush1.msra.mxu0 %v871_v40  ;;  %v855_v48 = vld [vmem:[%s7897_s5 + $0x140] sm:$0xff]  ;;  %v852_v49 = vld [vmem:[%s7897_s5 + $0x128] sm:$0xff]  ;;  %v837_v38 = vld [vmem:[%s7897_s5 + $0xb0] sm:$0xff] }
  0x23   : > { %755 = vmatpush1.msra.mxu1 %v714_v17  ;;  %965 = vmatprep.subr.mxu0 %v868_v41  ;;  %v851_v50 = vld [vmem:[%s7897_s5 + $0x120] sm:$0xff]  ;;  %v848_v51 = vld [vmem:[%s7897_s5 + $0x108] sm:$0xff]  ;;  %v877_v17 = vld [vmem:[%s7897_s5 + $0x1f0] sm:$0xff] }
  0x24   : > { %756 = vmatprep.subr.mxu1 %v713_v18  ;;  %966 = vmatpush1.msra.mxu0 %v867_v42  ;;  %v847_v52 = vld [vmem:[%s7897_s5 + $0x100] sm:$0xff]  ;;  %v844_v53 = vld [vmem:[%s7897_s5 + $0xe8] sm:$0xff]  ;;  %v834_v39 = vld [vmem:[%s7897_s5 + $0x98] sm:$0xff] }
  0x25   : > { %757 = vmatpush1.msra.mxu1 %v712_v19  ;;  %967 = vmatprep.subr.mxu0 %v864_v43  ;;  %v843_v54 = vld [vmem:[%s7897_s5 + $0xe0] sm:$0xff]  ;;  %v840_v55 = vld [vmem:[%s7897_s5 + $0xc8] sm:$0xff]  ;;  %v874_v19 = vld [vmem:[%s7897_s5 + $0x1d8] sm:$0xff] }
  0x26   : > { %758 = vmatprep.subr.mxu1 %v711_v20  ;;  %968 = vmatpush1.msra.mxu0 %v863_v44  ;;  %v839_v56 = vld [vmem:[%s7897_s5 + $0xc0] sm:$0xff]  ;;  %v836_v57 = vld [vmem:[%s7897_s5 + $0xa8] sm:$0xff]  ;;  %v873_v20 = vld [vmem:[%s7897_s5 + $0x1d0] sm:$0xff] }
  0x27   : > { %759 = vmatpush1.msra.mxu1 %v710_v21  ;;  %969 = vmatprep.subr.mxu0 %v860_v45  ;;  %v835_v58 = vld [vmem:[%s7897_s5 + $0xa0] sm:$0xff]  ;;  %v832_v59 = vld [vmem:[%s7897_s5 + $0x88] sm:$0xff]  ;;  %v870_v21 = vld [vmem:[%s7897_s5 + $0x1b8] sm:$0xff] }
  0x28   : > { %760 = vmatprep.subr.mxu1 %v709_v22  ;;  %970 = vmatpush1.msra.mxu0 %v859_v46  ;;  %v831_v60 = vld [vmem:[%s7897_s5 + $0x80] sm:$0xff]  ;;  %v828_v61 = vld [vmem:[%s7897_s5 + $0x68] sm:$0xff]  ;;  %v869_v22 = vld [vmem:[%s7897_s5 + $0x1b0] sm:$0xff] }
  0x29   : > { %761 = vmatpush1.msra.mxu1 %v708_v23  ;;  %971 = vmatprep.subr.mxu0 %v856_v47  ;;  %v827_v62 = vld [vmem:[%s7897_s5 + $0x60] sm:$0xff]  ;;  %v824_v63 = vld [vmem:[%s7897_s5 + $0x48] sm:$0xff]  ;;  %v866_v23 = vld [vmem:[%s7897_s5 + $0x198] sm:$0xff] }
  0x2a   : > { %762 = vmatprep.subr.mxu1 %v707_v24  ;;  %972 = vmatpush1.msra.mxu0 %v855_v48  ;;  %v823_v0 = vld [vmem:[%s7897_s5 + $0x40] sm:$0xff]  ;;  %v820_v1 = vld [vmem:[%s7897_s5 + $0x28] sm:$0xff]  ;;  %v865_v24 = vld [vmem:[%s7897_s5 + $0x190] sm:$0xff] }
  0x2b   : > { %763 = vmatpush1.msra.mxu1 %v706_v25  ;;  %973 = vmatprep.subr.mxu0 %v852_v49  ;;  %v819_v2 = vld [vmem:[%s7897_s5 + $0x20] sm:$0xff]  ;;  %v816_v3 = vld [vmem:[%s7897_s5 + $0x8] sm:$0xff]  ;;  %v862_v25 = vld [vmem:[%s7897_s5 + $0x178] sm:$0xff] }
  0x2c   : > { %764 = vmatprep.subr.mxu1 %v705_v26  ;;  %974 = vmatpush1.msra.mxu0 %v851_v50  ;;  %v815_v4 = vld [vmem:[%s7897_s5] sm:$0xff]  ;;  %v932_v5 = vld [vmem:[%s7897_s5 + $0x3a8] sm:$0xff]  ;;  %v861_v26 = vld [vmem:[%s7897_s5 + $0x170] sm:$0xff] }
  0x2d   : > { %765 = vmatpush1.msra.mxu1 %v704_v27  ;;  %975 = vmatprep.subr.mxu0 %v848_v51  ;;  %v931_v6 = vld [vmem:[%s7897_s5 + $0x3a0] sm:$0xff]  ;;  %v928_v7 = vld [vmem:[%s7897_s5 + $0x388] sm:$0xff]  ;;  %v858_v27 = vld [vmem:[%s7897_s5 + $0x158] sm:$0xff] }
  0x2e   : > { %766 = vmatprep.subr.mxu1 %v703_v28  ;;  %976 = vmatpush1.msra.mxu0 %v847_v52  ;;  %v927_v8 = vld [vmem:[%s7897_s5 + $0x380] sm:$0xff]  ;;  %v924_v9 = vld [vmem:[%s7897_s5 + $0x368] sm:$0xff]  ;;  %v857_v28 = vld [vmem:[%s7897_s5 + $0x150] sm:$0xff] }
  0x2f   : > { %767 = vmatpush1.msra.mxu1 %v702_v29  ;;  %977 = vmatprep.subr.mxu0 %v844_v53  ;;  %v923_v10 = vld [vmem:[%s7897_s5 + $0x360] sm:$0xff]  ;;  %v920_v11 = vld [vmem:[%s7897_s5 + $0x348] sm:$0xff]  ;;  %v854_v29 = vld [vmem:[%s7897_s5 + $0x138] sm:$0xff] }
  0x30   : > { %768 = vmatprep.subr.mxu1 %v701_v30  ;;  %978 = vmatpush1.msra.mxu0 %v843_v54  ;;  %v919_v12 = vld [vmem:[%s7897_s5 + $0x340] sm:$0xff]  ;;  %v853_v30 = vld [vmem:[%s7897_s5 + $0x130] sm:$0xff]  ;;  %v830_v41 = vld [vmem:[%s7897_s5 + $0x78] sm:$0xff] }
  0x31   : > { %769 = vmatpush1.msra.mxu1 %v700_v31  ;;  %979 = vmatprep.subr.mxu0 %v840_v55  ;;  %v5560_v13 = vld [vmem:[%s7989_s2] ss:$0 sm:$0xff]  ;;  %v850_v31 = vld [vmem:[%s7897_s5 + $0x118] sm:$0xff]  ;;  %v833_v40 = vld [vmem:[%s7897_s5 + $0x90] sm:$0xff] }
  0x32   : > { %770 = vmatprep.subr.mxu1 %v699_v32  ;;  %980 = vmatpush1.msra.mxu0 %v839_v56  ;;  %v849_v32 = vld [vmem:[%s7897_s5 + $0x110] sm:$0xff]  ;;  %v826_v43 = vld [vmem:[%s7897_s5 + $0x58] sm:$0xff] }
  0x33   : > { %771 = vmatpush1.msra.mxu1 %v698_v33  ;;  %981 = vmatprep.subr.mxu0 %v836_v57  ;;  %v846_v33 = vld [vmem:[%s7897_s5 + $0xf8] sm:$0xff]  ;;  %v829_v42 = vld [vmem:[%s7897_s5 + $0x70] sm:$0xff]  ;;  %v916_v57 = vld [vmem:[%s7897_s5 + $0x328] sm:$0xff] }
  0x34   : > { %772 = vmatprep.subr.mxu1 %v697_v34  ;;  %982 = vmatpush1.msra.mxu0 %v835_v58  ;;  %v845_v34 = vld [vmem:[%s7897_s5 + $0xf0] sm:$0xff]  ;;  %v822_v45 = vld [vmem:[%s7897_s5 + $0x38] sm:$0xff] }
  0x35   : > { %773 = vmatpush1.msra.mxu1 %v696_v35  ;;  %983 = vmatprep.subr.mxu0 %v832_v59  ;;  %v842_v35 = vld [vmem:[%s7897_s5 + $0xd8] sm:$0xff]  ;;  %v825_v44 = vld [vmem:[%s7897_s5 + $0x50] sm:$0xff]  ;;  %v915_v59 = vld [vmem:[%s7897_s5 + $0x320] sm:$0xff] }
  0x36   : > { %1032 = vmatprep.subr.mxu1 %v878_v37  ;;  %984 = vmatpush1.msra.mxu0 %v831_v60  ;;  %v838_v37 = vld [vmem:[%s7897_s5 + $0xb8] sm:$0xff]  ;;  %v821_v46 = vld [vmem:[%s7897_s5 + $0x30] sm:$0xff] }
  0x37   : > { %985 = vmatprep.subr.mxu0 %v828_v61  ;;  %v818_v47 = vld [vmem:[%s7897_s5 + $0x18] sm:$0xff]  ;;  %v817_v48 = vld [vmem:[%s7897_s5 + $0x10] sm:$0xff]  ;;  %v912_v61 = vld [vmem:[%s7897_s5 + $0x308] sm:$0xff] }
  0x38   : > { %986 = vmatpush1.msra.mxu0 %v827_v62  ;;  %v934_v49 = vld [vmem:[%s7897_s5 + $0x3b8] sm:$0xff]  ;;  %v933_v50 = vld [vmem:[%s7897_s5 + $0x3b0] sm:$0xff] }
  0x39   : > { %987 = vmatprep.subr.mxu0 %v824_v63  ;;  %v930_v51 = vld [vmem:[%s7897_s5 + $0x398] sm:$0xff]  ;;  %v929_v52 = vld [vmem:[%s7897_s5 + $0x390] sm:$0xff]  ;;  %v911_v63 = vld [vmem:[%s7897_s5 + $0x300] sm:$0xff] }
  0x3a   : > { %988 = vmatpush1.msra.mxu0 %v823_v0  ;;  %v926_v53 = vld [vmem:[%s7897_s5 + $0x378] sm:$0xff]  ;;  %v925_v54 = vld [vmem:[%s7897_s5 + $0x370] sm:$0xff] }
  0x3b   : > { %989 = vmatprep.subr.mxu0 %v820_v1  ;;  %v922_v55 = vld [vmem:[%s7897_s5 + $0x358] sm:$0xff]  ;;  %v921_v56 = vld [vmem:[%s7897_s5 + $0x350] sm:$0xff]  ;;  %v908_v1 = vld [vmem:[%s7897_s5 + $0x2e8] sm:$0xff] }
  0x3c   : > { %990 = vmatpush1.msra.mxu0 %v819_v2  ;;  %v918_v58 = vld [vmem:[%s7897_s5 + $0x338] sm:$0xff]  ;;  %v917_v60 = vld [vmem:[%s7897_s5 + $0x330] sm:$0xff] }
  0x3d   : > { %991 = vmatprep.subr.mxu0 %v816_v3  ;;  %v914_v62 = vld [vmem:[%s7897_s5 + $0x318] sm:$0xff]  ;;  %v913_v0 = vld [vmem:[%s7897_s5 + $0x310] sm:$0xff]  ;;  %v907_v3 = vld [vmem:[%s7897_s5 + $0x2e0] sm:$0xff] }
  0x3e   : > { %992 = vmatpush1.msra.mxu0 %v815_v4  ;;  %v910_v2 = vld [vmem:[%s7897_s5 + $0x2f8] sm:$0xff]  ;;  %v909_v4 = vld [vmem:[%s7897_s5 + $0x2f0] sm:$0xff] }
  0x3f   : > { %997 = vmatprep.subr.mxu0 %v932_v5  ;;  %v904_v5 = vld [vmem:[%s7897_s5 + $0x2c8] sm:$0xff] }
  0x40   : > { %998 = vmatpush2.msra.mxu0 %v931_v6  ;;  %v906_v6 = vld [vmem:[%s7897_s5 + $0x2d8] sm:$0xff] }
  0x41   : > { %999 = vmatprep.subr.mxu0 %v928_v7  ;;  %v903_v7 = vld [vmem:[%s7897_s5 + $0x2c0] sm:$0xff] }
  0x42   : > { %1000 = vmatpush2.msra.mxu0 %v927_v8  ;;  %v905_v8 = vld [vmem:[%s7897_s5 + $0x2d0] sm:$0xff] }
  0x43   : > { %1001 = vmatprep.subr.mxu0 %v924_v9  ;;  %v900_v9 = vld [vmem:[%s7897_s5 + $0x2a8] sm:$0xff] }
  0x44   : > { %1002 = vmatpush2.msra.mxu0 %v923_v10  ;;  %v902_v10 = vld [vmem:[%s7897_s5 + $0x2b8] sm:$0xff] }
  0x45   : > { %1003 = vmatprep.subr.mxu0 %v920_v11  ;;  %v899_v11 = vld [vmem:[%s7897_s5 + $0x2a0] sm:$0xff] }
  0x46   : > { %1004 = vmatpush2.msra.mxu0 %v919_v12  ;;  %v901_v12 = vld [vmem:[%s7897_s5 + $0x2b0] sm:$0xff] }
  0x47   : > { %1005 = vmatprep.subr.mxu0 %v916_v57  ;;  %v6423_v57 = vld [vmem:[%s597_s1] sm:$0xff] }
  0x48   : > { %1006 = vmatpush2.msra.mxu0 %v915_v59  ;;  %8001 = vst [vmem:[#allocation13_spill] sm:$0xff] %v6423_v57  ;;  %v6427_v59 = vld [vmem:[%s597_s1 + $0x10] sm:$0xf] }
  0x49   : > { %1007 = vmatprep.subr.mxu0 %v912_v61  ;;  %8003 = vst [vmem:[#allocation15_spill] sm:$0xff] %v6427_v59  ;;  %v6429_v61 = vld [vmem:[%s603_s18] sm:$0x1] }
  0x4a   : > { %1008 = vmatpush2.msra.mxu0 %v911_v63  ;;  %8004 = vst [vmem:[#allocation16_spill] sm:$0xff] %v6429_v61 }
  0x4b   : > { %1009 = vmatprep.subr.mxu0 %v908_v1 }
  0x4c   : > { %1010 = vmatpush2.msra.mxu0 %v907_v3 }
  0x4d   : > { %1011 = vmatprep.subr.mxu0 %v904_v5 }
  0x4e   : > { %1012 = vmatpush2.msra.mxu0 %v903_v7 }
  0x4f   : > { %1013 = vmatprep.subr.mxu0 %v900_v9 }
  0x50   : > { %1014 = vmatpush2.msra.mxu0 %v899_v11 }
  0xde   : > { %v691_v14 = vpop.f32.mrf.mxu0 }
  0xdf   : > { %v692_v15 = vadd.f32 %v5560_v13, %v691_v14  ;;  %v896_v13 = vld [vmem:[%s7897_s5 + $0x288] sm:$0xff]  ;;  %v898_v14 = vld [vmem:[%s7897_s5 + $0x298] sm:$0xff] }
  0xe0   : > { %v5742_v16 = vpop.f32.mrf.mxu0  ;;  %1015 = vmatprep.subr.mxu0 %v896_v13 }
  0xe1   : > { %5766 = vtanh.f32 %v692_v15  ;;  %v895_v15 = vld [vmem:[%s7897_s5 + $0x280] sm:$0xff]  ;;  %v897_v16 = vld [vmem:[%s7897_s5 + $0x290] sm:$0xff] }
  0xe2   : > { %1016 = vmatpush2.msra.mxu0 %v895_v15 }
  0xee   : > { %v5767_v18 = vpop.eup %5766 }
  0xef   : > { %5562 = vmatmul.mubr.msk.f32.vlgmr.msra.gmra.mxu1 %vm738_vm2, %v5767_v18  ;;  %v894_v18 = vld [vmem:[%s7897_s5 + $0x278] sm:$0xff] }
  0xf0   : > { %1033 = vmatpush1.msra.mxu1 %v877_v17  ;;  %v892_v17 = vld [vmem:[%s7897_s5 + $0x268] sm:$0xff] }
  0xf1   : > { %1034 = vmatprep.subr.mxu1 %v874_v19  ;;  %v891_v19 = vld [vmem:[%s7897_s5 + $0x260] sm:$0xff]  ;;  %1017 = vmatprep.subr.mxu0 %v892_v17 }
  0xf2   : > { %1035 = vmatpush1.msra.mxu1 %v873_v20  ;;  %v893_v20 = vld [vmem:[%s7897_s5 + $0x270] sm:$0xff]  ;;  %1018 = vmatpush2.msra.mxu0 %v891_v19 }
  0xf3   : > { %1036 = vmatprep.subr.mxu1 %v870_v21  ;;  %v888_v21 = vld [vmem:[%s7897_s5 + $0x248] sm:$0xff] }
  0xf4   : > { %1037 = vmatpush1.msra.mxu1 %v869_v22  ;;  %v890_v22 = vld [vmem:[%s7897_s5 + $0x258] sm:$0xff]  ;;  %1019 = vmatprep.subr.mxu0 %v888_v21 }
  0xf5   : > { %1038 = vmatprep.subr.mxu1 %v866_v23  ;;  %v887_v23 = vld [vmem:[%s7897_s5 + $0x240] sm:$0xff] }
  0xf6   : > { %1039 = vmatpush1.msra.mxu1 %v865_v24  ;;  %v889_v24 = vld [vmem:[%s7897_s5 + $0x250] sm:$0xff]  ;;  %1020 = vmatpush2.msra.mxu0 %v887_v23 }
  0xf7   : > { %1040 = vmatprep.subr.mxu1 %v862_v25  ;;  %v884_v25 = vld [vmem:[%s7897_s5 + $0x228] sm:$0xff] }
  0xf8   : > { %1041 = vmatpush1.msra.mxu1 %v861_v26  ;;  %v886_v26 = vld [vmem:[%s7897_s5 + $0x238] sm:$0xff]  ;;  %1021 = vmatprep.subr.mxu0 %v884_v25 }
  0xf9   : > { %1042 = vmatprep.subr.mxu1 %v858_v27  ;;  %v883_v27 = vld [vmem:[%s7897_s5 + $0x220] sm:$0xff] }
  0xfa   : > { %1043 = vmatpush1.msra.mxu1 %v857_v28  ;;  %v885_v28 = vld [vmem:[%s7897_s5 + $0x230] sm:$0xff]  ;;  %1022 = vmatpush2.msra.mxu0 %v883_v27 }
  0xfb   : > { %1044 = vmatprep.subr.mxu1 %v854_v29  ;;  %v880_v29 = vld [vmem:[%s7897_s5 + $0x208] sm:$0xff] }
  0xfc   : > { %1045 = vmatpush1.msra.mxu1 %v853_v30  ;;  %v882_v30 = vld [vmem:[%s7897_s5 + $0x218] sm:$0xff]  ;;  %1023 = vmatprep.subr.mxu0 %v880_v29 }
  0xfd   : > { %1046 = vmatprep.subr.mxu1 %v850_v31  ;;  %v879_v31 = vld [vmem:[%s7897_s5 + $0x200] sm:$0xff] }
  0xfe   : > { %1047 = vmatpush1.msra.mxu1 %v849_v32  ;;  %v881_v32 = vld [vmem:[%s7897_s5 + $0x210] sm:$0xff]  ;;  %1024 = vmatpush2.msra.mxu0 %v879_v31 }
  0xff   : > { %1048 = vmatprep.subr.mxu1 %v846_v33  ;;  %v728_v33 = vlaneseq }
 0x100   : > { %1049 = vmatpush1.msra.mxu1 %v845_v34 }
 0x101   : > { %1050 = vmatprep.subr.mxu1 %v842_v35  ;;  %v6373_v34 = vshrl.u32 %v728_v33, 7 }
 0x102   : > { %1051 = vmatpush1.msra.mxu1 %v841_v36  ;;  %v726_v36 = vld [vmem:[%s7992_s4] sm:$0x3] }
 0x103   : > { %1052 = vmatprep.subr.mxu1 %v838_v37  ;;  %7990 = vst [vmem:[#allocation3_spill] sm:$0xff] %v6373_v34  ;;  %v6376_v35 = vsub.s32 0, %v6373_v34  ;;  %v6382_v37 = vsub.s32 1, %v6373_v34  ;;  %v6434_v63 = vsub.s32 2, %v6373_v34  ;;  %v6440_v1 = vsub.s32 3, %v6373_v34 }
 0x104   : > { %1053 = vmatpush1.msra.mxu1 %v837_v38 }
 0x105   : > { %1054 = vmatprep.subr.mxu1 %v834_v39  ;;  %7991 = vst [vmem:[#allocation4_spill] sm:$0xff] %v6376_v35  ;;  %7993 = vst [vmem:[#allocation5_spill] sm:$0xff] %v6382_v37  ;;  %v731_v38 = vrot.slane %v726_v36, %v6376_v35  ;;  %v735_v39 = vrot.slane %v726_v36, %v6382_v37 }
 0x106   : > { %1055 = vmatpush1.msra.mxu1 %v833_v40  ;;  %8006 = vst [vmem:[#allocation18_spill] sm:$0xff] %v6434_v63  ;;  %8007 = vst [vmem:[#allocation19_spill] sm:$0xff] %v6440_v1 }
 0x107   : > { %1056 = vmatprep.subr.mxu1 %v830_v41 }
 0x108   : > { %1057 = vmatpush1.msra.mxu1 %v829_v42 }
 0x109   : > { %1058 = vmatprep.subr.mxu1 %v826_v43 }
 0x10a   : > { %1059 = vmatpush1.msra.mxu1 %v825_v44 }
 0x10b   : > { %1060 = vmatprep.subr.mxu1 %v822_v45 }
 0x10c   : > { %1061 = vmatpush1.msra.mxu1 %v821_v46  ;;  %v1109_v46 = vld [vmem:[%s592_s17] sm:$0xff] }
 0x10d   : > { %1062 = vmatprep.subr.mxu1 %v818_v47  ;;  %v1110_v47 = vld [vmem:[%s592_s17 + $0x8] sm:$0xff] }
 0x10e   : > { %1063 = vmatpush1.msra.mxu1 %v817_v48  ;;  %v1111_v48 = vld [vmem:[%s592_s17 + $0x10] sm:$0xf] }
 0x10f   : > { %1068 = vmatprep.subr.mxu1 %v934_v49  ;;  %v6407_v49 = vld [vmem:[%s582_s20] sm:$0xff] }
 0x110   : > { %1069 = vmatpush2.msra.mxu1 %v933_v50  ;;  %7994 = vst [vmem:[#allocation6_spill] sm:$0xff] %v6407_v49  ;;  %v6409_v50 = vld [vmem:[%s582_s20 + $0x8] sm:$0xff] }
 0x111   : > { %1070 = vmatprep.subr.mxu1 %v930_v51  ;;  %7995 = vst [vmem:[#allocation7_spill] sm:$0xff] %v6409_v50  ;;  %v6411_v51 = vld [vmem:[%s582_s20 + $0x10] sm:$0xf] }
 0x112   : > { %1071 = vmatpush2.msra.mxu1 %v929_v52  ;;  %7996 = vst [vmem:[#allocation8_spill] sm:$0xff] %v6411_v51  ;;  %v6413_v52 = vpack.c.bf16 %v1110_v47, %v1109_v46 }
 0x113   : > { %1072 = vmatprep.subr.mxu1 %v926_v53  ;;  %v6415_v53 = vpack.c.bf16 %v1111_v48, %v1111_v48 }
 0x114   : > { %1073 = vmatpush2.msra.mxu1 %v925_v54  ;;  %v6417_v54 = vld [vmem:[%s587_s24] sm:$0xff] }
 0x115   : > { %1074 = vmatprep.subr.mxu1 %v922_v55  ;;  %7997 = vst [vmem:[#allocation9_spill] sm:$0xff] %v6415_v53  ;;  %7998 = vst [vmem:[#allocation10_spill] sm:$0xff] %v6417_v54  ;;  %v6419_v55 = vld [vmem:[%s587_s24 + $0x8] sm:$0xff] }
 0x116   : > { %1075 = vmatpush2.msra.mxu1 %v921_v56  ;;  %7999 = vst [vmem:[#allocation11_spill] sm:$0xff] %v6419_v55  ;;  %v6421_v56 = vld [vmem:[%s587_s24 + $0x10] sm:$0xf] }
 0x117   : > { %1076 = vmatprep.subr.mxu1 %v918_v58  ;;  %8000 = vst [vmem:[#allocation12_spill] sm:$0xff] %v6421_v56  ;;  %v6425_v58 = vld [vmem:[%s597_s1 + $0x8] sm:$0xff]  ;;  %s6454_s1 = smov 0  }
 0x118   : > { %1077 = vmatpush2.msra.mxu1 %v917_v60  ;;  %8002 = vst [vmem:[#allocation14_spill] sm:$0xff] %v6425_v58  ;;  %v1117_v60 = vld [vmem:[%s600_s29] sm:$0x1] }
 0x119   : > { %1078 = vmatprep.subr.mxu1 %v914_v62  ;;  %v6431_v62 = vpack.c.bf16 %v1117_v60, %v1117_v60 }
 0x11a   : > { %1079 = vmatpush2.msra.mxu1 %v913_v0  ;;  %v935_v0 = vld [vmem:[%s7898_s6] sm:$0xf] }
 0x11b   : > { %1080 = vmatprep.subr.mxu1 %v910_v2  ;;  %8005 = vst [vmem:[#allocation17_spill] sm:$0xff] %v6431_v62  ;;  %v940_v2 = vrot.slane %v935_v0, %v6376_v35  ;;  %v948_v3 = vrot.slane %v935_v0, %v6434_v63  ;;  %v952_v5 = vrot.slane %v935_v0, %v6440_v1 }
 0x11c   : > { %1081 = vmatpush2.msra.mxu1 %v909_v4  ;;  %v944_v4 = vrot.slane %v935_v0, %v6382_v37 }
 0x11d   : > { %1082 = vmatprep.subr.mxu1 %v906_v6 }
 0x11e   : > { %1083 = vmatpush2.msra.mxu1 %v905_v8 }
 0x11f   : > { %1084 = vmatprep.subr.mxu1 %v902_v10 }
 0x120   : > { %1085 = vmatpush2.msra.mxu1 %v901_v12 }
 0x121   : > { %1086 = vmatprep.subr.mxu1 %v898_v14 }
 0x122   : > { %1087 = vmatpush2.msra.mxu1 %v897_v16 }
 0x123   : > { %1088 = vmatprep.subr.mxu1 %v894_v18 }
 0x124   : > { %1089 = vmatpush2.msra.mxu1 %v893_v20 }
 0x125   : > { %1090 = vmatprep.subr.mxu1 %v890_v22 }
 0x126   : > { %1091 = vmatpush2.msra.mxu1 %v889_v24 }
 0x127   : > { %1092 = vmatprep.subr.mxu1 %v886_v26 }
 0x128   : > { %1093 = vmatpush2.msra.mxu1 %v885_v28 }
 0x129   : > { %1094 = vmatprep.subr.mxu1 %v882_v30 }
 0x12a   : > { %1095 = vmatpush2.msra.mxu1 %v881_v32 }
 0x1af   : > { %v808_v40 = vpop.f32.mrf.mxu1 }
 0x1b0   : > { %v809_v41 = vadd.f32 %v808_v40, %v731_v38 }
 0x1b1   : > { %v810_v42 = vpop.f32.mrf.mxu1 }
 0x1b2   : > { %v811_v43 = vadd.f32 %v810_v42, %v735_v39 }
 0x1b4   : > { %5768 = vtanh.f32 %v811_v43 }
 0x1b5   : > { %5770 = vtanh.f32 %v809_v41 }
 0x1c1   : > { %v5769_v44 = vpop.eup %5768 }
 0x1c2   : > { %v5771_v45 = vpop.eup %5770  ;;  %5563 = vmatprep.mubr.msk.f32.mxu0 %vm957_vm3, %v5769_v44  ;;  %5564 = vmatprep.mubr.msk.f32.mxu1 %vm957_vm3, %v5769_v44 }
 0x1c3   : > { %1026 = vmatmul.mubr.f32.vlgmr.msra.gmra.mxu0 %v5771_v45  ;;  %1097 = vmatmul.mubr.f32.vlgmr.msra.gmra.mxu1 %v5771_v45 }
 0x283   : > { %v1027_v6 = vpop.f32.mrf.mxu0  ;;  %v1098_v7 = vpop.f32.mrf.mxu1 }
 0x284   : > { %v6446_v8 = vadd.f32 %v1027_v6, %v940_v2  ;;  %v6448_v9 = vadd.f32 %v1098_v7, %v948_v3 }
 0x285   : > { %v1029_v10 = vpop.f32.mrf.mxu0  ;;  %v1100_v11 = vpop.f32.mrf.mxu1 }
 0x286   : > { %8008 = vst [vmem:[#allocation20_spill] sm:$0xff] %v6446_v8  ;;  %8009 = vst [vmem:[#allocation21_spill] sm:$0xff] %v6448_v9  ;;  %v6450_v12 = vadd.f32 %v1029_v10, %v944_v4  ;;  %v6452_v13 = vadd.f32 %v1100_v11, %v952_v5 }
 0x288   : > { %8010 = vst [vmem:[#allocation22_spill] sm:$0xff] %v6450_v12  ;;  %8011 = vst [vmem:[#allocation23_spill] sm:$0xff] %v6452_v13 }
 0x289 LB: >> { %v8012_v63 = vld [vmem:[#allocation18_spill] sm:$0xff]  ;;  %v8013_v35 = vld [vmem:[#allocation4_spill] sm:$0xff]  ;;  %v8014_v1 = vld [vmem:[#allocation19_spill] sm:$0xff]  ;;  %v7909_v14 = vmov 0   ;;  %v5801_v15 = vmov 1   ;;  %s1126_s4 = sshra.s32 %s5796_s1, 3  ;;  %s5796_s1 = sphi %s6454_s1, %s1125_s1  }
 0x28a   : >> { %v8015_v37 = vld [vmem:[#allocation5_spill] sm:$0xff]  ;;  %v8016_v34 = vld [vmem:[#allocation3_spill] sm:$0xff]  ;;  %v8017_v51 = vld [vmem:[#allocation8_spill] sm:$0xff]  ;;  %5774 = vset.pattern.permute.xlu1 %v7909_v14  ;;  %5772 = vset.pattern.permute.xlu0 %v7909_v14  ;;  %s5565_s22 = smul.u32 320, %s1126_s4  ;;  %s1129_s27 = sand.u32 7, %s5796_s1  ;;  %vm2359_vm4 = vcmask 1041408  }
 0x28b   : >> { %v8018_v50 = vld [vmem:[#allocation7_spill] sm:$0xff]  ;;  %v8019_v49 = vld [vmem:[#allocation6_spill] sm:$0xff]  ;;  %1217 = vperm.xlu0 %5772, %v8017_v51   ;;  %2512 = vmatprep.mubr.bf16.mxu0 %v7909_v14  ;;  %v8020_v56 = vld [vmem:[#allocation12_spill] sm:$0xff]  ;;  %v6499_v21 = vsub.s32 5, %v8016_v34  ;;  %v6502_v22 = vsub.s32 7, %v8016_v34  ;;  %v6512_v29 = vsub.s32 4, %v8016_v34 }
 0x28c   : >> { %1207 = vperm.xlu1 %5774, %v8019_v49   ;;  %2563 = vmatprep.mubr.bf16.mxu1 %v7909_v14  ;;  %v8021_v54 = vld [vmem:[#allocation10_spill] sm:$0xff]  ;;  %v8022_v55 = vld [vmem:[#allocation11_spill] sm:$0xff]  ;;  %v8023_v57 = vld [vmem:[#allocation13_spill] sm:$0xff]  ;;  %s6480_s17 = sadd.s32 %s5565_s22, %s1129_s27  ;;  %v6515_v30 = vsub.s32 6, %v8016_v34  ;;  %vm2352_vm5 = vcmask 162816   ;;  %s4897_s18 = smul.u32 40, %s5796_s1 }
 0x28d   : >> { %v8024_v59 = vld [vmem:[#allocation15_spill] sm:$0xff]  ;;  %v8025_v61 = vld [vmem:[#allocation16_spill] sm:$0xff]  ;;  %v8026_v58 = vld [vmem:[#allocation14_spill] sm:$0xff]  ;;  %s6486_s23 = scalar_lea.vmem %s7899_s7, %s6480_s17  ;;  %s6492_s25 = scalar_lea.vmem %s7900_s8, %s6480_s17  ;;  %8027 = vst [vmem:[#allocation24_spill] sm:$0xff] %v6499_v21 }
 0x28e   : >> { %v1134_v16 = vld [vmem:[%s6486_s23] ss:$8 sm:$0xf]  ;;  %8028 = vst [vmem:[#allocation25_spill] sm:$0xff] %v6502_v22  ;;  %8029 = vst [vmem:[#allocation26_spill] sm:$0xff] %v6512_v29  ;;  %s7732_s0 = scalar_lea.vmem %s7901_s9, %s6480_s17  ;;  %s7765_s2 = scalar_lea.vmem [#allocation2], %s4897_s18 }
 0x28f   : >> { %5773 = vset.pattern.permute.xlu0 %v5801_v15  ;;  %v1135_v17 = vld [vmem:[%s6486_s23] ss:$8 sm:$0xf0]  ;;  %8030 = vst [vmem:[#allocation27_spill] sm:$0xff] %v6515_v30  ;;  %s1125_s1 = sadd.s32 1, %s5796_s1  }
 0x290   : >> { %1212 = vperm.xlu1 %5774, %v8018_v50   ;;  %1554 = vperm.xlu0 %5773, %v8017_v51   ;;  %v1166_v18 = vld [vmem:[%s6492_s25] ss:$8 sm:$0xf]  ;;  %v1136_v20 = vor.u32 %v1135_v17, %v1134_v16  ;;  %p1122_p4 = scmp.ge.s32.totalorder %s1125_s1, 10  }
 0x291   : >> { %v1167_v19 = vld [vmem:[%s6492_s25] ss:$8 sm:$0xf0]  ;;  %vm5273_vm6 = vcmask (%p1122_p4), 130048  }
 0x292   : >> { %v1168_v23 = vor.u32 %v1167_v19, %v1166_v18  ;;  %v5567_v24 = vld [vmem:[%s6486_s23 + $0x40] ss:$8 sm:$0xf]  ;;  %v6509_v28 = vrot.slane %v1136_v20, %v8015_v37  ;;  %v6518_v31 = vrot.slane %v1136_v20, %v8014_v1  ;;  %v6521_v32 = vrot.slane %v1136_v20, %v8013_v35 }
 0x293   : >> { %v5568_v25 = vld [vmem:[%s6486_s23 + $0x40] ss:$8 sm:$0xf0]  ;;  %v6524_v33 = vrot.slane %v1136_v20, %v8012_v63  ;;  %v6541_v45 = vrot.slane %v1136_v20, %v6499_v21  ;;  %v6547_v47 = vrot.slane %v1136_v20, %v6502_v22  ;;  %v6553_v60 = vrot.slane %v1136_v20, %v6512_v29 }
 0x294   : >> { %5775 = vset.pattern.permute.xlu1 %v5801_v15  ;;  %1550 = vperm.xlu0 %5773, %v8018_v50   ;;  %v5579_v26 = vld [vmem:[%s6492_s25 + $0x40] ss:$8 sm:$0xf]  ;;  %v1143_v36 = vor.u32 %v5568_v25, %v5567_v24  ;;  %v6527_v38 = vrot.slane %v1168_v23, %v8015_v37  ;;  %v6530_v39 = vrot.slane %v1168_v23, %v8014_v1 }
 0x295   : >> { %1546 = vperm.xlu1 %5775, %v8019_v49   ;;  %v5580_v27 = vld [vmem:[%s6492_s25 + $0x40] ss:$8 sm:$0xf0]  ;;  %v6533_v40 = vrot.slane %v1168_v23, %v8013_v35  ;;  %v6538_v44 = vrot.slane %v1168_v23, %v8012_v63  ;;  %v6544_v46 = vrot.slane %v1168_v23, %v6499_v21  ;;  %v6550_v48 = vrot.slane %v1168_v23, %v6502_v22 }
 0x296   : >> { %v1172_v41 = vor.u32 %v5580_v27, %v5579_v26  ;;  %v5570_v42 = vld [vmem:[%s6486_s23 + $0x80] ss:$8 sm:$0xf]  ;;  %v6556_v0 = vrot.slane %v1168_v23, %v6512_v29  ;;  %v6559_v2 = vrot.slane %v1136_v20, %v6515_v30  ;;  %v6564_v5 = vrot.slane %v1168_v23, %v6515_v30 }
 0x297   : >> { %v5571_v43 = vld [vmem:[%s6486_s23 + $0x80] ss:$8 sm:$0xf0]  ;;  %v6567_v6 = vrot.slane %v1143_v36, %v8015_v37  ;;  %v6570_v7 = vrot.slane %v1143_v36, %v8014_v1  ;;  %v6579_v16 = vrot.slane %v1143_v36, %v8013_v35  ;;  %v6582_v17 = vrot.slane %v1143_v36, %v8012_v63 }
 0x298   : >> { %5777 = vset.pattern.permute.xlu0 %v7909_v14  ;;  %v5582_v3 = vld [vmem:[%s6492_s25 + $0x80] ss:$8 sm:$0xf]  ;;  %v1150_v10 = vor.u32 %v5571_v43, %v5570_v42  ;;  %v6573_v11 = vrot.slane %v1172_v41, %v8015_v37  ;;  %v6576_v15 = vrot.slane %v1172_v41, %v8014_v1  ;;  %v6585_v18 = vrot.slane %v1172_v41, %v8013_v35 }
 0x299   : >> { %5776 = vset.pattern.permute.xlu1 %v7909_v14  ;;  %2004 = vperm.xlu0 %5777, %v8021_v54   ;;  %v5583_v4 = vld [vmem:[%s6492_s25 + $0x80] ss:$8 sm:$0xf0]  ;;  %v6588_v19 = vrot.slane %v1172_v41, %v8012_v63  ;;  %v6591_v20 = vrot.slane %v1143_v36, %v6499_v21  ;;  %v6596_v26 = vrot.slane %v1172_v41, %v6499_v21 }
 0x29a   : >> { %2014 = vperm.xlu1 %5776, %v8020_v56   ;;  %v1176_v23 = vor.u32 %v5583_v4, %v5582_v3  ;;  %v5573_v24 = vld [vmem:[%s6486_s23 + $0xc0] ss:$8 sm:$0xf]  ;;  %v6599_v27 = vrot.slane %v1143_v36, %v6502_v22  ;;  %v6602_v42 = vrot.slane %v1143_v36, %v6512_v29  ;;  %v6605_v43 = vrot.slane %v1143_v36, %v6515_v30 }
 0x29b   : >> { %8031 = vst [vmem:[#allocation28_spill] sm:$0xff] %v6588_v19  ;;  %8032 = vst [vmem:[#allocation29_spill] sm:$0xff] %v6591_v20  ;;  %v5574_v25 = vld [vmem:[%s6486_s23 + $0xc0] ss:$8 sm:$0xf0]  ;;  %v6610_v50 = vrot.slane %v1172_v41, %v6502_v22  ;;  %v6613_v3 = vrot.slane %v1172_v41, %v6512_v29  ;;  %v6616_v4 = vrot.slane %v1172_v41, %v6515_v30 }
 0x29c   : >> { %8033 = vst [vmem:[#allocation30_spill] sm:$0xff] %v6596_v26  ;;  %8034 = vst [vmem:[#allocation31_spill] sm:$0xff] %v6599_v27  ;;  %v5585_v14 = vld [vmem:[%s6492_s25 + $0xc0] ss:$8 sm:$0xf]  ;;  %v6619_v51 = vrot.slane %v1150_v10, %v8015_v37  ;;  %v6622_v54 = vrot.slane %v1150_v10, %v8014_v1  ;;  %v6625_v36 = vrot.slane %v1150_v10, %v8013_v35 }
 0x29d   : >> { %2339 = vperm.xlu0 %5777, %v8023_v57   ;;  %8035 = vst [vmem:[#allocation32_spill] sm:$0xff] %v6602_v42  ;;  %8036 = vst [vmem:[#allocation33_spill] sm:$0xff] %v6605_v43  ;;  %v5586_v49 = vld [vmem:[%s6492_s25 + $0xc0] ss:$8 sm:$0xf0]  ;;  %v1157_v56 = vor.u32 %v5574_v25, %v5573_v24  ;;  %v6631_v57 = vrot.slane %v1176_v23, %v8015_v37  ;;  %v6637_v41 = vrot.slane %v1176_v23, %v8013_v35 }
 0x29e   : >> { %2009 = vperm.xlu1 %5776, %v8022_v55   ;;  %8037 = vst [vmem:[#allocation34_spill] sm:$0xff] %v6610_v50  ;;  %8038 = vst [vmem:[#allocation35_spill] sm:$0xff] %v6613_v3  ;;  %v6628_v55 = vrot.slane %v1150_v10, %v8012_v63  ;;  %v6643_v9 = vrot.slane %v1150_v10, %v6499_v21  ;;  %v6646_v8 = vrot.slane %v1150_v10, %v6502_v22 }
 0x29f   : >> { %8039 = vst [vmem:[#allocation36_spill] sm:$0xff] %v6616_v4  ;;  %8040 = vst [vmem:[#allocation37_spill] sm:$0xff] %v6619_v51  ;;  %v6649_v24 = vrot.slane %v1150_v10, %v6512_v29  ;;  %v6652_v25 = vrot.slane %v1176_v23, %v6499_v21  ;;  %v6655_v13 = vrot.slane %v1176_v23, %v6502_v22 }
 0x2a0   : >> { %8041 = vst [vmem:[#allocation38_spill] sm:$0xff] %v6622_v54  ;;  %8042 = vst [vmem:[#allocation39_spill] sm:$0xff] %v6625_v36  ;;  %v6664_v12 = vrot.slane %v1176_v23, %v6515_v30  ;;  %v6667_v34 = vrot.slane %v1157_v56, %v8015_v37  ;;  %v6670_v62 = vrot.slane %v1157_v56, %v8014_v1 }
 0x2a1   : >> { %3702 = vperm.xlu0 %5777, %v8025_v61   ;;  %8043 = vst [vmem:[#allocation40_spill] sm:$0xff] %v6628_v55  ;;  %8044 = vst [vmem:[#allocation41_spill] sm:$0xff] %v6631_v57  ;;  %v6640_v61 = vrot.slane %v1176_v23, %v8012_v63 }
 0x2a2   : >> { %2349 = vperm.xlu1 %5776, %v8024_v59   ;;  %8046 = vst [vmem:[#allocation43_spill] sm:$0xff] %v6637_v41  ;;  %v1180_v59 = vor.u32 %v5586_v49, %v5585_v14  ;;  %8048 = vst [vmem:[#allocation45_spill] sm:$0xff] %v6643_v9  ;;  %v6658_v49 = vrot.slane %v1176_v23, %v6512_v29  ;;  %v6661_v14 = vrot.slane %v1150_v10, %v6515_v30 }
 0x2a3   : >> { %8047 = vst [vmem:[#allocation44_spill] sm:$0xff] %v6640_v61  ;;  %8049 = vst [vmem:[#allocation46_spill] sm:$0xff] %v6646_v8 }
 0x2a4   : >> { %8050 = vst [vmem:[#allocation47_spill] sm:$0xff] %v6649_v24  ;;  %8051 = vst [vmem:[#allocation48_spill] sm:$0xff] %v6652_v25  ;;  %v6673_v24 = vrot.slane %v1157_v56, %v8013_v35  ;;  %v6682_v10 = vrot.slane %v1180_v59, %v8013_v35  ;;  %v6704_v35 = vrot.slane %v1180_v59, %v6499_v21 }
 0x2a5   : >> { %8052 = vst [vmem:[#allocation49_spill] sm:$0xff] %v6655_v13  ;;  %8053 = vst [vmem:[#allocation50_spill] sm:$0xff] %v6658_v49  ;;  %v6676_v13 = vrot.slane %v1180_v59, %v8015_v37  ;;  %v6679_v49 = vrot.slane %v1180_v59, %v8014_v1  ;;  %v6697_v37 = vrot.slane %v1157_v56, %v6512_v29 }
 0x2a6   : >> { %2344 = vperm.xlu1 %5776, %v8026_v58   ;;  %v6634_v58 = vrot.slane %v1176_v23, %v8014_v1  ;;  %8054 = vst [vmem:[#allocation51_spill] sm:$0xff] %v6661_v14  ;;  %8055 = vst [vmem:[#allocation52_spill] sm:$0xff] %v6664_v12  ;;  %v6685_v23 = vrot.slane %v1157_v56, %v8012_v63 }
 0x2a7   : >> { %8056 = vst [vmem:[#allocation53_spill] sm:$0xff] %v6667_v34  ;;  %8057 = vst [vmem:[#allocation54_spill] sm:$0xff] %v6670_v62  ;;  %v6688_v34 = vrot.slane %v1180_v59, %v8012_v63  ;;  %v6691_v62 = vrot.slane %v1157_v56, %v6499_v21  ;;  %v6710_v63 = vrot.slane %v1180_v59, %v6512_v29 }
 0x2a8   : >> { %8045 = vst [vmem:[#allocation42_spill] sm:$0xff] %v6634_v58  ;;  %8058 = vst [vmem:[#allocation55_spill] sm:$0xff] %v6673_v24  ;;  %v6694_v24 = vrot.slane %v1157_v56, %v6502_v22  ;;  %v6722_v21 = vrot.slane %v1180_v59, %v6515_v30 }
 0x2a9   : >> { %8059 = vst [vmem:[#allocation56_spill] sm:$0xff] %v6676_v13  ;;  %8060 = vst [vmem:[#allocation57_spill] sm:$0xff] %v6679_v49 }
 0x2aa   : >> { %8061 = vst [vmem:[#allocation58_spill] sm:$0xff] %v6682_v10  ;;  %8062 = vst [vmem:[#allocation59_spill] sm:$0xff] %v6685_v23  ;;  %v6707_v23 = vrot.slane %v1180_v59, %v6502_v22 }
 0x2ab   : >> { %8063 = vst [vmem:[#allocation60_spill] sm:$0xff] %v6688_v34  ;;  %8064 = vst [vmem:[#allocation61_spill] sm:$0xff] %v6691_v62  ;;  %v6713_v62 = vrot.slane %v1157_v56, %v6515_v30 }
 0x2ac   : >> { %8065 = vst [vmem:[#allocation62_spill] sm:$0xff] %v6694_v24  ;;  %8066 = vst [vmem:[#allocation63_spill] sm:$0xff] %v6697_v37 }
 0x2ad   : >> { %8068 = vst [vmem:[#allocation65_spill] sm:$0xff] %v6704_v35  ;;  %8069 = vst [vmem:[#allocation66_spill] sm:$0xff] %v6707_v23 }
 0x2ae   : >> { %8070 = vst [vmem:[#allocation67_spill] sm:$0xff] %v6710_v63  ;;  %8071 = vst [vmem:[#allocation68_spill] sm:$0xff] %v6713_v62 }
 0x2af   : >> { %8072 = vst [vmem:[#allocation69_spill] sm:$0xff] %v6722_v21 }
 0x306   : >> { %v6701_v49 = vpop.permute.xlu0 %1217 }
 0x307   : >> { %v6699_v1 = vpop.permute.xlu1 %1207  ;;  %v1506_v24 = vmul.f32 %v6509_v28, %v6701_v49  ;;  %v1508_v37 = vmul.f32 %v6518_v31, %v6701_v49  ;;  %v1505_v34 = vmul.f32 %v6521_v32, %v6701_v49  ;;  %v1507_v22 = vmul.f32 %v6524_v33, %v6701_v49 }
 0x308   : >> { %8067 = vst [vmem:[#allocation64_spill] sm:$0xff] %v6699_v1  ;;  %v1426_v29 = vmul.f32 %v6509_v28, %v6699_v1  ;;  %v1428_v56 = vmul.f32 %v6518_v31, %v6699_v1  ;;  %v1425_v62 = vmul.f32 %v6521_v32, %v6699_v1  ;;  %v1427_v63 = vmul.f32 %v6524_v33, %v6699_v1 }
 0x309   : >> { %v1510_v23 = vmul.f32 %v6541_v45, %v6701_v49  ;;  %v1512_v59 = vmul.f32 %v6547_v47, %v6701_v49  ;;  %v1509_v30 = vmul.f32 %v6553_v60, %v6701_v49  ;;  %v1511_v35 = vmul.f32 %v6559_v2, %v6701_v49 }
 0x30a   : >> { %v6746_v10 = vmul.f32 %v6541_v45, %v6699_v1  ;;  %v6750_v13 = vmul.f32 %v6547_v47, %v6699_v1  ;;  %v6754_v12 = vmul.f32 %v6553_v60, %v6699_v1  ;;  %v6766_v61 = vmul.f32 %v6559_v2, %v6699_v1 }
 0x30b   : >> { %v6740_v21 = vpop.permute.xlu1 %1212  ;;  %v6756_v14 = vpop.permute.xlu0 %1554 }
 0x30c   : >> { %v1466_v8 = vmul.f32 %v6509_v28, %v6740_v21  ;;  %v1468_v25 = vmul.f32 %v6518_v31, %v6740_v21  ;;  %v1465_v9 = vmul.f32 %v6521_v32, %v6740_v21  ;;  %v1843_v55 = vmul.f32 %v6527_v38, %v6756_v14 }
 0x30d   : >> { %v1845_v41 = vmul.f32 %v6530_v39, %v6756_v14  ;;  %v1842_v36 = vmul.f32 %v6533_v40, %v6756_v14  ;;  %v1844_v28 = vmul.f32 %v6538_v44, %v6756_v14  ;;  %v1467_v31 = vmul.f32 %v6524_v33, %v6740_v21 }
 0x30e   : >> { %v1847_v32 = vmul.f32 %v6544_v46, %v6756_v14  ;;  %v1849_v58 = vmul.f32 %v6550_v48, %v6756_v14  ;;  %v1846_v54 = vmul.f32 %v6556_v0, %v6756_v14  ;;  %v1963_v57 = vadd.f32 %v1843_v55, %v1506_v24 }
 0x30f   : >> { %v1965_v51 = vadd.f32 %v1845_v41, %v1508_v37  ;;  %v1962_v4 = vadd.f32 %v1842_v36, %v1505_v34  ;;  %v1848_v43 = vmul.f32 %v6564_v5, %v6756_v14  ;;  %v6788_v42 = vpop.permute.xlu0 %1550  ;;  %v1964_v33 = vadd.f32 %v1844_v28, %v1507_v22 }
 0x310   : >> { %v6786_v3 = vpop.permute.xlu1 %1546  ;;  %v1967_v50 = vadd.f32 %v1847_v32, %v1510_v23  ;;  %v1969_v27 = vadd.f32 %v1849_v58, %v1512_v59  ;;  %v6790_v26 = vadd.f32 %v1846_v54, %v1509_v30  ;;  %v1803_v37 = vmul.f32 %v6527_v38, %v6788_v42 }
 0x311   : >> { %v1763_v20 = vmul.f32 %v6527_v38, %v6786_v3  ;;  %v1765_v34 = vmul.f32 %v6530_v39, %v6786_v3  ;;  %v1805_v55 = vmul.f32 %v6530_v39, %v6788_v42  ;;  %v1762_v22 = vmul.f32 %v6533_v40, %v6786_v3 }
 0x312   : >> { %v1802_v54 = vmul.f32 %v6533_v40, %v6788_v42  ;;  %v1764_v58 = vmul.f32 %v6538_v44, %v6786_v3  ;;  %v1804_v30 = vmul.f32 %v6538_v44, %v6788_v42  ;;  %v1923_v38 = vadd.f32 %v1803_v37, %v1466_v8 }
 0x313   : >> { %v1883_v36 = vadd.f32 %v1763_v20, %v1426_v29  ;;  %v1885_v41 = vadd.f32 %v1765_v34, %v1428_v56  ;;  %v1968_v24 = vadd.f32 %v1848_v43, %v1511_v35  ;;  %v1925_v23 = vadd.f32 %v1805_v55, %v1468_v25 }
 0x314   : >> { %v1882_v59 = vadd.f32 %v1762_v22, %v1425_v62  ;;  %v1922_v28 = vadd.f32 %v1802_v54, %v1465_v9  ;;  %v1884_v39 = vadd.f32 %v1764_v58, %v1427_v63  ;;  %v6810_v1 = vpop.permute.xlu0 %2004  ;;  %v1924_v19 = vadd.f32 %v1804_v30, %v1467_v31 }
 0x315   : >> { %v6808_v32 = vpop.permute.xlu1 %2014  ;;  %v1470_v40 = vmul.f32 %v6541_v45, %v6740_v21  ;;  %v1767_v53 = vmul.f32 %v6544_v46, %v6786_v3  ;;  %v1807_v8 = vmul.f32 %v6544_v46, %v6788_v42  ;;  %v2018_v29 = vadd.f32 %v6810_v1, %v1883_v36 }
 0x316   : >> { %v2098_v35 = vadd.f32 %v6808_v32, %v1963_v57  ;;  %v2100_v62 = vadd.f32 %v6808_v32, %v1965_v51  ;;  %v2097_v63 = vadd.f32 %v6808_v32, %v1962_v4  ;;  %v2099_v9 = vadd.f32 %v6808_v32, %v1964_v33 }
 0x317   : >> { %v2020_v44 = vadd.f32 %v6810_v1, %v1885_v41  ;;  %v2017_v45 = vadd.f32 %v6810_v1, %v1882_v59  ;;  %v2019_v20 = vadd.f32 %v6810_v1, %v1884_v39  ;;  %v2138_v57 = vmax.f32 %v2018_v29, 0.0 }
 0x318   : >> { %v2218_v43 = vmax.f32 %v2098_v35, 0.0  ;;  %v2220_v25 = vmax.f32 %v2100_v62, 0.0  ;;  %v2217_v56 = vmax.f32 %v2097_v63, 0.0  ;;  %v2219_v46 = vmax.f32 %v2099_v9, 0.0 }
 0x319   : >> { %v6826_v31 = vpop.permute.xlu1 %2009  ;;  %v2140_v51 = vmax.f32 %v2020_v44, 0.0  ;;  %v2137_v37 = vmax.f32 %v2017_v45, 0.0  ;;  %v2139_v4 = vmax.f32 %v2019_v20, 0.0  ;;  %v2102_v39 = vadd.f32 %v6808_v32, %v1967_v50 }
 0x31a   : >> { %v2298_v34 = vpack.c.bf16 %v2218_v43, %v2218_v43  ;;  %v2300_v33 = vpack.c.bf16 %v2220_v25, %v2220_v25  ;;  %v2297_v55 = vpack.c.bf16 %v2217_v56, %v2217_v56  ;;  %v2299_v22 = vpack.c.bf16 %v2219_v46, %v2219_v46 }
 0x31b   : >> { %v2058_v54 = vadd.f32 %v6826_v31, %v1923_v38  ;;  %v2060_v58 = vadd.f32 %v6826_v31, %v1925_v23  ;;  %v2057_v30 = vadd.f32 %v6826_v31, %v1922_v28  ;;  %v2059_v36 = vadd.f32 %v6826_v31, %v1924_v19 }
 0x31c   : >> { %5602 = vmatprep.subr.msk.bf16.mxu0 %vm2359_vm4, %v2298_v34  ;;  %5605 = vmatprep.subr.msk.bf16.mxu1 %vm2359_vm4, %v2300_v33  ;;  %v2361_v41 = vsel %vm2359_vm4, %v2297_v55, 0  ;;  %v2367_v59 = vsel %vm2359_vm4, %v2299_v22, 0  ;;  %v2104_v35 = vadd.f32 %v6808_v32, %v1969_v27  ;;  %v2222_v63 = vmax.f32 %v2102_v39, 0.0 }
 0x31d   : >> { %2493 = vmatpush1.bf16.msra.mxu0 %v2361_v41  ;;  %2544 = vmatpush1.bf16.msra.mxu1 %v2367_v59  ;;  %v2178_v38 = vmax.f32 %v2058_v54, 0.0  ;;  %v2180_v23 = vmax.f32 %v2060_v58, 0.0  ;;  %v2177_v62 = vmax.f32 %v2057_v30, 0.0  ;;  %v2179_v28 = vmax.f32 %v2059_v36, 0.0 }
 0x31e   : >> { %v2224_v19 = vmax.f32 %v2104_v35, 0.0  ;;  %v2101_v9 = vadd.f32 %v6808_v32, %v6790_v26  ;;  %v1472_v29 = vmul.f32 %v6547_v47, %v6740_v21  ;;  %v2302_v43 = vpack.c.bf16 %v2222_v63, %v2222_v63 }
 0x31f   : >> { %v2258_v44 = vpack.c.bf16 %v2178_v38, %v2138_v57  ;;  %v2260_v45 = vpack.c.bf16 %v2180_v23, %v2140_v51  ;;  %v2257_v20 = vpack.c.bf16 %v2177_v62, %v2137_v37  ;;  %v2259_v50 = vpack.c.bf16 %v2179_v28, %v2139_v4 }
 0x320   : >> { %v2304_v27 = vpack.c.bf16 %v2224_v19, %v2224_v19  ;;  %v2221_v25 = vmax.f32 %v2101_v9, 0.0  ;;  %v2103_v56 = vadd.f32 %v6808_v32, %v1968_v24  ;;  %v1887_v46 = vadd.f32 %v1767_v53, %v6746_v10 }
 0x321   : >> { %2494 = vmatprep.subr.bf16.mxu0 %v2258_v44  ;;  %2545 = vmatprep.subr.bf16.mxu1 %v2260_v45  ;;  %v1927_v34 = vadd.f32 %v1807_v8, %v1470_v40  ;;  %v1769_v26 = vmul.f32 %v6550_v48, %v6786_v3  ;;  %v1809_v51 = vmul.f32 %v6550_v48, %v6788_v42  ;;  %v8073_v36 = vmov 0  }
 0x322   : >> { %2495 = vmatpush1.bf16.msra.mxu0 %v2257_v20  ;;  %2546 = vmatpush1.bf16.msra.mxu1 %v2259_v50  ;;  %v2301_v47 = vpack.c.bf16 %v2221_v25, %v2221_v25  ;;  %v2223_v57 = vmax.f32 %v2103_v56, 0.0  ;;  %v1469_v37 = vmul.f32 %v6553_v60, %v6740_v21  ;;  %v2022_v53 = vadd.f32 %v6810_v1, %v1887_v46 }
 0x323   : >> { %5608 = vmatprep.subr.msk.bf16.mxu0 %vm2359_vm4, %v2302_v43  ;;  %5611 = vmatprep.subr.msk.bf16.mxu1 %vm2359_vm4, %v2304_v27  ;;  %v2062_v10 = vadd.f32 %v6826_v31, %v1927_v34  ;;  %v1889_v24 = vadd.f32 %v1769_v26, %v6750_v13  ;;  %v1929_v4 = vadd.f32 %v1809_v51, %v1472_v29  ;;  %v8074_v26 = vld [vmem:[#allocation9_spill] sm:$0xff] }
 0x324   : >> { %v2373_v40 = vsel %vm2359_vm4, %v2301_v47, 0  ;;  %v2303_v8 = vpack.c.bf16 %v2223_v57, %v2223_v57  ;;  %v1766_v48 = vmul.f32 %v6556_v0, %v6786_v3  ;;  %v2142_v60 = vmax.f32 %v2022_v53, 0.0  ;;  %v8075_v47 = vld [vmem:[#allocation28_spill] sm:$0xff] }
 0x325   : >> { %5603 = vmatmul.mubr.msk.bf16.vlgmr.msra.gmra.mxu0 %vm2352_vm5, %v6413_v52  ;;  %5606 = vmatmul.mubr.msk.bf16.vlgmr.msra.gmra.mxu1 %vm2352_vm5, %v6413_v52  ;;  %v2182_v33 = vmax.f32 %v2062_v10, 0.0  ;;  %v2024_v55 = vadd.f32 %v6810_v1, %v1889_v24  ;;  %v1806_v13 = vmul.f32 %v6556_v0, %v6788_v42  ;;  %v2064_v54 = vadd.f32 %v6826_v31, %v1929_v4  ;;  %v8076_v10 = vld [vmem:[#allocation64_spill] sm:$0xff] }
 0x326   : >> { %2595 = vmatpush1.bf16.msra.mxu0 %v2373_v40  ;;  %v2379_v22 = vsel %vm2359_vm4, %v2303_v8, 0  ;;  %v1886_v58 = vadd.f32 %v1766_v48, %v6754_v12  ;;  %v1471_v30 = vmul.f32 %v6559_v2, %v6740_v21  ;;  %2522 = vmatprep.mubr.bf16.mxu0 %v8073_v36  ;;  %v1768_v35 = vmul.f32 %v6564_v5, %v6786_v3 }
 0x327   : >> { %2646 = vmatpush1.bf16.msra.mxu1 %v2379_v22  ;;  %v2262_v41 = vpack.c.bf16 %v2182_v33, %v2142_v60  ;;  %v2144_v59 = vmax.f32 %v2024_v55, 0.0  ;;  %v1926_v39 = vadd.f32 %v1806_v13, %v1469_v37  ;;  %2573 = vmatprep.mubr.bf16.mxu1 %v8073_v36  ;;  %v2184_v0 = vmax.f32 %v2064_v54, 0.0 }
 0x328   : >> { %v2021_v38 = vadd.f32 %v6810_v1, %v1886_v58  ;;  %v1808_v12 = vmul.f32 %v6564_v5, %v6788_v42  ;;  %v1514_v2 = vmul.f32 %v6567_v6, %v6701_v49  ;;  %v1888_v62 = vadd.f32 %v1768_v35, %v6766_v61 }
 0x329   : >> { %2596 = vmatprep.subr.bf16.mxu0 %v2262_v41  ;;  %v2061_v23 = vadd.f32 %v6826_v31, %v1926_v39  ;;  %v1851_v28 = vmul.f32 %v6573_v11, %v6756_v14  ;;  %v1516_v63 = vmul.f32 %v6570_v7, %v6701_v49  ;;  %v2264_v19 = vpack.c.bf16 %v2184_v0, %v2144_v59 }
 0x32a   : >> { %v2141_v9 = vmax.f32 %v2021_v38, 0.0  ;;  %v1928_v29 = vadd.f32 %v1808_v12, %v1471_v30  ;;  %v1853_v5 = vmul.f32 %v6576_v15, %v6756_v14  ;;  %v2023_v45 = vadd.f32 %v6810_v1, %v1888_v62 }
 0x32b   : >> { %v2181_v44 = vmax.f32 %v2061_v23, 0.0  ;;  %v1971_v20 = vadd.f32 %v1851_v28, %v1514_v2  ;;  %v1513_v50 = vmul.f32 %v6579_v16, %v6701_v49  ;;  %2647 = vmatprep.subr.bf16.mxu1 %v2264_v19  ;;  %v1850_v27 = vmul.f32 %v6585_v18, %v6756_v14 }
 0x32c   : >> { %v2063_v61 = vadd.f32 %v6826_v31, %v1928_v29  ;;  %v1973_v43 = vadd.f32 %v1853_v5, %v1516_v63  ;;  %v1515_v25 = vmul.f32 %v6582_v17, %v6701_v49  ;;  %v2143_v46 = vmax.f32 %v2023_v45, 0.0 }
 0x32d   : >> { %v2261_v56 = vpack.c.bf16 %v2181_v44, %v2141_v9  ;;  %v2106_v34 = vadd.f32 %v6808_v32, %v1971_v20  ;;  %5604 = vmatmul.mubr.msk.bf16.gmra.mxu0 %vm2352_vm5, %v8074_v26  ;;  %5607 = vmatmul.mubr.msk.bf16.gmra.mxu1 %vm2352_vm5, %v8074_v26  ;;  %v1852_v57 = vmul.f32 %v8075_v47, %v6756_v14 }
 0x32e   : >> { %v2183_v51 = vmax.f32 %v2063_v61, 0.0  ;;  %v2108_v37 = vadd.f32 %v6808_v32, %v1973_v43  ;;  %2614 = vmatprep.mubr.bf16.mxu0 %v8073_v36  ;;  %2665 = vmatprep.mubr.bf16.mxu1 %v8073_v36  ;;  %v1970_v53 = vadd.f32 %v1850_v27, %v1513_v50  ;;  %v1434_v24 = vmul.f32 %v6567_v6, %v8076_v10 }
 0x32f   : >> { %2597 = vmatpush1.bf16.msra.mxu0 %v2261_v56  ;;  %v2226_v40 = vmax.f32 %v2106_v34, 0.0  ;;  %v1972_v8 = vadd.f32 %v1852_v57, %v1515_v25  ;;  %v1474_v4 = vmul.f32 %v6567_v6, %v6740_v21  ;;  %v1771_v48 = vmul.f32 %v6573_v11, %v6786_v3 }
 0x330   : >> { %v2263_v60 = vpack.c.bf16 %v2183_v51, %v2143_v46  ;;  %v2228_v33 = vmax.f32 %v2108_v37, 0.0  ;;  %v2105_v55 = vadd.f32 %v6808_v32, %v1970_v53  ;;  %v1811_v13 = vmul.f32 %v6573_v11, %v6788_v42  ;;  %v8077_v51 = vld [vmem:[#allocation29_spill] sm:$0xff]  ;;  %v8078_v53 = vld [vmem:[#allocation30_spill] sm:$0xff] }
 0x331   : >> { %v2306_v22 = vpack.c.bf16 %v2226_v40, %v2226_v40  ;;  %v2107_v54 = vadd.f32 %v6808_v32, %v1972_v8  ;;  %v1891_v58 = vadd.f32 %v1771_v48, %v1434_v24  ;;  %v1436_v30 = vmul.f32 %v6570_v7, %v8076_v10 }
 0x332   : >> { %2648 = vmatpush1.bf16.msra.mxu1 %v2263_v60  ;;  %v2308_v41 = vpack.c.bf16 %v2228_v33, %v2228_v33  ;;  %v2225_v6 = vmax.f32 %v2105_v55, 0.0  ;;  %v1931_v59 = vadd.f32 %v1811_v13, %v1474_v4  ;;  %v1476_v39 = vmul.f32 %v6570_v7, %v6740_v21  ;;  %v8079_v4 = vld [vmem:[#allocation31_spill] sm:$0xff]  ;;  %v8080_v55 = vld [vmem:[#allocation34_spill] sm:$0xff] }
 0x333   : >> { %5614 = vmatprep.subr.msk.bf16.mxu0 %vm2359_vm4, %v2306_v22  ;;  %v2227_v35 = vmax.f32 %v2107_v54, 0.0  ;;  %v2026_v0 = vadd.f32 %v6810_v1, %v1891_v58  ;;  %v1773_v11 = vmul.f32 %v6576_v15, %v6786_v3  ;;  %v1813_v38 = vmul.f32 %v6576_v15, %v6788_v42  ;;  %v8081_v58 = vld [vmem:[#allocation32_spill] sm:$0xff] }
 0x334   : >> { %5617 = vmatprep.subr.msk.bf16.mxu1 %vm2359_vm4, %v2308_v41  ;;  %v2305_v12 = vpack.c.bf16 %v2225_v6, %v2225_v6  ;;  %v2066_v2 = vadd.f32 %v6826_v31, %v1931_v59  ;;  %v1433_v23 = vmul.f32 %v6579_v16, %v8076_v10  ;;  %v1473_v7 = vmul.f32 %v6579_v16, %v6740_v21 }
 0x335   : >> { %5609 = vmatmul.mubr.msk.bf16.vlgmr.msra.gmra.mxu0 %vm2352_vm5, %v6413_v52  ;;  %5612 = vmatmul.mubr.msk.bf16.vlgmr.msra.gmra.mxu1 %vm2352_vm5, %v6413_v52  ;;  %v2307_v62 = vpack.c.bf16 %v2227_v35, %v2227_v35  ;;  %v2146_v28 = vmax.f32 %v2026_v0, 0.0  ;;  %v1893_v15 = vadd.f32 %v1773_v11, %v1436_v30  ;;  %v1933_v63 = vadd.f32 %v1813_v38, %v1476_v39  ;;  %v8082_v0 = vld [vmem:[#allocation35_spill] sm:$0xff]  ;;  %v8083_v38 = vld [vmem:[#allocation33_spill] sm:$0xff] }
 0x336   : >> { %v2385_v19 = vsel %vm2359_vm4, %v2305_v12, 0  ;;  %v2186_v9 = vmax.f32 %v2066_v2, 0.0  ;;  %v1770_v29 = vmul.f32 %v6585_v18, %v6786_v3  ;;  %v1810_v5 = vmul.f32 %v6585_v18, %v6788_v42  ;;  %2624 = vmatprep.mubr.bf16.mxu0 %v8073_v36  ;;  %2675 = vmatprep.mubr.bf16.mxu1 %v8073_v36 }
 0x337   : >> { %2697 = vmatpush1.bf16.msra.mxu0 %v2385_v19  ;;  %v2391_v16 = vsel %vm2359_vm4, %v2307_v62, 0  ;;  %v2028_v44 = vadd.f32 %v6810_v1, %v1893_v15  ;;  %v2068_v45 = vadd.f32 %v6826_v31, %v1933_v63  ;;  %v1435_v20 = vmul.f32 %v6582_v17, %v8076_v10 }
 0x338   : >> { %2748 = vmatpush1.bf16.msra.mxu1 %v2391_v16  ;;  %v2266_v50 = vpack.c.bf16 %v2186_v9, %v2146_v28  ;;  %v1890_v61 = vadd.f32 %v1770_v29, %v1433_v23  ;;  %v1930_v43 = vadd.f32 %v1810_v5, %v1473_v7  ;;  %v1475_v18 = vmul.f32 %v6582_v17, %v6740_v21  ;;  %v8084_v7 = vld [vmem:[#allocation36_spill] sm:$0xff] }
 0x339   : >> { %v2148_v27 = vmax.f32 %v2028_v44, 0.0  ;;  %v2188_v25 = vmax.f32 %v2068_v45, 0.0  ;;  %v1772_v56 = vmul.f32 %v8075_v47, %v6786_v3  ;;  %v1812_v46 = vmul.f32 %v8075_v47, %v6788_v42 }
 0x33a   : >> { %2698 = vmatprep.subr.bf16.mxu0 %v2266_v50  ;;  %v2025_v34 = vadd.f32 %v6810_v1, %v1890_v61  ;;  %v2065_v57 = vadd.f32 %v6826_v31, %v1930_v43  ;;  %v1518_v37 = vmul.f32 %v8077_v51, %v6701_v49  ;;  %v1855_v24 = vmul.f32 %v8078_v53, %v6756_v14 }
 0x33b   : >> { %v2268_v17 = vpack.c.bf16 %v2188_v25, %v2148_v27  ;;  %v1892_v40 = vadd.f32 %v1772_v56, %v1435_v20  ;;  %v1932_v8 = vadd.f32 %v1812_v46, %v1475_v18  ;;  %v1520_v48 = vmul.f32 %v8079_v4, %v6701_v49 }
 0x33c   : >> { %v2145_v60 = vmax.f32 %v2025_v34, 0.0  ;;  %v2185_v33 = vmax.f32 %v2065_v57, 0.0  ;;  %v1975_v47 = vadd.f32 %v1855_v24, %v1518_v37  ;;  %v1857_v13 = vmul.f32 %v8080_v55, %v6756_v14 }
 0x33d   : >> { %2749 = vmatprep.subr.bf16.mxu1 %v2268_v17  ;;  %v2027_v22 = vadd.f32 %v6810_v1, %v1892_v40  ;;  %v2067_v54 = vadd.f32 %v6826_v31, %v1932_v8  ;;  %5610 = vmatmul.mubr.msk.bf16.gmra.mxu0 %vm2352_vm5, %v8074_v26  ;;  %v1517_v30 = vmul.f32 %v8081_v58, %v6701_v49 }
 0x33e   : >> { %v2265_v41 = vpack.c.bf16 %v2185_v33, %v2145_v60  ;;  %v2110_v6 = vadd.f32 %v6808_v32, %v1975_v47  ;;  %v1977_v59 = vadd.f32 %v1857_v13, %v1520_v48  ;;  %5613 = vmatmul.mubr.msk.bf16.gmra.mxu1 %vm2352_vm5, %v8074_v26  ;;  %2716 = vmatprep.mubr.bf16.mxu0 %v8073_v36 }
 0x33f   : >> { %v2147_v39 = vmax.f32 %v2027_v22, 0.0  ;;  %v2187_v35 = vmax.f32 %v2067_v54, 0.0  ;;  %2767 = vmatprep.mubr.bf16.mxu1 %v8073_v36  ;;  %v1854_v11 = vmul.f32 %v8082_v0, %v6756_v14  ;;  %v1519_v12 = vmul.f32 %v8083_v38, %v6701_v49 }
 0x340   : >> { %2699 = vmatpush1.bf16.msra.mxu0 %v2265_v41  ;;  %v2230_v2 = vmax.f32 %v2110_v6, 0.0  ;;  %v2112_v23 = vadd.f32 %v6808_v32, %v1977_v59  ;;  %v1856_v62 = vmul.f32 %v8084_v7, %v6756_v14  ;;  %v1438_v28 = vmul.f32 %v8077_v51, %v8076_v10 }
 0x341   : >> { %v2267_v15 = vpack.c.bf16 %v2187_v35, %v2147_v39  ;;  %v1974_v63 = vadd.f32 %v1854_v11, %v1517_v30  ;;  %v1478_v19 = vmul.f32 %v8077_v51, %v6740_v21  ;;  %v1775_v9 = vmul.f32 %v8078_v53, %v6786_v3 }
 0x342   : >> { %v2310_v29 = vpack.c.bf16 %v2230_v2, %v2230_v2  ;;  %v2232_v5 = vmax.f32 %v2112_v23, 0.0  ;;  %v1976_v16 = vadd.f32 %v1856_v62, %v1519_v12  ;;  %v1815_v44 = vmul.f32 %v8078_v53, %v6788_v42  ;;  %v8085_v2 = vld [vmem:[#allocation37_spill] sm:$0xff] }
 0x343   : >> { %2750 = vmatpush1.bf16.msra.mxu1 %v2267_v15  ;;  %v2109_v45 = vadd.f32 %v6808_v32, %v1974_v63  ;;  %v1895_v20 = vadd.f32 %v1775_v9, %v1438_v28  ;;  %v1440_v50 = vmul.f32 %v8079_v4, %v8076_v10  ;;  %v1480_v61 = vmul.f32 %v8079_v4, %v6740_v21  ;;  %v8086_v62 = vld [vmem:[#allocation41_spill] sm:$0xff] }
 0x344   : >> { %5620 = vmatprep.subr.msk.bf16.mxu0 %vm2359_vm4, %v2310_v29  ;;  %v2312_v43 = vpack.c.bf16 %v2232_v5, %v2232_v5  ;;  %v2111_v18 = vadd.f32 %v6808_v32, %v1976_v16  ;;  %v1935_v27 = vadd.f32 %v1815_v44, %v1478_v19  ;;  %v1777_v25 = vmul.f32 %v8080_v55, %v6786_v3 }
 0x345   : >> { %5615 = vmatmul.mubr.msk.bf16.vlgmr.msra.gmra.mxu0 %vm2352_vm5, %v6413_v52  ;;  %v2229_v56 = vmax.f32 %v2109_v45, 0.0  ;;  %v2030_v46 = vadd.f32 %v6810_v1, %v1895_v20  ;;  %v1817_v34 = vmul.f32 %v8080_v55, %v6788_v42  ;;  %v1437_v57 = vmul.f32 %v8081_v58, %v8076_v10  ;;  %v8089_v20 = vld [vmem:[#allocation39_spill] sm:$0xff] }
 0x346   : >> { %5623 = vmatprep.subr.msk.bf16.mxu1 %vm2359_vm4, %v2312_v43  ;;  %5618 = vmatmul.mubr.msk.bf16.vlgmr.msra.gmra.mxu1 %vm2352_vm5, %v6413_v52  ;;  %v2231_v51 = vmax.f32 %v2111_v18, 0.0  ;;  %v2070_v37 = vadd.f32 %v6826_v31, %v1935_v27  ;;  %v1897_v53 = vadd.f32 %v1777_v25, %v1440_v50  ;;  %v1477_v24 = vmul.f32 %v8081_v58, %v6740_v21 }
 0x347   : >> { %v2309_v17 = vpack.c.bf16 %v2229_v56, %v2229_v56  ;;  %v2150_v40 = vmax.f32 %v2030_v46, 0.0  ;;  %v1937_v8 = vadd.f32 %v1817_v34, %v1480_v61  ;;  %v1774_v4 = vmul.f32 %v8082_v0, %v6786_v3  ;;  %2726 = vmatprep.mubr.bf16.mxu0 %v8073_v36  ;;  %2777 = vmatprep.mubr.bf16.mxu1 %v8073_v36  ;;  %v8090_v61 = vld [vmem:[#allocation43_spill] sm:$0xff] }
 0x348   : >> { %v2311_v48 = vpack.c.bf16 %v2231_v51, %v2231_v51  ;;  %v2190_v60 = vmax.f32 %v2070_v37, 0.0  ;;  %v2032_v33 = vadd.f32 %v6810_v1, %v1897_v53  ;;  %v1814_v47 = vmul.f32 %v8082_v0, %v6788_v42  ;;  %v8092_v37 = vld [vmem:[#allocation44_spill] sm:$0xff] }
 0x349   : >> { %v2397_v55 = vsel %vm2359_vm4, %v2309_v17, 0  ;;  %v2072_v13 = vadd.f32 %v6826_v31, %v1937_v8  ;;  %v1894_v22 = vadd.f32 %v1774_v4, %v1437_v57  ;;  %v1439_v54 = vmul.f32 %v8083_v38, %v8076_v10  ;;  %v8091_v57 = vld [vmem:[#allocation40_spill] sm:$0xff] }
 0x34a   : >> { %2799 = vmatpush1.bf16.msra.mxu0 %v2397_v55  ;;  %v2403_v58 = vsel %vm2359_vm4, %v2311_v48, 0  ;;  %v2270_v30 = vpack.c.bf16 %v2190_v60, %v2150_v40  ;;  %v2152_v41 = vmax.f32 %v2032_v33, 0.0  ;;  %v1934_v6 = vadd.f32 %v1814_v47, %v1477_v24 }
 0x34b   : >> { %2850 = vmatpush1.bf16.msra.mxu1 %v2403_v58  ;;  %v2192_v59 = vmax.f32 %v2072_v13, 0.0  ;;  %v2029_v39 = vadd.f32 %v6810_v1, %v1894_v22  ;;  %v1479_v35 = vmul.f32 %v8083_v38, %v6740_v21  ;;  %v1776_v0 = vmul.f32 %v8084_v7, %v6786_v3  ;;  %v8087_v38 = vld [vmem:[#allocation38_spill] sm:$0xff] }
 0x34c   : >> { %2800 = vmatprep.subr.bf16.mxu0 %v2270_v30  ;;  %v2069_v11 = vadd.f32 %v6826_v31, %v1934_v6  ;;  %v1816_v12 = vmul.f32 %v8084_v7, %v6788_v42  ;;  %v1522_v23 = vmul.f32 %v8085_v2, %v6701_v49  ;;  %v1859_v28 = vmul.f32 %v8086_v62, %v6756_v14  ;;  %v8088_v7 = vld [vmem:[#allocation42_spill] sm:$0xff] }
 0x34d   : >> { %v2272_v15 = vpack.c.bf16 %v2192_v59, %v2152_v41  ;;  %v2149_v63 = vmax.f32 %v2029_v39, 0.0  ;;  %v1896_v19 = vadd.f32 %v1776_v0, %v1439_v54  ;;  %v1524_v9 = vmul.f32 %v8087_v38, %v6701_v49  ;;  %5616 = vmatmul.mubr.msk.bf16.gmra.mxu0 %vm2352_vm5, %v8074_v26 }
 0x34e   : >> { %v2189_v29 = vmax.f32 %v2069_v11, 0.0  ;;  %v1936_v5 = vadd.f32 %v1816_v12, %v1479_v35  ;;  %v1979_v16 = vadd.f32 %v1859_v28, %v1522_v23  ;;  %v1861_v44 = vmul.f32 %v8088_v7, %v6756_v14  ;;  %5619 = vmatmul.mubr.msk.bf16.gmra.mxu1 %vm2352_vm5, %v8074_v26  ;;  %2818 = vmatprep.mubr.bf16.mxu0 %v8073_v36 }
 0x34f   : >> { %2851 = vmatprep.subr.bf16.mxu1 %v2272_v15  ;;  %v2031_v45 = vadd.f32 %v6810_v1, %v1896_v19  ;;  %2869 = vmatprep.mubr.bf16.mxu1 %v8073_v36  ;;  %v1521_v50 = vmul.f32 %v8089_v20, %v6701_v49  ;;  %v1858_v43 = vmul.f32 %v8090_v61, %v6756_v14 }
 0x350   : >> { %v2269_v18 = vpack.c.bf16 %v2189_v29, %v2149_v63  ;;  %v2071_v27 = vadd.f32 %v6826_v31, %v1936_v5  ;;  %v2114_v25 = vadd.f32 %v6808_v32, %v1979_v16  ;;  %v1981_v56 = vadd.f32 %v1861_v44, %v1524_v9 }
 0x351   : >> { %v2151_v46 = vmax.f32 %v2031_v45, 0.0  ;;  %v1978_v34 = vadd.f32 %v1858_v43, %v1521_v50  ;;  %v1523_v51 = vmul.f32 %v8091_v57, %v6701_v49  ;;  %v1860_v53 = vmul.f32 %v8092_v37, %v6756_v14 }
 0x352   : >> { %2801 = vmatpush1.bf16.msra.mxu0 %v2269_v18  ;;  %v2191_v24 = vmax.f32 %v2071_v27, 0.0  ;;  %v2234_v17 = vmax.f32 %v2114_v25, 0.0  ;;  %v2116_v40 = vadd.f32 %v6808_v32, %v1981_v56  ;;  %v1442_v8 = vmul.f32 %v8085_v2, %v8076_v10 }
 0x353   : >> { %v2113_v4 = vadd.f32 %v6808_v32, %v1978_v34  ;;  %v1980_v48 = vadd.f32 %v1860_v53, %v1523_v51  ;;  %v1482_v60 = vmul.f32 %v8085_v2, %v6740_v21  ;;  %v1779_v33 = vmul.f32 %v8086_v62, %v6786_v3 }
 0x354   : >> { %v2271_v47 = vpack.c.bf16 %v2191_v24, %v2151_v46  ;;  %v2314_v55 = vpack.c.bf16 %v2234_v17, %v2234_v17  ;;  %v2236_v13 = vmax.f32 %v2116_v40, 0.0  ;;  %v1819_v22 = vmul.f32 %v8086_v62, %v6788_v42  ;;  %v8093_v46 = vld [vmem:[#allocation45_spill] sm:$0xff]  ;;  %v8094_v24 = vld [vmem:[#allocation48_spill] sm:$0xff] }
 0x355   : >> { %5621 = vmatmul.mubr.msk.bf16.vlgmr.msra.gmra.mxu0 %vm2352_vm5, %v6413_v52  ;;  %v2233_v54 = vmax.f32 %v2113_v4, 0.0  ;;  %v2115_v58 = vadd.f32 %v6808_v32, %v1980_v48  ;;  %v1899_v30 = vadd.f32 %v1779_v33, %v1442_v8  ;;  %v1444_v41 = vmul.f32 %v8087_v38, %v8076_v10  ;;  %v8096_v48 = vld [vmem:[#allocation49_spill] sm:$0xff] }
 0x356   : >> { %2852 = vmatpush1.bf16.msra.mxu1 %v2271_v47  ;;  %5626 = vmatprep.subr.msk.bf16.mxu0 %vm2359_vm4, %v2314_v55  ;;  %v2316_v6 = vpack.c.bf16 %v2236_v13, %v2236_v13  ;;  %v1939_v59 = vadd.f32 %v1819_v22, %v1482_v60  ;;  %v1484_v39 = vmul.f32 %v8087_v38, %v6740_v21 }
 0x357   : >> { %v2313_v35 = vpack.c.bf16 %v2233_v54, %v2233_v54  ;;  %v2235_v0 = vmax.f32 %v2115_v58, 0.0  ;;  %v2034_v11 = vadd.f32 %v6810_v1, %v1899_v30  ;;  %v1781_v12 = vmul.f32 %v8088_v7, %v6786_v3  ;;  %2828 = vmatprep.mubr.bf16.mxu0 %v8073_v36  ;;  %v8097_v30 = vld [vmem:[#allocation47_spill] sm:$0xff] }
 0x358   : >> { %5629 = vmatprep.subr.msk.bf16.mxu1 %vm2359_vm4, %v2316_v6  ;;  %v2074_v2 = vadd.f32 %v6826_v31, %v1939_v59  ;;  %v1821_v23 = vmul.f32 %v8088_v7, %v6788_v42  ;;  %v1441_v62 = vmul.f32 %v8089_v20, %v8076_v10  ;;  %v1481_v28 = vmul.f32 %v8089_v20, %v6740_v21 }
 0x359   : >> { %5624 = vmatmul.mubr.msk.bf16.vlgmr.msra.gmra.mxu1 %vm2352_vm5, %v6413_v52  ;;  %v2409_v15 = vsel %vm2359_vm4, %v2313_v35, 0  ;;  %v2315_v63 = vpack.c.bf16 %v2235_v0, %v2235_v0  ;;  %v2154_v19 = vmax.f32 %v2034_v11, 0.0  ;;  %v1901_v38 = vadd.f32 %v1781_v12, %v1444_v41 }
 0x35a   : >> { %2901 = vmatpush1.bf16.msra.mxu0 %v2409_v15  ;;  %v2194_v9 = vmax.f32 %v2074_v2, 0.0  ;;  %v1941_v29 = vadd.f32 %v1821_v23, %v1484_v39  ;;  %v1778_v5 = vmul.f32 %v8090_v61, %v6786_v3  ;;  %v1818_v16 = vmul.f32 %v8090_v61, %v6788_v42  ;;  %2879 = vmatprep.mubr.bf16.mxu1 %v8073_v36  ;;  %v8098_v39 = vld [vmem:[#allocation50_spill] sm:$0xff]  ;;  %v8099_v2 = vld [vmem:[#allocation51_spill] sm:$0xff]  ;;  %v8100_v15 = vld [vmem:[#allocation52_spill] sm:$0xff] }
 0x35b   : >> { %v2415_v7 = vsel %vm2359_vm4, %v2315_v63, 0  ;;  %v2036_v44 = vadd.f32 %v6810_v1, %v1901_v38  ;;  %v1443_v45 = vmul.f32 %v8091_v57, %v8076_v10  ;;  %v1483_v20 = vmul.f32 %v8091_v57, %v6740_v21 }
 0x35c   : >> { %2952 = vmatpush1.bf16.msra.mxu1 %v2415_v7  ;;  %v2274_v50 = vpack.c.bf16 %v2194_v9, %v2154_v19  ;;  %v2076_v43 = vadd.f32 %v6826_v31, %v1941_v29  ;;  %v1898_v18 = vadd.f32 %v1778_v5, %v1441_v62  ;;  %v1938_v27 = vadd.f32 %v1818_v16, %v1481_v28 }
 0x35d   : >> { %v2156_v25 = vmax.f32 %v2036_v44, 0.0  ;;  %v1780_v61 = vmul.f32 %v8092_v37, %v6786_v3  ;;  %v1820_v56 = vmul.f32 %v8092_v37, %v6788_v42  ;;  %v1526_v34 = vmul.f32 %v8093_v46, %v6701_v49  ;;  %5622 = vmatmul.mubr.msk.bf16.gmra.mxu0 %vm2352_vm5, %v8074_v26  ;;  %v8095_v37 = vld [vmem:[#allocation46_spill] sm:$0xff] }
 0x35e   : >> { %2902 = vmatprep.subr.bf16.mxu0 %v2274_v50  ;;  %v2196_v57 = vmax.f32 %v2076_v43, 0.0  ;;  %v2033_v51 = vadd.f32 %v6810_v1, %v1898_v18  ;;  %v2073_v53 = vadd.f32 %v6826_v31, %v1938_v27  ;;  %v1863_v17 = vmul.f32 %v8094_v24, %v6756_v14  ;;  %2920 = vmatprep.mubr.bf16.mxu0 %v8073_v36 }
 0x35f   : >> { %v1900_v40 = vadd.f32 %v1780_v61, %v1443_v45  ;;  %v1940_v8 = vadd.f32 %v1820_v56, %v1483_v20  ;;  %v1528_v4 = vmul.f32 %v8095_v37, %v6701_v49  ;;  %v1865_v60 = vmul.f32 %v8096_v48, %v6756_v14 }
 0x360   : >> { %v2276_v33 = vpack.c.bf16 %v2196_v57, %v2156_v25  ;;  %v2153_v47 = vmax.f32 %v2033_v51, 0.0  ;;  %v2193_v55 = vmax.f32 %v2073_v53, 0.0  ;;  %v1983_v13 = vadd.f32 %v1863_v17, %v1526_v34 }
 0x361   : >> { %v2035_v22 = vadd.f32 %v6810_v1, %v1900_v40  ;;  %v2075_v54 = vadd.f32 %v6826_v31, %v1940_v8  ;;  %v1985_v58 = vadd.f32 %v1865_v60, %v1528_v4  ;;  %5625 = vmatmul.mubr.msk.bf16.gmra.mxu1 %vm2352_vm5, %v8074_v26  ;;  %v1525_v41 = vmul.f32 %v8097_v30, %v6701_v49 }
 0x362   : >> { %2953 = vmatprep.subr.bf16.mxu1 %v2276_v33  ;;  %v2273_v6 = vpack.c.bf16 %v2193_v55, %v2153_v47  ;;  %v2118_v59 = vadd.f32 %v6808_v32, %v1983_v13  ;;  %2971 = vmatprep.mubr.bf16.mxu1 %v8073_v36  ;;  %v1862_v35 = vmul.f32 %v8098_v39, %v6756_v14 }
 0x363   : >> { %v2155_v0 = vmax.f32 %v2035_v22, 0.0  ;;  %v2195_v11 = vmax.f32 %v2075_v54, 0.0  ;;  %v2120_v12 = vadd.f32 %v6808_v32, %v1985_v58  ;;  %v1527_v23 = vmul.f32 %v8099_v2, %v6701_v49 }
 0x364   : >> { %2903 = vmatpush1.bf16.msra.mxu0 %v2273_v6  ;;  %v2238_v62 = vmax.f32 %v2118_v59, 0.0  ;;  %v1982_v28 = vadd.f32 %v1862_v35, %v1525_v41  ;;  %v1864_v63 = vmul.f32 %v8100_v15, %v6756_v14  ;;  %v1446_v19 = vmul.f32 %v8093_v46, %v8076_v10 }
 0x365   : >> { %v2275_v38 = vpack.c.bf16 %v2195_v11, %v2155_v0  ;;  %v2240_v9 = vmax.f32 %v2120_v12, 0.0  ;;  %v1486_v29 = vmul.f32 %v8093_v46, %v6740_v21  ;;  %v1783_v5 = vmul.f32 %v8094_v24, %v6786_v3 }
 0x366   : >> { %v2318_v16 = vpack.c.bf16 %v2238_v62, %v2238_v62  ;;  %v2117_v7 = vadd.f32 %v6808_v32, %v1982_v28  ;;  %v1984_v44 = vadd.f32 %v1864_v63, %v1527_v23  ;;  %v1823_v45 = vmul.f32 %v8094_v24, %v6788_v42  ;;  %v8101_v23 = vld [vmem:[#allocation53_spill] sm:$0xff]  ;;  %v8102_v62 = vld [vmem:[#allocation56_spill] sm:$0xff] }
 0x367   : >> { %2954 = vmatpush1.bf16.msra.mxu1 %v2275_v38  ;;  %v2320_v20 = vpack.c.bf16 %v2240_v9, %v2240_v9  ;;  %5627 = vmatmul.mubr.msk.bf16.vlgmr.msra.gmra.mxu0 %vm2352_vm5, %v6413_v52  ;;  %v1903_v50 = vadd.f32 %v1783_v5, %v1446_v19  ;;  %v1448_v43 = vmul.f32 %v8095_v37, %v8076_v10  ;;  %v8103_v9 = vld [vmem:[#allocation54_spill] sm:$0xff] }
 0x368   : >> { %5632 = vmatprep.subr.msk.bf16.mxu0 %vm2359_vm4, %v2318_v16  ;;  %v2237_v18 = vmax.f32 %v2117_v7, 0.0  ;;  %v2119_v27 = vadd.f32 %v6808_v32, %v1984_v44  ;;  %v1943_v25 = vadd.f32 %v1823_v45, %v1486_v29  ;;  %v1488_v61 = vmul.f32 %v8095_v37, %v6740_v21  ;;  %2930 = vmatprep.mubr.bf16.mxu0 %v8073_v36  ;;  %v8104_v44 = vld [vmem:[#allocation57_spill] sm:$0xff] }
 0x369   : >> { %5635 = vmatprep.subr.msk.bf16.mxu1 %vm2359_vm4, %v2320_v20  ;;  %v2038_v56 = vadd.f32 %v6810_v1, %v1903_v50  ;;  %v1785_v46 = vmul.f32 %v8096_v48, %v6786_v3  ;;  %v1825_v34 = vmul.f32 %v8096_v48, %v6788_v42  ;;  %v1445_v57 = vmul.f32 %v8097_v30, %v8076_v10  ;;  %v8105_v20 = vld [vmem:[#allocation55_spill] sm:$0xff] }
 0x36a   : >> { %5630 = vmatmul.mubr.msk.bf16.vlgmr.msra.gmra.mxu1 %vm2352_vm5, %v6413_v52  ;;  %v2317_v51 = vpack.c.bf16 %v2237_v18, %v2237_v18  ;;  %v2239_v53 = vmax.f32 %v2119_v27, 0.0  ;;  %v2078_v24 = vadd.f32 %v6826_v31, %v1943_v25  ;;  %v1485_v17 = vmul.f32 %v8097_v30, %v6740_v21 }
 0x36b   : >> { %v2158_v40 = vmax.f32 %v2038_v56, 0.0  ;;  %v1905_v8 = vadd.f32 %v1785_v46, %v1448_v43  ;;  %v1945_v37 = vadd.f32 %v1825_v34, %v1488_v61  ;;  %v1782_v4 = vmul.f32 %v8098_v39, %v6786_v3  ;;  %2981 = vmatprep.mubr.bf16.mxu1 %v8073_v36  ;;  %v8106_v43 = vld [vmem:[#allocation58_spill] sm:$0xff] }
 0x36c   : >> { %v2421_v48 = vsel %vm2359_vm4, %v2317_v51, 0  ;;  %v2319_v60 = vpack.c.bf16 %v2239_v53, %v2239_v53  ;;  %v2198_v33 = vmax.f32 %v2078_v24, 0.0  ;;  %v1822_v47 = vmul.f32 %v8098_v39, %v6788_v42  ;;  %v8108_v53 = vld [vmem:[#allocation60_spill] sm:$0xff] }
 0x36d   : >> { %3003 = vmatpush1.bf16.msra.mxu0 %v2421_v48  ;;  %v2040_v55 = vadd.f32 %v6810_v1, %v1905_v8  ;;  %v2080_v13 = vadd.f32 %v6826_v31, %v1945_v37  ;;  %v1902_v22 = vadd.f32 %v1782_v4, %v1445_v57  ;;  %v1447_v54 = vmul.f32 %v8099_v2, %v8076_v10  ;;  %v8107_v57 = vld [vmem:[#allocation59_spill] sm:$0xff] }
 0x36e   : >> { %v2427_v58 = vsel %vm2359_vm4, %v2319_v60, 0  ;;  %v2278_v30 = vpack.c.bf16 %v2198_v33, %v2158_v40  ;;  %v1942_v41 = vadd.f32 %v1822_v47, %v1485_v17  ;;  %v1487_v6 = vmul.f32 %v8099_v2, %v6740_v21 }
 0x36f   : >> { %3054 = vmatpush1.bf16.msra.mxu1 %v2427_v58  ;;  %v2160_v59 = vmax.f32 %v2040_v55, 0.0  ;;  %v2200_v35 = vmax.f32 %v2080_v13, 0.0  ;;  %v2037_v39 = vadd.f32 %v6810_v1, %v1902_v22  ;;  %v1784_v0 = vmul.f32 %v8100_v15, %v6786_v3  ;;  %5628 = vmatmul.mubr.msk.bf16.gmra.mxu0 %vm2352_vm5, %v8074_v26 }
 0x370   : >> { %3004 = vmatprep.subr.bf16.mxu0 %v2278_v30  ;;  %v2077_v11 = vadd.f32 %v6826_v31, %v1942_v41  ;;  %v1824_v12 = vmul.f32 %v8100_v15, %v6788_v42  ;;  %v1530_v2 = vmul.f32 %v8101_v23, %v6701_v49  ;;  %v1867_v28 = vmul.f32 %v8102_v62, %v6756_v14 }
 0x371   : >> { %v2280_v63 = vpack.c.bf16 %v2200_v35, %v2160_v59  ;;  %v2157_v19 = vmax.f32 %v2037_v39, 0.0  ;;  %v1904_v38 = vadd.f32 %v1784_v0, %v1447_v54  ;;  %v1532_v29 = vmul.f32 %v8103_v9, %v6701_v49  ;;  %3022 = vmatprep.mubr.bf16.mxu0 %v8073_v36 }
 0x372   : >> { %v2197_v5 = vmax.f32 %v2077_v11, 0.0  ;;  %v1944_v16 = vadd.f32 %v1824_v12, %v1487_v6  ;;  %v1987_v7 = vadd.f32 %v1867_v28, %v1530_v2  ;;  %v1869_v15 = vmul.f32 %v8104_v44, %v6756_v14  ;;  %5631 = vmatmul.mubr.msk.bf16.gmra.mxu1 %vm2352_vm5, %v8074_v26 }
 0x373   : >> { %3055 = vmatprep.subr.bf16.mxu1 %v2280_v63  ;;  %v2039_v45 = vadd.f32 %v6810_v1, %v1904_v38  ;;  %3073 = vmatprep.mubr.bf16.mxu1 %v8073_v36  ;;  %v1529_v50 = vmul.f32 %v8105_v20, %v6701_v49  ;;  %v1866_v18 = vmul.f32 %v8106_v43, %v6756_v14 }
 0x374   : >> { %v2277_v27 = vpack.c.bf16 %v2197_v5, %v2157_v19  ;;  %v2079_v25 = vadd.f32 %v6826_v31, %v1944_v16  ;;  %v2122_v61 = vadd.f32 %v6808_v32, %v1987_v7  ;;  %v1989_v56 = vadd.f32 %v1869_v15, %v1532_v29 }
 0x375   : >> { %v2159_v46 = vmax.f32 %v2039_v45, 0.0  ;;  %v1986_v34 = vadd.f32 %v1866_v18, %v1529_v50  ;;  %v1531_v51 = vmul.f32 %v8107_v57, %v6701_v49  ;;  %v1868_v24 = vmul.f32 %v8108_v53, %v6756_v14 }
 0x376   : >> { %3005 = vmatpush1.bf16.msra.mxu0 %v2277_v27  ;;  %v2199_v17 = vmax.f32 %v2079_v25, 0.0  ;;  %v2242_v40 = vmax.f32 %v2122_v61, 0.0  ;;  %v2124_v8 = vadd.f32 %v6808_v32, %v1989_v56  ;;  %v1450_v37 = vmul.f32 %v8101_v23, %v8076_v10 }
 0x377   : >> { %v2121_v4 = vadd.f32 %v6808_v32, %v1986_v34  ;;  %v1988_v48 = vadd.f32 %v1868_v24, %v1531_v51  ;;  %v1490_v60 = vmul.f32 %v8101_v23, %v6740_v21  ;;  %v1787_v33 = vmul.f32 %v8102_v62, %v6786_v3 }
 0x378   : >> { %v2279_v47 = vpack.c.bf16 %v2199_v17, %v2159_v46  ;;  %v2322_v55 = vpack.c.bf16 %v2242_v40, %v2242_v40  ;;  %v2244_v13 = vmax.f32 %v2124_v8, 0.0  ;;  %v1827_v22 = vmul.f32 %v8102_v62, %v6788_v42  ;;  %v8109_v46 = vld [vmem:[#allocation61_spill] sm:$0xff] }
 0x379   : >> { %5633 = vmatmul.mubr.msk.bf16.vlgmr.msra.gmra.mxu0 %vm2352_vm5, %v6413_v52  ;;  %v2241_v54 = vmax.f32 %v2121_v4, 0.0  ;;  %v2123_v58 = vadd.f32 %v6808_v32, %v1988_v48  ;;  %v1907_v30 = vadd.f32 %v1787_v33, %v1450_v37  ;;  %v1452_v41 = vmul.f32 %v8103_v9, %v8076_v10  ;;  %v8110_v17 = vld [vmem:[#allocation65_spill] sm:$0xff]  ;;  %v8112_v48 = vld [vmem:[#allocation66_spill] sm:$0xff] }
 0x37a   : >> { %3056 = vmatpush1.bf16.msra.mxu1 %v2279_v47  ;;  %5638 = vmatprep.subr.msk.bf16.mxu0 %vm2359_vm4, %v2322_v55  ;;  %v2324_v6 = vpack.c.bf16 %v2244_v13, %v2244_v13  ;;  %v1947_v59 = vadd.f32 %v1827_v22, %v1490_v60  ;;  %v1492_v35 = vmul.f32 %v8103_v9, %v6740_v21 }
 0x37b   : >> { %v2321_v39 = vpack.c.bf16 %v2241_v54, %v2241_v54  ;;  %v2243_v0 = vmax.f32 %v2123_v58, 0.0  ;;  %v2042_v11 = vadd.f32 %v6810_v1, %v1907_v30  ;;  %v1789_v12 = vmul.f32 %v8104_v44, %v6786_v3  ;;  %3032 = vmatprep.mubr.bf16.mxu0 %v8073_v36  ;;  %v8113_v30 = vld [vmem:[#allocation63_spill] sm:$0xff] }
 0x37c   : >> { %5641 = vmatprep.subr.msk.bf16.mxu1 %vm2359_vm4, %v2324_v6  ;;  %v2082_v23 = vadd.f32 %v6826_v31, %v1947_v59  ;;  %v1829_v2 = vmul.f32 %v8104_v44, %v6788_v42  ;;  %v1449_v62 = vmul.f32 %v8105_v20, %v8076_v10  ;;  %v1489_v28 = vmul.f32 %v8105_v20, %v6740_v21 }
 0x37d   : >> { %5636 = vmatmul.mubr.msk.bf16.vlgmr.msra.gmra.mxu1 %vm2352_vm5, %v6413_v52  ;;  %v2433_v63 = vsel %vm2359_vm4, %v2321_v39, 0  ;;  %v2323_v19 = vpack.c.bf16 %v2243_v0, %v2243_v0  ;;  %v2162_v38 = vmax.f32 %v2042_v11, 0.0  ;;  %v1909_v9 = vadd.f32 %v1789_v12, %v1452_v41 }
 0x37e   : >> { %3105 = vmatpush1.bf16.msra.mxu0 %v2433_v63  ;;  %v2202_v29 = vmax.f32 %v2082_v23, 0.0  ;;  %v1949_v5 = vadd.f32 %v1829_v2, %v1492_v35  ;;  %v1786_v16 = vmul.f32 %v8106_v43, %v6786_v3  ;;  %v1826_v7 = vmul.f32 %v8106_v43, %v6788_v42  ;;  %3083 = vmatprep.mubr.bf16.mxu1 %v8073_v36  ;;  %v8114_v35 = vld [vmem:[#allocation67_spill] sm:$0xff]  ;;  %v8115_v23 = vld [vmem:[#allocation68_spill] sm:$0xff]  ;;  %v8116_v63 = vld [vmem:[#allocation69_spill] sm:$0xff] }
 0x37f   : >> { %v2439_v44 = vsel %vm2359_vm4, %v2323_v19, 0  ;;  %v2044_v15 = vadd.f32 %v6810_v1, %v1909_v9  ;;  %v1451_v45 = vmul.f32 %v8107_v57, %v8076_v10  ;;  %v1491_v20 = vmul.f32 %v8107_v57, %v6740_v21 }
 0x380   : >> { %3156 = vmatpush1.bf16.msra.mxu1 %v2439_v44  ;;  %v2282_v50 = vpack.c.bf16 %v2202_v29, %v2162_v38  ;;  %v2084_v18 = vadd.f32 %v6826_v31, %v1949_v5  ;;  %v1906_v27 = vadd.f32 %v1786_v16, %v1449_v62  ;;  %v1946_v25 = vadd.f32 %v1826_v7, %v1489_v28 }
 0x381   : >> { %v2164_v61 = vmax.f32 %v2044_v15, 0.0  ;;  %v1788_v43 = vmul.f32 %v8108_v53, %v6786_v3  ;;  %v1828_v56 = vmul.f32 %v8108_v53, %v6788_v42  ;;  %v1534_v34 = vmul.f32 %v8109_v46, %v6701_v49  ;;  %5634 = vmatmul.mubr.msk.bf16.gmra.mxu0 %vm2352_vm5, %v8074_v26  ;;  %v8111_v53 = vld [vmem:[#allocation62_spill] sm:$0xff] }
 0x382   : >> { %3106 = vmatprep.subr.bf16.mxu0 %v2282_v50  ;;  %v2204_v57 = vmax.f32 %v2084_v18, 0.0  ;;  %v2041_v51 = vadd.f32 %v6810_v1, %v1906_v27  ;;  %v2081_v24 = vadd.f32 %v6826_v31, %v1946_v25  ;;  %v1871_v40 = vmul.f32 %v8110_v17, %v6756_v14  ;;  %3124 = vmatprep.mubr.bf16.mxu0 %v8073_v36 }
 0x383   : >> { %v1908_v8 = vadd.f32 %v1788_v43, %v1451_v45  ;;  %v1948_v37 = vadd.f32 %v1828_v56, %v1491_v20  ;;  %v1536_v4 = vmul.f32 %v8111_v53, %v6701_v49  ;;  %v1873_v60 = vmul.f32 %v8112_v48, %v6756_v14 }
 0x384   : >> { %v2284_v33 = vpack.c.bf16 %v2204_v57, %v2164_v61  ;;  %v2161_v47 = vmax.f32 %v2041_v51, 0.0  ;;  %v2201_v55 = vmax.f32 %v2081_v24, 0.0  ;;  %v1991_v13 = vadd.f32 %v1871_v40, %v1534_v34 }
 0x385   : >> { %v2043_v22 = vadd.f32 %v6810_v1, %v1908_v8  ;;  %v2083_v54 = vadd.f32 %v6826_v31, %v1948_v37  ;;  %v1993_v58 = vadd.f32 %v1873_v60, %v1536_v4  ;;  %5637 = vmatmul.mubr.msk.bf16.gmra.mxu1 %vm2352_vm5, %v8074_v26  ;;  %v1533_v41 = vmul.f32 %v8113_v30, %v6701_v49 }
 0x386   : >> { %3157 = vmatprep.subr.bf16.mxu1 %v2284_v33  ;;  %v2281_v6 = vpack.c.bf16 %v2201_v55, %v2161_v47  ;;  %v2126_v59 = vadd.f32 %v6808_v32, %v1991_v13  ;;  %3175 = vmatprep.mubr.bf16.mxu1 %v8073_v36  ;;  %v1870_v39 = vmul.f32 %v8114_v35, %v6756_v14  ;;  %v5577_v13 = vld [vmem:[%s6486_s23 + $0x100] ss:$8 sm:$0xf0] }
 0x387   : >> { %v2163_v0 = vmax.f32 %v2043_v22, 0.0  ;;  %v2203_v11 = vmax.f32 %v2083_v54, 0.0  ;;  %v2128_v12 = vadd.f32 %v6808_v32, %v1993_v58  ;;  %v1535_v2 = vmul.f32 %v8115_v23, %v6701_v49 }
 0x388   : >> { %3107 = vmatpush1.bf16.msra.mxu0 %v2281_v6  ;;  %v2246_v62 = vmax.f32 %v2126_v59, 0.0  ;;  %v1990_v28 = vadd.f32 %v1870_v39, %v1533_v41  ;;  %v1872_v19 = vmul.f32 %v8116_v63, %v6756_v14  ;;  %v1454_v38 = vmul.f32 %v8109_v46, %v8076_v10  ;;  %v5588_v41 = vld [vmem:[%s6492_s25 + $0x100] ss:$8 sm:$0xf] }
 0x389   : >> { %v2283_v9 = vpack.c.bf16 %v2203_v11, %v2163_v0  ;;  %v2248_v29 = vmax.f32 %v2128_v12, 0.0  ;;  %v1494_v5 = vmul.f32 %v8109_v46, %v6740_v21  ;;  %v1791_v16 = vmul.f32 %v8110_v17, %v6786_v3  ;;  %v5589_v6 = vld [vmem:[%s6492_s25 + $0x100] ss:$8 sm:$0xf0] }
 0x38a   : >> { %v2326_v7 = vpack.c.bf16 %v2246_v62, %v2246_v62  ;;  %v2125_v44 = vadd.f32 %v6808_v32, %v1990_v28  ;;  %v1992_v15 = vadd.f32 %v1872_v19, %v1535_v2  ;;  %v1831_v45 = vmul.f32 %v8110_v17, %v6788_v42 }
 0x38b   : >> { %3158 = vmatpush1.bf16.msra.mxu1 %v2283_v9  ;;  %v2328_v20 = vpack.c.bf16 %v2248_v29, %v2248_v29  ;;  %5639 = vmatmul.mubr.msk.bf16.vlgmr.msra.gmra.mxu0 %vm2352_vm5, %v6413_v52  ;;  %v1911_v50 = vadd.f32 %v1791_v16, %v1454_v38  ;;  %v1456_v18 = vmul.f32 %v8111_v53, %v8076_v10 }
 0x38c   : >> { %5644 = vmatprep.subr.msk.bf16.mxu0 %vm2359_vm4, %v2326_v7  ;;  %v2245_v27 = vmax.f32 %v2125_v44, 0.0  ;;  %v2127_v25 = vadd.f32 %v6808_v32, %v1992_v15  ;;  %v1951_v61 = vadd.f32 %v1831_v45, %v1494_v5  ;;  %v1496_v43 = vmul.f32 %v8111_v53, %v6740_v21  ;;  %3134 = vmatprep.mubr.bf16.mxu0 %v8073_v36  ;;  %v8117_v44 = vld [vmem:[#allocation5_spill] sm:$0xff] }
 0x38d   : >> { %5647 = vmatprep.subr.msk.bf16.mxu1 %vm2359_vm4, %v2328_v20  ;;  %v2046_v56 = vadd.f32 %v6810_v1, %v1911_v50  ;;  %v1793_v46 = vmul.f32 %v8112_v48, %v6786_v3  ;;  %v1833_v34 = vmul.f32 %v8112_v48, %v6788_v42  ;;  %v1453_v57 = vmul.f32 %v8113_v30, %v8076_v10  ;;  %v5576_v48 = vld [vmem:[%s6486_s23 + $0x100] ss:$8 sm:$0xf] }
 0x38e   : >> { %5642 = vmatmul.mubr.msk.bf16.vlgmr.msra.gmra.mxu1 %vm2352_vm5, %v6413_v52  ;;  %v2325_v51 = vpack.c.bf16 %v2245_v27, %v2245_v27  ;;  %v2247_v24 = vmax.f32 %v2127_v25, 0.0  ;;  %v2086_v17 = vadd.f32 %v6826_v31, %v1951_v61  ;;  %v1493_v40 = vmul.f32 %v8113_v30, %v6740_v21  ;;  %v8118_v20 = vld [vmem:[#allocation19_spill] sm:$0xff] }
 0x38f   : >> { %v2166_v8 = vmax.f32 %v2046_v56, 0.0  ;;  %v1913_v37 = vadd.f32 %v1793_v46, %v1456_v18  ;;  %v1953_v53 = vadd.f32 %v1833_v34, %v1496_v43  ;;  %v1790_v4 = vmul.f32 %v8114_v35, %v6786_v3  ;;  %3185 = vmatprep.mubr.bf16.mxu1 %v8073_v36 }
 0x390   : >> { %v2445_v60 = vsel %vm2359_vm4, %v2325_v51, 0  ;;  %v2327_v33 = vpack.c.bf16 %v2247_v24, %v2247_v24  ;;  %v2206_v47 = vmax.f32 %v2086_v17, 0.0  ;;  %v1830_v55 = vmul.f32 %v8114_v35, %v6788_v42 }
 0x391   : >> { %3207 = vmatpush1.bf16.msra.mxu0 %v2445_v60  ;;  %v2048_v22 = vadd.f32 %v6810_v1, %v1913_v37  ;;  %v2088_v54 = vadd.f32 %v6826_v31, %v1953_v53  ;;  %v1910_v58 = vadd.f32 %v1790_v4, %v1453_v57  ;;  %v1455_v30 = vmul.f32 %v8115_v23, %v8076_v10  ;;  %v8119_v57 = vld [vmem:[#allocation4_spill] sm:$0xff] }
 0x392   : >> { %v2451_v59 = vsel %vm2359_vm4, %v2327_v33, 0  ;;  %v2286_v39 = vpack.c.bf16 %v2206_v47, %v2166_v8  ;;  %v1950_v0 = vadd.f32 %v1830_v55, %v1493_v40  ;;  %v1495_v11 = vmul.f32 %v8115_v23, %v6740_v21  ;;  %v8120_v8 = vld [vmem:[#allocation18_spill] sm:$0xff] }
 0x393   : >> { %3258 = vmatpush1.bf16.msra.mxu1 %v2451_v59  ;;  %v2168_v35 = vmax.f32 %v2048_v22, 0.0  ;;  %v2208_v12 = vmax.f32 %v2088_v54, 0.0  ;;  %v2045_v2 = vadd.f32 %v6810_v1, %v1910_v58  ;;  %v1792_v62 = vmul.f32 %v8116_v63, %v6786_v3  ;;  %5640 = vmatmul.mubr.msk.bf16.gmra.mxu0 %vm2352_vm5, %v8074_v26 }
 0x394   : >> { %3208 = vmatprep.subr.bf16.mxu0 %v2286_v39  ;;  %v2085_v28 = vadd.f32 %v6826_v31, %v1950_v0  ;;  %v1832_v19 = vmul.f32 %v8116_v63, %v6788_v42  ;;  %v7341_v38 = vor.u32 %v5577_v13, %v5576_v48  ;;  %v7343_v23 = vor.u32 %v5589_v6, %v5588_v41 }
 0x395   : >> { %v2288_v9 = vpack.c.bf16 %v2208_v12, %v2168_v35  ;;  %v2165_v29 = vmax.f32 %v2045_v2, 0.0  ;;  %v1912_v5 = vadd.f32 %v1792_v62, %v1455_v30  ;;  %3226 = vmatprep.mubr.bf16.mxu0 %v8073_v36 }
 0x396   : >> { %v2205_v16 = vmax.f32 %v2085_v28, 0.0  ;;  %v1952_v7 = vadd.f32 %v1832_v19, %v1495_v11  ;;  %v1360_v15 = vrot.slane %v7341_v38, %v8117_v44  ;;  %v1697_v45 = vrot.slane %v7343_v23, %v8117_v44  ;;  %5643 = vmatmul.mubr.msk.bf16.gmra.mxu1 %vm2352_vm5, %v8074_v26 }
 0x397   : >> { %3259 = vmatprep.subr.bf16.mxu1 %v2288_v9  ;;  %v2047_v63 = vadd.f32 %v6810_v1, %v1912_v5  ;;  %v1368_v50 = vrot.slane %v7341_v38, %v8118_v20  ;;  %v1705_v18 = vrot.slane %v7343_v23, %v8118_v20  ;;  %3277 = vmatprep.mubr.bf16.mxu1 %v8073_v36 }
 0x398   : >> { %v2285_v27 = vpack.c.bf16 %v2205_v16, %v2165_v29  ;;  %v2087_v25 = vadd.f32 %v6826_v31, %v1952_v7  ;;  %v1538_v61 = vmul.f32 %v1360_v15, %v6701_v49  ;;  %v1875_v43 = vmul.f32 %v1697_v45, %v6756_v14 }
 0x399   : >> { %v2167_v56 = vmax.f32 %v2047_v63, 0.0  ;;  %v1540_v46 = vmul.f32 %v1368_v50, %v6701_v49  ;;  %v1877_v34 = vmul.f32 %v1705_v18, %v6756_v14  ;;  %v1356_v51 = vrot.slane %v7341_v38, %v8119_v57 }
 0x39a   : >> { %3209 = vmatpush1.bf16.msra.mxu0 %v2285_v27  ;;  %v2207_v24 = vmax.f32 %v2087_v25, 0.0  ;;  %v1995_v17 = vadd.f32 %v1875_v43, %v1538_v61  ;;  %v1693_v40 = vrot.slane %v7343_v23, %v8119_v57  ;;  %v1364_v37 = vrot.slane %v7341_v38, %v8120_v8 }
 0x39b   : >> { %v1997_v53 = vadd.f32 %v1877_v34, %v1540_v46  ;;  %v1537_v4 = vmul.f32 %v1356_v51, %v6701_v49  ;;  %v7372_v48 = vrot.slane %v7343_v23, %v8120_v8  ;;  %v1458_v60 = vmul.f32 %v1360_v15, %v8076_v10 }
 0x39c   : >> { %v2287_v33 = vpack.c.bf16 %v2207_v24, %v2167_v56  ;;  %v2130_v47 = vadd.f32 %v6808_v32, %v1995_v17  ;;  %v1874_v55 = vmul.f32 %v1693_v40, %v6756_v14  ;;  %v1539_v13 = vmul.f32 %v1364_v37, %v6701_v49 }
 0x39d   : >> { %v2132_v22 = vadd.f32 %v6808_v32, %v1997_v53  ;;  %5645 = vmatmul.mubr.msk.bf16.vlgmr.msra.gmra.mxu0 %vm2352_vm5, %v6413_v52  ;;  %v1876_v54 = vmul.f32 %v7372_v48, %v6756_v14  ;;  %v1498_v58 = vmul.f32 %v1360_v15, %v6740_v21  ;;  %v1795_v30 = vmul.f32 %v1697_v45, %v6786_v3 }
 0x39e   : >> { %3260 = vmatpush1.bf16.msra.mxu1 %v2287_v33  ;;  %v2250_v41 = vmax.f32 %v2130_v47, 0.0  ;;  %v1994_v6 = vadd.f32 %v1874_v55, %v1537_v4  ;;  %v1835_v59 = vmul.f32 %v1697_v45, %v6788_v42  ;;  %v1460_v39 = vmul.f32 %v1368_v50, %v8076_v10  ;;  %3236 = vmatprep.mubr.bf16.mxu0 %v8073_v36 }
 0x39f   : >> { %v2252_v0 = vmax.f32 %v2132_v22, 0.0  ;;  %v1996_v11 = vadd.f32 %v1876_v54, %v1539_v13  ;;  %v1915_v35 = vadd.f32 %v1795_v30, %v1458_v60  ;;  %v1500_v12 = vmul.f32 %v1368_v50, %v6740_v21 }
 0x3a0   : >> { %v2330_v2 = vpack.c.bf16 %v2250_v41, %v2250_v41  ;;  %v2129_v62 = vadd.f32 %v6808_v32, %v1994_v6  ;;  %v1955_v28 = vadd.f32 %v1835_v59, %v1498_v58  ;;  %v1797_v19 = vmul.f32 %v1705_v18, %v6786_v3  ;;  %v8121_v6 = vld [vmem:[#allocation24_spill] sm:$0xff] }
 0x3a1   : >> { %v2332_v9 = vpack.c.bf16 %v2252_v0, %v2252_v0  ;;  %5648 = vmatmul.mubr.msk.bf16.vlgmr.msra.gmra.mxu1 %vm2352_vm5, %v6413_v52  ;;  %v2131_v29 = vadd.f32 %v6808_v32, %v1996_v11  ;;  %v2050_v5 = vadd.f32 %v6810_v1, %v1915_v35  ;;  %v1837_v16 = vmul.f32 %v1705_v18, %v6788_v42  ;;  %v8122_v35 = vld [vmem:[#allocation25_spill] sm:$0xff] }
 0x3a2   : >> { %5650 = vmatprep.subr.msk.bf16.mxu0 %vm2359_vm4, %v2330_v2  ;;  %v2249_v7 = vmax.f32 %v2129_v62, 0.0  ;;  %v2090_v15 = vadd.f32 %v6826_v31, %v1955_v28  ;;  %v1917_v45 = vadd.f32 %v1797_v19, %v1460_v39  ;;  %v1457_v63 = vmul.f32 %v1356_v51, %v8076_v10  ;;  %3287 = vmatprep.mubr.bf16.mxu1 %v8073_v36 }
 0x3a3   : >> { %5653 = vmatprep.subr.msk.bf16.mxu1 %vm2359_vm4, %v2332_v9  ;;  %v2251_v50 = vmax.f32 %v2131_v29, 0.0  ;;  %v2170_v27 = vmax.f32 %v2050_v5, 0.0  ;;  %v1957_v25 = vadd.f32 %v1837_v16, %v1500_v12  ;;  %v1497_v61 = vmul.f32 %v1356_v51, %v6740_v21  ;;  %v8123_v5 = vld [vmem:[#allocation26_spill] sm:$0xff] }
 0x3a4   : >> { %v2329_v43 = vpack.c.bf16 %v2249_v7, %v2249_v7  ;;  %v2210_v56 = vmax.f32 %v2090_v15, 0.0  ;;  %v2052_v18 = vadd.f32 %v6810_v1, %v1917_v45  ;;  %v1794_v46 = vmul.f32 %v1693_v40, %v6786_v3 }
 0x3a5   : >> { %v2331_v34 = vpack.c.bf16 %v2251_v50, %v2251_v50  ;;  %v2092_v24 = vadd.f32 %v6826_v31, %v1957_v25  ;;  %v1834_v17 = vmul.f32 %v1693_v40, %v6788_v42  ;;  %v1459_v53 = vmul.f32 %v1364_v37, %v8076_v10  ;;  %5646 = vmatmul.mubr.msk.bf16.gmra.mxu0 %vm2352_vm5, %v8074_v26 }
 0x3a6   : >> { %v2457_v4 = vsel %vm2359_vm4, %v2329_v43, 0  ;;  %v2290_v60 = vpack.c.bf16 %v2210_v56, %v2170_v27  ;;  %v2172_v51 = vmax.f32 %v2052_v18, 0.0  ;;  %v1914_v33 = vadd.f32 %v1794_v46, %v1457_v63  ;;  %3328 = vmatprep.mubr.bf16.mxu0 %v8073_v36 }
 0x3a7   : >> { %3309 = vmatpush1.bf16.msra.mxu0 %v2457_v4  ;;  %v2463_v47 = vsel %vm2359_vm4, %v2331_v34, 0  ;;  %v2212_v55 = vmax.f32 %v2092_v24, 0.0  ;;  %v1954_v13 = vadd.f32 %v1834_v17, %v1497_v61  ;;  %v1499_v22 = vmul.f32 %v1364_v37, %v6740_v21  ;;  %v8124_v61 = vld [vmem:[#allocation27_spill] sm:$0xff] }
 0x3a8   : >> { %3360 = vmatpush1.bf16.msra.mxu1 %v2463_v47  ;;  %3310 = vmatprep.subr.bf16.mxu0 %v2290_v60  ;;  %v2049_v40 = vadd.f32 %v6810_v1, %v1914_v33  ;;  %v1796_v54 = vmul.f32 %v7372_v48, %v6786_v3  ;;  %v1836_v58 = vmul.f32 %v7372_v48, %v6788_v42 }
 0x3a9   : >> { %v2292_v30 = vpack.c.bf16 %v2212_v55, %v2172_v51  ;;  %v2089_v41 = vadd.f32 %v6826_v31, %v1954_v13  ;;  %v1376_v59 = vrot.slane %v7341_v38, %v8121_v6  ;;  %v1713_v39 = vrot.slane %v7343_v23, %v8121_v6  ;;  %5649 = vmatmul.mubr.msk.bf16.gmra.mxu1 %vm2352_vm5, %v8074_v26 }
 0x3aa   : >> { %v2169_v37 = vmax.f32 %v2049_v40, 0.0  ;;  %v1916_v0 = vadd.f32 %v1796_v54, %v1459_v53  ;;  %v1956_v11 = vadd.f32 %v1836_v58, %v1499_v22  ;;  %v1384_v12 = vrot.slane %v7341_v38, %v8122_v35  ;;  %3379 = vmatprep.mubr.bf16.mxu1 %v8073_v36 }
 0x3ab   : >> { %3361 = vmatprep.subr.bf16.mxu1 %v2292_v30  ;;  %v2209_v48 = vmax.f32 %v2089_v41, 0.0  ;;  %v1542_v2 = vmul.f32 %v1376_v59, %v6701_v49  ;;  %v1879_v62 = vmul.f32 %v1713_v39, %v6756_v14  ;;  %v1721_v28 = vrot.slane %v7343_v23, %v8122_v35 }
 0x3ac   : >> { %v2051_v19 = vadd.f32 %v6810_v1, %v1916_v0  ;;  %v2091_v9 = vadd.f32 %v6826_v31, %v1956_v11  ;;  %v1544_v29 = vmul.f32 %v1384_v12, %v6701_v49  ;;  %v1372_v16 = vrot.slane %v7341_v38, %v8123_v5 }
 0x3ad   : >> { %v2289_v7 = vpack.c.bf16 %v2209_v48, %v2169_v37  ;;  %v1999_v15 = vadd.f32 %v1879_v62, %v1542_v2  ;;  %v1881_v45 = vmul.f32 %v1721_v28, %v6756_v14  ;;  %v1709_v63 = vrot.slane %v7343_v23, %v8123_v5 }
 0x3ae   : >> { %v2171_v50 = vmax.f32 %v2051_v19, 0.0  ;;  %v2211_v27 = vmax.f32 %v2091_v9, 0.0  ;;  %v1541_v25 = vmul.f32 %v1372_v16, %v6701_v49  ;;  %v1380_v43 = vrot.slane %v7341_v38, %v8124_v61 }
 0x3af   : >> { %3311 = vmatpush1.bf16.msra.mxu0 %v2289_v7  ;;  %v2134_v56 = vadd.f32 %v6808_v32, %v1999_v15  ;;  %v2001_v18 = vadd.f32 %v1881_v45, %v1544_v29  ;;  %v1878_v46 = vmul.f32 %v1709_v63, %v6756_v14  ;;  %v1717_v34 = vrot.slane %v7343_v23, %v8124_v61 }
 0x3b0   : >> { %v2291_v24 = vpack.c.bf16 %v2211_v27, %v2171_v50  ;;  %v1543_v17 = vmul.f32 %v1380_v43, %v6701_v49  ;;  %v1462_v53 = vmul.f32 %v1376_v59, %v8076_v10  ;;  %v1502_v4 = vmul.f32 %v1376_v59, %v6740_v21 }
 0x3b1   : >> { %v2254_v60 = vmax.f32 %v2134_v56, 0.0  ;;  %v2136_v51 = vadd.f32 %v6808_v32, %v2001_v18  ;;  %v1998_v38 = vadd.f32 %v1878_v46, %v1541_v25  ;;  %v1880_v33 = vmul.f32 %v1717_v34, %v6756_v14 }
 0x3b2   : >> { %3362 = vmatpush1.bf16.msra.mxu1 %v2291_v24  ;;  %5651 = vmatmul.mubr.msk.bf16.vlgmr.msra.gmra.mxu0 %vm2352_vm5, %v6413_v52  ;;  %v1799_v47 = vmul.f32 %v1713_v39, %v6786_v3  ;;  %v1839_v23 = vmul.f32 %v1713_v39, %v6788_v42  ;;  %v1464_v49 = vmul.f32 %v1384_v12, %v8076_v10 }
 0x3b3   : >> { %v2334_v55 = vpack.c.bf16 %v2254_v60, %v2254_v60  ;;  %v2256_v13 = vmax.f32 %v2136_v51, 0.0  ;;  %v2133_v22 = vadd.f32 %v6808_v32, %v1998_v38  ;;  %v2000_v40 = vadd.f32 %v1880_v33, %v1543_v17  ;;  %3338 = vmatprep.mubr.bf16.mxu0 %v8073_v36 }
 0x3b4   : >> { %v1919_v54 = vadd.f32 %v1799_v47, %v1462_v53  ;;  %v1959_v58 = vadd.f32 %v1839_v23, %v1502_v4  ;;  %v1504_v14 = vmul.f32 %v1384_v12, %v6740_v21  ;;  %v1801_v30 = vmul.f32 %v1721_v28, %v6786_v3 }
 0x3b5   : >> { %5656 = vmatprep.subr.msk.bf16.mxu0 %vm2359_vm4, %v2334_v55  ;;  %v2336_v41 = vpack.c.bf16 %v2256_v13, %v2256_v13  ;;  %5654 = vmatmul.mubr.msk.bf16.vlgmr.msra.gmra.mxu1 %vm2352_vm5, %v6413_v52  ;;  %v2253_v59 = vmax.f32 %v2133_v22, 0.0  ;;  %v2135_v39 = vadd.f32 %v6808_v32, %v2000_v40  ;;  %v1841_v37 = vmul.f32 %v1721_v28, %v6788_v42  ;;  %v7504_v55 = vpop.permute.xlu1 %2349 }
 0x3b6   : >> { %v2054_v0 = vadd.f32 %v6810_v1, %v1919_v54  ;;  %v2094_v11 = vadd.f32 %v6826_v31, %v1959_v58  ;;  %v1921_v48 = vadd.f32 %v1801_v30, %v1464_v49  ;;  %v1461_v12 = vmul.f32 %v1372_v16, %v8076_v10  ;;  %3389 = vmatprep.mubr.bf16.mxu1 %v8073_v36 }
 0x3b7   : >> { %5659 = vmatprep.subr.msk.bf16.mxu1 %vm2359_vm4, %v2336_v41  ;;  %v2333_v2 = vpack.c.bf16 %v2253_v59, %v2253_v59  ;;  %v2255_v62 = vmax.f32 %v2135_v39, 0.0  ;;  %v1961_v19 = vadd.f32 %v1841_v37, %v1504_v14  ;;  %v1501_v9 = vmul.f32 %v1372_v16, %v6740_v21  ;;  %v7508_v39 = vpop.permute.xlu0 %2339 }
 0x3b8   : >> { %v2174_v29 = vmax.f32 %v2054_v0, 0.0  ;;  %v2214_v32 = vmax.f32 %v2094_v11, 0.0  ;;  %v2056_v28 = vadd.f32 %v6810_v1, %v1921_v48  ;;  %v1798_v7 = vmul.f32 %v1709_v63, %v6786_v3 }
 0x3b9   : >> { %v2469_v15 = vsel %vm2359_vm4, %v2333_v2, 0  ;;  %v2335_v45 = vpack.c.bf16 %v2255_v62, %v2255_v62  ;;  %v2096_v50 = vadd.f32 %v6826_v31, %v1961_v19  ;;  %v1838_v27 = vmul.f32 %v1709_v63, %v6788_v42  ;;  %v7506_v30 = vpop.permute.xlu1 %2344 }
 0x3ba   : >> { %3411 = vmatpush1.bf16.msra.mxu0 %v2469_v15  ;;  %v2294_v25 = vpack.c.bf16 %v2214_v32, %v2174_v29  ;;  %v2176_v56 = vmax.f32 %v2056_v28, 0.0  ;;  %v1918_v18 = vadd.f32 %v1798_v7, %v1461_v12  ;;  %v1463_v46 = vmul.f32 %v1380_v43, %v8076_v10 }
 0x3bb   : >> { %v2475_v16 = vsel %vm2359_vm4, %v2335_v45, 0  ;;  %v2216_v24 = vmax.f32 %v2096_v50, 0.0  ;;  %v1958_v17 = vadd.f32 %v1838_v27, %v1501_v9  ;;  %v1503_v53 = vmul.f32 %v1380_v43, %v6740_v21  ;;  %5652 = vmatmul.mubr.msk.bf16.gmra.mxu0 %vm2352_vm5, %v8074_v26 }
 0x3bc   : >> { %3462 = vmatpush1.bf16.msra.mxu1 %v2475_v16  ;;  %3412 = vmatprep.subr.bf16.mxu0 %v2294_v25  ;;  %v2053_v4 = vadd.f32 %v6810_v1, %v1918_v18  ;;  %v1800_v63 = vmul.f32 %v1717_v34, %v6786_v3  ;;  %v1840_v60 = vmul.f32 %v1717_v34, %v6788_v42 }
 0x3bd   : >> { %v2296_v51 = vpack.c.bf16 %v2216_v24, %v2176_v56  ;;  %v2093_v10 = vadd.f32 %v6826_v31, %v1958_v17  ;;  %5655 = vmatmul.mubr.msk.bf16.gmra.mxu1 %vm2352_vm5, %v8074_v26  ;;  %3430 = vmatprep.mubr.bf16.mxu0 %v8073_v36 }
 0x3be   : >> { %v1920_v21 = vadd.f32 %v1800_v63, %v1463_v46  ;;  %v1960_v43 = vadd.f32 %v1840_v60, %v1503_v53  ;;  %3481 = vmatprep.mubr.bf16.mxu1 %v8073_v36  ;;  %v2173_v38 = vmax.f32 %v2053_v4, 0.0 }
 0x3bf   : >> { %3463 = vmatprep.subr.bf16.mxu1 %v2296_v51  ;;  %v2213_v33 = vmax.f32 %v2093_v10, 0.0 }
 0x3c0   : >> { %v2055_v47 = vadd.f32 %v6810_v1, %v1920_v21  ;;  %v2095_v3 = vadd.f32 %v6826_v31, %v1960_v43 }
 0x3c1   : >> { %v2293_v42 = vpack.c.bf16 %v2213_v33, %v2173_v38 }
 0x3c2   : >> { %v2175_v34 = vmax.f32 %v2055_v47, 0.0  ;;  %v2215_v23 = vmax.f32 %v2095_v3, 0.0 }
 0x3c3   : >> { %3413 = vmatpush1.bf16.msra.mxu0 %v2293_v42 }
 0x3c4   : >> { %v2295_v49 = vpack.c.bf16 %v2215_v23, %v2175_v34 }
 0x3c6   : >> { %3464 = vmatpush1.bf16.msra.mxu1 %v2295_v49  ;;  %5657 = vmatmul.mubr.msk.bf16.vlgmr.msra.gmra.mxu0 %vm2352_vm5, %v6413_v52 }
 0x3c7   : >> { %3440 = vmatprep.mubr.bf16.mxu0 %v8073_v36 }
 0x3c9   : >> { %5660 = vmatmul.mubr.msk.bf16.vlgmr.msra.gmra.mxu1 %vm2352_vm5, %v6413_v52 }
 0x3ca   : >> { %3491 = vmatprep.mubr.bf16.mxu1 %v8073_v36 }
 0x3ce   : >> { %5658 = vmatmul.mubr.msk.bf16.gmra.mxu0 %vm2352_vm5, %v8074_v26 }
 0x3cf   : >> { %3864 = vmatprep.mubr.bf16.mxu0 %v8073_v36 }
 0x3d1   : >> { %5661 = vmatmul.mubr.msk.bf16.gmra.mxu1 %vm2352_vm5, %v8074_v26 }
 0x3d2   : >> { %3905 = vmatprep.mubr.bf16.mxu1 %v8073_v36 }
 0x3e5   : >> { %v2514_v1 = vpop.f32.mrf.mxu0  ;;  %v2565_v31 = vpop.f32.mrf.mxu1 }
 0x3e6   : >> { %v2515_v46 = vadd.f32 %v2514_v1, %v7508_v39  ;;  %v2566_v16 = vadd.f32 %v2565_v31, %v7508_v39 }
 0x3e7   : >> { %v2516_v13 = vpop.f32.mrf.mxu0  ;;  %v2567_v22 = vpop.f32.mrf.mxu1 }
 0x3e8   : >> { %v2517_v62 = vadd.f32 %v2516_v13, %v7508_v39  ;;  %v2568_v19 = vadd.f32 %v2567_v22, %v7508_v39  ;;  %v3500_v23 = vmax.f32 %v2515_v46, 0.0  ;;  %v3502_v49 = vmax.f32 %v2566_v16, 0.0 }
 0x3e9   : >> { %v2518_v40 = vpop.f32.mrf.mxu0  ;;  %v2569_v54 = vpop.f32.mrf.mxu1 }
 0x3ea   : >> { %v2519_v32 = vadd.f32 %v2518_v40, %v7506_v30  ;;  %v2570_v28 = vadd.f32 %v2569_v54, %v7506_v30  ;;  %v3501_v63 = vmax.f32 %v2517_v62, 0.0  ;;  %v3503_v60 = vmax.f32 %v2568_v19, 0.0 }
 0x3eb   : >> { %v2520_v58 = vpop.f32.mrf.mxu0  ;;  %v2571_v14 = vpop.f32.mrf.mxu1 }
 0x3ec   : >> { %v2521_v37 = vadd.f32 %v2520_v58, %v7506_v30  ;;  %v2572_v0 = vadd.f32 %v2571_v14, %v7506_v30  ;;  %v3540_v21 = vmax.f32 %v2519_v32, 0.0  ;;  %v3542_v43 = vmax.f32 %v2570_v28, 0.0 }
 0x3ed   : >> { %v2524_v41 = vpop.f32.mrf.mxu0  ;;  %v2575_v59 = vpop.f32.mrf.mxu1 }
 0x3ee   : >> { %v2525_v11 = vadd.f32 %v2524_v41, %v7504_v55  ;;  %v2576_v48 = vadd.f32 %v2575_v59, %v7504_v55  ;;  %v3541_v27 = vmax.f32 %v2521_v37, 0.0  ;;  %v3543_v25 = vmax.f32 %v2572_v0, 0.0  ;;  %v8125_v0 = vld [vmem:[#allocation17_spill] sm:$0xff] }
 0x3ef   : >> { %v2526_v12 = vpop.f32.mrf.mxu0  ;;  %v2577_v2 = vpop.f32.mrf.mxu1  ;;  %v3620_v13 = vpack.c.bf16 %v3540_v21, %v3500_v23  ;;  %v3622_v22 = vpack.c.bf16 %v3542_v43, %v3502_v49 }
 0x3f0   : >> { %v2527_v9 = vadd.f32 %v2526_v12, %v7504_v55  ;;  %v2578_v29 = vadd.f32 %v2577_v2, %v7504_v55  ;;  %v3580_v7 = vmax.f32 %v2525_v11, 0.0  ;;  %v3582_v15 = vmax.f32 %v2576_v48, 0.0 }
 0x3f1   : >> { %v2528_v45 = vpop.f32.mrf.mxu0  ;;  %v2579_v50 = vpop.f32.mrf.mxu1  ;;  %v3621_v42 = vpack.c.bf16 %v3541_v27, %v3501_v63  ;;  %v3623_v34 = vpack.c.bf16 %v3543_v25, %v3503_v60 }
 0x3f2   : >> { %v3581_v56 = vmax.f32 %v2527_v9, 0.0  ;;  %v3583_v18 = vmax.f32 %v2578_v29, 0.0  ;;  %v3660_v24 = vpack.c.bf16 %v3580_v7, %v3580_v7  ;;  %v3662_v17 = vpack.c.bf16 %v3582_v15, %v3582_v15 }
 0x3f3   : >> { %v2529_v53 = vpop.f32.mrf.mxu0  ;;  %v2580_v4 = vpop.f32.mrf.mxu1 }
 0x3f4   : >> { %v3661_v51 = vpack.c.bf16 %v3581_v56, %v3581_v56  ;;  %v3663_v10 = vpack.c.bf16 %v3583_v18, %v3583_v18  ;;  %v3713_v47 = vsel %vm2359_vm4, %v3660_v24, 0  ;;  %v3719_v3 = vsel %vm2359_vm4, %v3662_v17, 0 }
 0x3f5   : >> { %v2616_v38 = vpop.f32.mrf.mxu0  ;;  %v2667_v33 = vpop.f32.mrf.mxu1 }
 0x3f6   : >> { %5662 = vmatprep.subr.msk.bf16.mxu0 %vm2359_vm4, %v3661_v51  ;;  %5664 = vmatprep.subr.msk.bf16.mxu1 %vm2359_vm4, %v3663_v10  ;;  %v2617_v50 = vadd.f32 %v2616_v38, %v7508_v39  ;;  %v2668_v4 = vadd.f32 %v2667_v33, %v7508_v39 }
 0x3f7   : >> { %v2618_v1 = vpop.f32.mrf.mxu0  ;;  %v2669_v31 = vpop.f32.mrf.mxu1  ;;  %3845 = vmatpush1.bf16.msra.mxu0 %v3713_v47  ;;  %3886 = vmatpush1.bf16.msra.mxu1 %v3719_v3 }
 0x3f8   : >> { %3846 = vmatprep.subr.bf16.mxu0 %v3621_v42  ;;  %3887 = vmatprep.subr.bf16.mxu1 %v3623_v34  ;;  %v2619_v62 = vadd.f32 %v2618_v1, %v7508_v39  ;;  %v2670_v19 = vadd.f32 %v2669_v31, %v7508_v39  ;;  %v3504_v23 = vmax.f32 %v2617_v50, 0.0  ;;  %v3506_v31 = vmax.f32 %v2668_v4, 0.0 }
 0x3f9   : >> { %v2620_v40 = vpop.f32.mrf.mxu0  ;;  %v2671_v54 = vpop.f32.mrf.mxu1 }
 0x3fa   : >> { %v2621_v32 = vadd.f32 %v2620_v40, %v7506_v30  ;;  %v2672_v27 = vadd.f32 %v2671_v54, %v7506_v30  ;;  %v3505_v63 = vmax.f32 %v2619_v62, 0.0  ;;  %v3507_v10 = vmax.f32 %v2670_v19, 0.0 }
 0x3fb   : >> { %v2622_v58 = vpop.f32.mrf.mxu0  ;;  %v2673_v14 = vpop.f32.mrf.mxu1  ;;  %3847 = vmatpush1.bf16.msra.mxu0 %v3620_v13  ;;  %3888 = vmatpush1.bf16.msra.mxu1 %v3622_v22 }
 0x3fc   : >> { %v2623_v59 = vadd.f32 %v2622_v58, %v7506_v30  ;;  %v2674_v11 = vadd.f32 %v2673_v14, %v7506_v30  ;;  %v3544_v21 = vmax.f32 %v2621_v32, 0.0  ;;  %v3546_v38 = vmax.f32 %v2672_v27, 0.0 }
 0x3fd   : >> { %v2626_v41 = vpop.f32.mrf.mxu0 }
 0x3fe   : >> { %v2677_v37 = vpop.f32.mrf.mxu1  ;;  %5663 = vmatmul.mubr.msk.bf16.vlgmr.msra.gmra.mxu0 %vm2352_vm5, %v8125_v0  ;;  %5665 = vmatmul.mubr.msk.bf16.vlgmr.msra.gmra.mxu1 %vm2352_vm5, %v8125_v0  ;;  %v2627_v48 = vadd.f32 %v2626_v41, %v7504_v55  ;;  %v3545_v25 = vmax.f32 %v2623_v59, 0.0  ;;  %v3547_v46 = vmax.f32 %v2674_v11, 0.0  ;;  %v3624_v22 = vpack.c.bf16 %v3544_v21, %v3504_v23 }
 0x3ff   : >> { %v2678_v12 = vadd.f32 %v2677_v37, %v7504_v55  ;;  %v2628_v2 = vpop.f32.mrf.mxu0  ;;  %3946 = vmatprep.mubr.bf16.mxu0 %v8073_v36  ;;  %3987 = vmatprep.mubr.bf16.mxu1 %v8073_v36  ;;  %v3626_v54 = vpack.c.bf16 %v3546_v38, %v3506_v31 }
 0x400   : >> { %v2629_v9 = vadd.f32 %v2628_v2, %v7504_v55  ;;  %v2679_v29 = vpop.f32.mrf.mxu1  ;;  %v3584_v28 = vmax.f32 %v2627_v48, 0.0  ;;  %v3625_v3 = vpack.c.bf16 %v3545_v25, %v3505_v63  ;;  %v3627_v49 = vpack.c.bf16 %v3547_v46, %v3507_v10 }
 0x401   : >> { %v3586_v7 = vmax.f32 %v2678_v12, 0.0  ;;  %v2680_v15 = vadd.f32 %v2679_v29, %v7504_v55  ;;  %v2630_v45 = vpop.f32.mrf.mxu0 }
 0x402   : >> { %v3585_v56 = vmax.f32 %v2629_v9, 0.0  ;;  %v2681_v18 = vpop.f32.mrf.mxu1  ;;  %v3664_v16 = vpack.c.bf16 %v3584_v28, %v3584_v28 }
 0x403   : >> { %v3666_v24 = vpack.c.bf16 %v3586_v7, %v3586_v7  ;;  %v3587_v17 = vmax.f32 %v2680_v15, 0.0  ;;  %v2631_v53 = vpop.f32.mrf.mxu0 }
 0x404   : >> { %v3665_v60 = vpack.c.bf16 %v3585_v56, %v3585_v56  ;;  %v2682_v51 = vpop.f32.mrf.mxu1  ;;  %v3725_v34 = vsel %vm2359_vm4, %v3664_v16, 0 }
 0x405   : >> { %v3667_v43 = vpack.c.bf16 %v3587_v17, %v3587_v17  ;;  %v2718_v47 = vpop.f32.mrf.mxu0  ;;  %v3731_v33 = vsel %vm2359_vm4, %v3666_v24, 0 }
 0x406   : >> { %v2769_v42 = vpop.f32.mrf.mxu1  ;;  %5666 = vmatprep.subr.msk.bf16.mxu0 %vm2359_vm4, %v3665_v60  ;;  %v2719_v16 = vadd.f32 %v2718_v47, %v7508_v39 }
 0x407   : >> { %5668 = vmatprep.subr.msk.bf16.mxu1 %vm2359_vm4, %v3667_v43  ;;  %v2720_v1 = vpop.f32.mrf.mxu0  ;;  %3927 = vmatpush1.bf16.msra.mxu0 %v3725_v34  ;;  %v2770_v63 = vadd.f32 %v2769_v42, %v7508_v39 }
 0x408   : >> { %v2771_v13 = vpop.f32.mrf.mxu1  ;;  %3968 = vmatpush1.bf16.msra.mxu1 %v3731_v33  ;;  %3928 = vmatprep.subr.bf16.mxu0 %v3625_v3  ;;  %v2721_v19 = vadd.f32 %v2720_v1, %v7508_v39  ;;  %v3508_v47 = vmax.f32 %v2719_v16, 0.0 }
 0x409   : >> { %3969 = vmatprep.subr.bf16.mxu1 %v3627_v49  ;;  %v2722_v40 = vpop.f32.mrf.mxu0  ;;  %v2772_v28 = vadd.f32 %v2771_v13, %v7508_v39  ;;  %v3510_v31 = vmax.f32 %v2770_v63, 0.0 }
 0x40a   : >> { %v2773_v58 = vpop.f32.mrf.mxu1  ;;  %v2723_v7 = vadd.f32 %v2722_v40, %v7506_v30  ;;  %v3509_v60 = vmax.f32 %v2721_v19, 0.0 }
 0x40b   : >> { %v2724_v14 = vpop.f32.mrf.mxu0  ;;  %3929 = vmatpush1.bf16.msra.mxu0 %v3624_v22  ;;  %v2774_v27 = vadd.f32 %v2773_v58, %v7506_v30  ;;  %v3511_v21 = vmax.f32 %v2772_v28, 0.0 }
 0x40c   : >> { %v2775_v41 = vpop.f32.mrf.mxu1  ;;  %3970 = vmatpush1.bf16.msra.mxu1 %v3626_v54  ;;  %v2725_v37 = vadd.f32 %v2724_v14, %v7506_v30  ;;  %v3548_v43 = vmax.f32 %v2723_v7, 0.0 }
 0x40d   : >> { %v2728_v59 = vpop.f32.mrf.mxu0  ;;  %v2776_v12 = vadd.f32 %v2775_v41, %v7506_v30  ;;  %v3550_v34 = vmax.f32 %v2774_v27, 0.0 }
 0x40e   : >> { %v2729_v11 = vadd.f32 %v2728_v59, %v7504_v55  ;;  %v2779_v48 = vpop.f32.mrf.mxu1  ;;  %5667 = vmatmul.mubr.msk.bf16.vlgmr.msra.gmra.mxu0 %vm2352_vm5, %v8125_v0  ;;  %v3549_v25 = vmax.f32 %v2725_v37, 0.0  ;;  %v3628_v13 = vpack.c.bf16 %v3548_v43, %v3508_v47 }
 0x40f   : >> { %v2780_v2 = vadd.f32 %v2779_v48, %v7504_v55  ;;  %5669 = vmatmul.mubr.msk.bf16.vlgmr.msra.gmra.mxu1 %vm2352_vm5, %v8125_v0  ;;  %v2730_v62 = vpop.f32.mrf.mxu0  ;;  %4028 = vmatprep.mubr.bf16.mxu0 %v8073_v36  ;;  %v3551_v24 = vmax.f32 %v2776_v12, 0.0  ;;  %v3630_v54 = vpack.c.bf16 %v3550_v34, %v3510_v31 }
 0x410   : >> { %v3588_v9 = vmax.f32 %v2729_v11, 0.0  ;;  %v2731_v29 = vadd.f32 %v2730_v62, %v7504_v55  ;;  %v2781_v32 = vpop.f32.mrf.mxu1  ;;  %4069 = vmatprep.mubr.bf16.mxu1 %v8073_v36  ;;  %v3629_v23 = vpack.c.bf16 %v3549_v25, %v3509_v60 }
 0x411   : >> { %v3590_v15 = vmax.f32 %v2780_v2, 0.0  ;;  %v2782_v45 = vadd.f32 %v2781_v32, %v7504_v55  ;;  %v2732_v50 = vpop.f32.mrf.mxu0  ;;  %v3631_v1 = vpack.c.bf16 %v3551_v24, %v3511_v21 }
 0x412   : >> { %v3668_v56 = vpack.c.bf16 %v3588_v9, %v3588_v9  ;;  %v3589_v18 = vmax.f32 %v2731_v29, 0.0  ;;  %v2783_v46 = vpop.f32.mrf.mxu1 }
 0x413   : >> { %v3670_v17 = vpack.c.bf16 %v3590_v15, %v3590_v15  ;;  %v3591_v53 = vmax.f32 %v2782_v45, 0.0  ;;  %v2733_v4 = vpop.f32.mrf.mxu0 }
 0x414   : >> { %v3669_v51 = vpack.c.bf16 %v3589_v18, %v3589_v18  ;;  %v2784_v10 = vpop.f32.mrf.mxu1  ;;  %v3737_v49 = vsel %vm2359_vm4, %v3668_v56, 0 }
 0x415   : >> { %v3671_v38 = vpack.c.bf16 %v3591_v53, %v3591_v53  ;;  %v2820_v3 = vpop.f32.mrf.mxu0  ;;  %v3743_v42 = vsel %vm2359_vm4, %v3670_v17, 0 }
 0x416   : >> { %5670 = vmatprep.subr.msk.bf16.mxu0 %vm2359_vm4, %v3669_v51  ;;  %v2821_v50 = vadd.f32 %v2820_v3, %v7508_v39 }
 0x417   : >> { %5672 = vmatprep.subr.msk.bf16.mxu1 %vm2359_vm4, %v3671_v38  ;;  %v2822_v33 = vpop.f32.mrf.mxu0  ;;  %4009 = vmatpush1.bf16.msra.mxu0 %v3737_v49 }
 0x418   : >> { %4050 = vmatpush1.bf16.msra.mxu1 %v3743_v42  ;;  %4010 = vmatprep.subr.bf16.mxu0 %v3629_v23  ;;  %v2823_v11 = vadd.f32 %v2822_v33, %v7508_v39  ;;  %v3512_v38 = vmax.f32 %v2821_v50, 0.0 }
 0x419   : >> { %v2871_v22 = vpop.f32.mrf.mxu1  ;;  %4051 = vmatprep.subr.bf16.mxu1 %v3631_v1  ;;  %v2824_v40 = vpop.f32.mrf.mxu0 }
 0x41a   : >> { %v2825_v19 = vadd.f32 %v2824_v40, %v7506_v30  ;;  %v3513_v27 = vmax.f32 %v2823_v11, 0.0  ;;  %v2872_v3 = vadd.f32 %v2871_v22, %v7508_v39 }
 0x41b   : >> { %v2873_v58 = vpop.f32.mrf.mxu1  ;;  %v2826_v14 = vpop.f32.mrf.mxu0  ;;  %4011 = vmatpush1.bf16.msra.mxu0 %v3628_v13 }
 0x41c   : >> { %4052 = vmatpush1.bf16.msra.mxu1 %v3630_v54  ;;  %v2827_v59 = vadd.f32 %v2826_v14, %v7506_v30  ;;  %v2874_v46 = vadd.f32 %v2873_v58, %v7508_v39  ;;  %v3552_v53 = vmax.f32 %v2825_v19, 0.0  ;;  %v3514_v54 = vmax.f32 %v2872_v3, 0.0 }
 0x41d   : >> { %v2875_v41 = vpop.f32.mrf.mxu1  ;;  %v2830_v37 = vpop.f32.mrf.mxu0 }
 0x41e   : >> { %5671 = vmatmul.mubr.msk.bf16.vlgmr.msra.gmra.mxu0 %vm2352_vm5, %v8125_v0  ;;  %v2831_v12 = vadd.f32 %v2830_v37, %v7504_v55  ;;  %v3553_v9 = vmax.f32 %v2827_v59, 0.0  ;;  %v2876_v4 = vadd.f32 %v2875_v41, %v7506_v30  ;;  %v3515_v49 = vmax.f32 %v2874_v46, 0.0 }
 0x41f   : >> { %v2877_v48 = vpop.f32.mrf.mxu1  ;;  %5673 = vmatmul.mubr.msk.bf16.vlgmr.msra.gmra.mxu1 %vm2352_vm5, %v8125_v0  ;;  %v2832_v2 = vpop.f32.mrf.mxu0  ;;  %4110 = vmatprep.mubr.bf16.mxu0 %v8073_v36  ;;  %v3632_v1 = vpack.c.bf16 %v3552_v53, %v3512_v38 }
 0x420   : >> { %v2833_v62 = vadd.f32 %v2832_v2, %v7504_v55  ;;  %4151 = vmatprep.mubr.bf16.mxu1 %v8073_v36  ;;  %v3592_v29 = vmax.f32 %v2831_v12, 0.0  ;;  %v2878_v7 = vadd.f32 %v2877_v48, %v7506_v30  ;;  %v3633_v63 = vpack.c.bf16 %v3553_v9, %v3513_v27 }
 0x421   : >> { %v2881_v32 = vpop.f32.mrf.mxu1  ;;  %v2834_v28 = vpop.f32.mrf.mxu0  ;;  %v3554_v33 = vmax.f32 %v2876_v4, 0.0 }
 0x422   : >> { %v2882_v15 = vadd.f32 %v2881_v32, %v7504_v55  ;;  %v3593_v45 = vmax.f32 %v2833_v62, 0.0  ;;  %v3672_v25 = vpack.c.bf16 %v3592_v29, %v3592_v29  ;;  %v3555_v51 = vmax.f32 %v2878_v7, 0.0 }
 0x423   : >> { %v2883_v56 = vpop.f32.mrf.mxu1  ;;  %v2835_v18 = vpop.f32.mrf.mxu0  ;;  %v3634_v14 = vpack.c.bf16 %v3554_v33, %v3514_v54 }
 0x424   : >> { %v3594_v16 = vmax.f32 %v2882_v15, 0.0  ;;  %v3673_v24 = vpack.c.bf16 %v3593_v45, %v3593_v45  ;;  %v2884_v17 = vadd.f32 %v2883_v56, %v7504_v55  ;;  %v3749_v43 = vsel %vm2359_vm4, %v3672_v25, 0 }
 0x425   : >> { %v2885_v60 = vpop.f32.mrf.mxu1  ;;  %v3635_v31 = vpack.c.bf16 %v3555_v51, %v3515_v49 }
 0x426   : >> { %v3674_v10 = vpack.c.bf16 %v3594_v16, %v3594_v16  ;;  %v3595_v21 = vmax.f32 %v2884_v17, 0.0  ;;  %5674 = vmatprep.subr.msk.bf16.mxu0 %vm2359_vm4, %v3673_v24 }
 0x427   : >> { %v2886_v34 = vpop.f32.mrf.mxu1  ;;  %v2922_v23 = vpop.f32.mrf.mxu0  ;;  %4091 = vmatpush1.bf16.msra.mxu0 %v3749_v43 }
 0x428   : >> { %v3675_v47 = vpack.c.bf16 %v3595_v21, %v3595_v21  ;;  %4092 = vmatprep.subr.bf16.mxu0 %v3633_v63  ;;  %v3755_v40 = vsel %vm2359_vm4, %v3674_v10, 0  ;;  %v2923_v56 = vadd.f32 %v2922_v23, %v7508_v39 }
 0x429   : >> { %v2924_v42 = vpop.f32.mrf.mxu0 }
 0x42a   : >> { %v2973_v13 = vpop.f32.mrf.mxu1  ;;  %5676 = vmatprep.subr.msk.bf16.mxu1 %vm2359_vm4, %v3675_v47  ;;  %v2925_v62 = vadd.f32 %v2924_v42, %v7508_v39  ;;  %v3516_v23 = vmax.f32 %v2923_v56, 0.0 }
 0x42b   : >> { %4132 = vmatpush1.bf16.msra.mxu1 %v3755_v40  ;;  %v2926_v58 = vpop.f32.mrf.mxu0  ;;  %4093 = vmatpush1.bf16.msra.mxu0 %v3632_v1  ;;  %v2974_v43 = vadd.f32 %v2973_v13, %v7508_v39 }
 0x42c   : >> { %v2975_v22 = vpop.f32.mrf.mxu1  ;;  %4133 = vmatprep.subr.bf16.mxu1 %v3635_v31  ;;  %v2927_v32 = vadd.f32 %v2926_v58, %v7506_v30  ;;  %v3517_v17 = vmax.f32 %v2925_v62, 0.0 }
 0x42d   : >> { %v2928_v41 = vpop.f32.mrf.mxu0  ;;  %v2976_v18 = vadd.f32 %v2975_v22, %v7508_v39  ;;  %v3518_v54 = vmax.f32 %v2974_v43, 0.0 }
 0x42e   : >> { %v2977_v59 = vpop.f32.mrf.mxu1  ;;  %5675 = vmatmul.mubr.msk.bf16.vlgmr.msra.gmra.mxu0 %vm2352_vm5, %v8125_v0  ;;  %v2929_v11 = vadd.f32 %v2928_v41, %v7506_v30  ;;  %v3556_v60 = vmax.f32 %v2927_v32, 0.0 }
 0x42f   : >> { %4134 = vmatpush1.bf16.msra.mxu1 %v3634_v14  ;;  %v2932_v37 = vpop.f32.mrf.mxu0  ;;  %4192 = vmatprep.mubr.bf16.mxu0 %v8073_v36  ;;  %v2978_v53 = vadd.f32 %v2977_v59, %v7506_v30  ;;  %v3519_v49 = vmax.f32 %v2976_v18, 0.0 }
 0x430   : >> { %v2979_v48 = vpop.f32.mrf.mxu1  ;;  %v2933_v12 = vadd.f32 %v2932_v37, %v7504_v55  ;;  %v3557_v45 = vmax.f32 %v2929_v11, 0.0  ;;  %v3636_v42 = vpack.c.bf16 %v3556_v60, %v3516_v23 }
 0x431   : >> { %v2934_v2 = vpop.f32.mrf.mxu0  ;;  %v2980_v28 = vadd.f32 %v2979_v48, %v7506_v30  ;;  %v3558_v33 = vmax.f32 %v2978_v53, 0.0 }
 0x432   : >> { %v3596_v19 = vmax.f32 %v2933_v12, 0.0  ;;  %v2983_v9 = vpop.f32.mrf.mxu1  ;;  %5677 = vmatmul.mubr.msk.bf16.vlgmr.msra.gmra.mxu1 %vm2352_vm5, %v8125_v0  ;;  %v2935_v29 = vadd.f32 %v2934_v2, %v7504_v55  ;;  %v3637_v38 = vpack.c.bf16 %v3557_v45, %v3517_v17 }
 0x433   : >> { %v2984_v7 = vadd.f32 %v2983_v9, %v7504_v55  ;;  %v2936_v15 = vpop.f32.mrf.mxu0  ;;  %4233 = vmatprep.mubr.bf16.mxu1 %v8073_v36  ;;  %v3559_v51 = vmax.f32 %v2980_v28, 0.0  ;;  %v3638_v14 = vpack.c.bf16 %v3558_v33, %v3518_v54 }
 0x434   : >> { %v3676_v50 = vpack.c.bf16 %v3596_v19, %v3596_v19  ;;  %v3597_v27 = vmax.f32 %v2935_v29, 0.0  ;;  %v2985_v25 = vpop.f32.mrf.mxu1 }
 0x435   : >> { %v3598_v46 = vmax.f32 %v2984_v7, 0.0  ;;  %v2986_v16 = vadd.f32 %v2985_v25, %v7504_v55  ;;  %v2937_v24 = vpop.f32.mrf.mxu0  ;;  %v3639_v31 = vpack.c.bf16 %v3559_v51, %v3519_v49 }
 0x436   : >> { %v3677_v4 = vpack.c.bf16 %v3597_v27, %v3597_v27  ;;  %v2987_v63 = vpop.f32.mrf.mxu1  ;;  %v3761_v34 = vsel %vm2359_vm4, %v3676_v50, 0 }
 0x437   : >> { %v3678_v10 = vpack.c.bf16 %v3598_v46, %v3598_v46  ;;  %v3599_v21 = vmax.f32 %v2986_v16, 0.0 }
 0x438   : >> { %v2988_v3 = vpop.f32.mrf.mxu1  ;;  %5678 = vmatprep.subr.msk.bf16.mxu0 %vm2359_vm4, %v3677_v4 }
 0x439   : >> { %v3679_v47 = vpack.c.bf16 %v3599_v21, %v3599_v21  ;;  %v3024_v1 = vpop.f32.mrf.mxu0  ;;  %4173 = vmatpush1.bf16.msra.mxu0 %v3761_v34  ;;  %v3767_v13 = vsel %vm2359_vm4, %v3678_v10, 0 }
 0x43a   : >> { %4174 = vmatprep.subr.bf16.mxu0 %v3637_v38  ;;  %v3025_v25 = vadd.f32 %v3024_v1, %v7508_v39 }
 0x43b   : >> { %5680 = vmatprep.subr.msk.bf16.mxu1 %vm2359_vm4, %v3679_v47  ;;  %v3026_v40 = vpop.f32.mrf.mxu0 }
 0x43c   : >> { %4214 = vmatpush1.bf16.msra.mxu1 %v3767_v13  ;;  %v3027_v12 = vadd.f32 %v3026_v40, %v7508_v39  ;;  %v3520_v34 = vmax.f32 %v3025_v25, 0.0 }
 0x43d   : >> { %v3075_v58 = vpop.f32.mrf.mxu1  ;;  %4215 = vmatprep.subr.bf16.mxu1 %v3639_v31  ;;  %v3028_v22 = vpop.f32.mrf.mxu0  ;;  %4175 = vmatpush1.bf16.msra.mxu0 %v3636_v42 }
 0x43e   : >> { %v3029_v29 = vadd.f32 %v3028_v22, %v7506_v30  ;;  %v3521_v56 = vmax.f32 %v3027_v12, 0.0  ;;  %v3076_v23 = vadd.f32 %v3075_v58, %v7508_v39 }
 0x43f   : >> { %v3077_v41 = vpop.f32.mrf.mxu1  ;;  %v3030_v59 = vpop.f32.mrf.mxu0 }
 0x440   : >> { %4216 = vmatpush1.bf16.msra.mxu1 %v3638_v14  ;;  %5679 = vmatmul.mubr.msk.bf16.vlgmr.msra.gmra.mxu0 %vm2352_vm5, %v8125_v0  ;;  %v3031_v11 = vadd.f32 %v3030_v59, %v7506_v30  ;;  %v3078_v24 = vadd.f32 %v3077_v41, %v7508_v39  ;;  %v3560_v63 = vmax.f32 %v3029_v29, 0.0  ;;  %v3522_v14 = vmax.f32 %v3076_v23, 0.0 }
 0x441   : >> { %v3079_v37 = vpop.f32.mrf.mxu1  ;;  %v3034_v48 = vpop.f32.mrf.mxu0  ;;  %4274 = vmatprep.mubr.bf16.mxu0 %v8073_v36 }
 0x442   : >> { %v3035_v62 = vadd.f32 %v3034_v48, %v7504_v55  ;;  %v3561_v32 = vmax.f32 %v3031_v11, 0.0  ;;  %v3080_v60 = vadd.f32 %v3079_v37, %v7506_v30  ;;  %v3523_v1 = vmax.f32 %v3078_v24, 0.0 }
 0x443   : >> { %v3081_v2 = vpop.f32.mrf.mxu1  ;;  %5681 = vmatmul.mubr.msk.bf16.vlgmr.msra.gmra.mxu1 %vm2352_vm5, %v8125_v0  ;;  %v3036_v19 = vpop.f32.mrf.mxu0  ;;  %v3640_v42 = vpack.c.bf16 %v3560_v63, %v3520_v34 }
 0x444   : >> { %v3037_v9 = vadd.f32 %v3036_v19, %v7504_v55  ;;  %4315 = vmatprep.mubr.bf16.mxu1 %v8073_v36  ;;  %v3600_v28 = vmax.f32 %v3035_v62, 0.0  ;;  %v3082_v45 = vadd.f32 %v3081_v2, %v7506_v30  ;;  %v3641_v51 = vpack.c.bf16 %v3561_v32, %v3521_v56 }
 0x445   : >> { %v3085_v7 = vpop.f32.mrf.mxu1  ;;  %v3038_v15 = vpop.f32.mrf.mxu0  ;;  %v3562_v31 = vmax.f32 %v3080_v60, 0.0 }
 0x446   : >> { %v3086_v50 = vadd.f32 %v3085_v7, %v7504_v55  ;;  %v3601_v27 = vmax.f32 %v3037_v9, 0.0  ;;  %v3680_v18 = vpack.c.bf16 %v3600_v28, %v3600_v28  ;;  %v3563_v21 = vmax.f32 %v3082_v45, 0.0 }
 0x447   : >> { %v3087_v46 = vpop.f32.mrf.mxu1  ;;  %v3039_v16 = vpop.f32.mrf.mxu0  ;;  %v3642_v59 = vpack.c.bf16 %v3562_v31, %v3522_v14 }
 0x448   : >> { %v3602_v17 = vmax.f32 %v3086_v50, 0.0  ;;  %v3681_v53 = vpack.c.bf16 %v3601_v27, %v3601_v27  ;;  %v3088_v4 = vadd.f32 %v3087_v46, %v7504_v55  ;;  %v3773_v3 = vsel %vm2359_vm4, %v3680_v18, 0 }
 0x449   : >> { %v3089_v10 = vpop.f32.mrf.mxu1  ;;  %v3643_v13 = vpack.c.bf16 %v3563_v21, %v3523_v1 }
 0x44a   : >> { %v3682_v43 = vpack.c.bf16 %v3602_v17, %v3602_v17  ;;  %v3603_v38 = vmax.f32 %v3088_v4, 0.0  ;;  %5682 = vmatprep.subr.msk.bf16.mxu0 %vm2359_vm4, %v3681_v53 }
 0x44b   : >> { %v3090_v49 = vpop.f32.mrf.mxu1  ;;  %v3126_v47 = vpop.f32.mrf.mxu0  ;;  %4255 = vmatpush1.bf16.msra.mxu0 %v3773_v3 }
 0x44c   : >> { %v3683_v33 = vpack.c.bf16 %v3603_v38, %v3603_v38  ;;  %4256 = vmatprep.subr.bf16.mxu0 %v3641_v51  ;;  %v3779_v22 = vsel %vm2359_vm4, %v3682_v43, 0  ;;  %v3127_v46 = vadd.f32 %v3126_v47, %v7508_v39 }
 0x44d   : >> { %v3128_v40 = vpop.f32.mrf.mxu0 }
 0x44e   : >> { %v3177_v54 = vpop.f32.mrf.mxu1  ;;  %5684 = vmatprep.subr.msk.bf16.mxu1 %vm2359_vm4, %v3683_v33  ;;  %v3129_v9 = vadd.f32 %v3128_v40, %v7508_v39  ;;  %v3524_v47 = vmax.f32 %v3127_v46, 0.0 }
 0x44f   : >> { %4296 = vmatpush1.bf16.msra.mxu1 %v3779_v22  ;;  %v3130_v41 = vpop.f32.mrf.mxu0  ;;  %4257 = vmatpush1.bf16.msra.mxu0 %v3640_v42  ;;  %v3178_v3 = vadd.f32 %v3177_v54, %v7508_v39 }
 0x450   : >> { %v3179_v58 = vpop.f32.mrf.mxu1  ;;  %4297 = vmatprep.subr.bf16.mxu1 %v3643_v13  ;;  %v3131_v7 = vadd.f32 %v3130_v41, %v7506_v30  ;;  %v3525_v4 = vmax.f32 %v3129_v9, 0.0 }
 0x451   : >> { %v3132_v37 = vpop.f32.mrf.mxu0  ;;  %v3180_v16 = vadd.f32 %v3179_v58, %v7508_v39  ;;  %v3526_v14 = vmax.f32 %v3178_v3, 0.0 }
 0x452   : >> { %v3181_v11 = vpop.f32.mrf.mxu1  ;;  %5683 = vmatmul.mubr.msk.bf16.vlgmr.msra.gmra.mxu0 %vm2352_vm5, %v8125_v0  ;;  %v3133_v12 = vadd.f32 %v3132_v37, %v7506_v30  ;;  %v3564_v10 = vmax.f32 %v3131_v7, 0.0 }
 0x453   : >> { %4298 = vmatpush1.bf16.msra.mxu1 %v3642_v59  ;;  %v3136_v48 = vpop.f32.mrf.mxu0  ;;  %4356 = vmatprep.mubr.bf16.mxu0 %v8073_v36  ;;  %v3182_v63 = vadd.f32 %v3181_v11, %v7506_v30  ;;  %v3527_v1 = vmax.f32 %v3180_v16, 0.0 }
 0x454   : >> { %v3183_v2 = vpop.f32.mrf.mxu1  ;;  %v3137_v62 = vadd.f32 %v3136_v48, %v7504_v55  ;;  %v3565_v27 = vmax.f32 %v3133_v12, 0.0  ;;  %v3644_v40 = vpack.c.bf16 %v3564_v10, %v3524_v47 }
 0x455   : >> { %v3138_v19 = vpop.f32.mrf.mxu0  ;;  %v3184_v15 = vadd.f32 %v3183_v2, %v7506_v30  ;;  %v3566_v31 = vmax.f32 %v3182_v63, 0.0 }
 0x456   : >> { %v3604_v29 = vmax.f32 %v3137_v62, 0.0  ;;  %v3187_v32 = vpop.f32.mrf.mxu1  ;;  %5685 = vmatmul.mubr.msk.bf16.vlgmr.msra.gmra.mxu1 %vm2352_vm5, %v8125_v0  ;;  %v3139_v28 = vadd.f32 %v3138_v19, %v7504_v55  ;;  %v3645_v34 = vpack.c.bf16 %v3565_v27, %v3525_v4 }
 0x457   : >> { %v3188_v45 = vadd.f32 %v3187_v32, %v7504_v55  ;;  %v3140_v50 = vpop.f32.mrf.mxu0  ;;  %4397 = vmatprep.mubr.bf16.mxu1 %v8073_v36  ;;  %v3567_v21 = vmax.f32 %v3184_v15, 0.0  ;;  %v3646_v59 = vpack.c.bf16 %v3566_v31, %v3526_v14 }
 0x458   : >> { %v3684_v25 = vpack.c.bf16 %v3604_v29, %v3604_v29  ;;  %v3605_v56 = vmax.f32 %v3139_v28, 0.0  ;;  %v3189_v18 = vpop.f32.mrf.mxu1 }
 0x459   : >> { %v3606_v24 = vmax.f32 %v3188_v45, 0.0  ;;  %v3190_v17 = vadd.f32 %v3189_v18, %v7504_v55  ;;  %v3141_v53 = vpop.f32.mrf.mxu0  ;;  %v3647_v13 = vpack.c.bf16 %v3567_v21, %v3527_v1 }
 0x45a   : >> { %v3685_v60 = vpack.c.bf16 %v3605_v56, %v3605_v56  ;;  %v3191_v51 = vpop.f32.mrf.mxu1  ;;  %v3785_v49 = vsel %vm2359_vm4, %v3684_v25, 0 }
 0x45b   : >> { %v3686_v43 = vpack.c.bf16 %v3606_v24, %v3606_v24  ;;  %v3607_v38 = vmax.f32 %v3190_v17, 0.0 }
 0x45c   : >> { %v3192_v23 = vpop.f32.mrf.mxu1  ;;  %5686 = vmatprep.subr.msk.bf16.mxu0 %vm2359_vm4, %v3685_v60 }
 0x45d   : >> { %v3687_v33 = vpack.c.bf16 %v3607_v38, %v3607_v38  ;;  %v3228_v42 = vpop.f32.mrf.mxu0  ;;  %4337 = vmatpush1.bf16.msra.mxu0 %v3785_v49  ;;  %v3791_v54 = vsel %vm2359_vm4, %v3686_v43, 0 }
 0x45e   : >> { %4338 = vmatprep.subr.bf16.mxu0 %v3645_v34  ;;  %v3229_v18 = vadd.f32 %v3228_v42, %v7508_v39 }
 0x45f   : >> { %5688 = vmatprep.subr.msk.bf16.mxu1 %vm2359_vm4, %v3687_v33  ;;  %v3230_v22 = vpop.f32.mrf.mxu0 }
 0x460   : >> { %4378 = vmatpush1.bf16.msra.mxu1 %v3791_v54  ;;  %v3231_v62 = vadd.f32 %v3230_v22, %v7508_v39  ;;  %v3528_v49 = vmax.f32 %v3229_v18, 0.0 }
 0x461   : >> { %v3279_v41 = vpop.f32.mrf.mxu1  ;;  %4379 = vmatprep.subr.bf16.mxu1 %v3647_v13  ;;  %v3232_v58 = vpop.f32.mrf.mxu0  ;;  %4339 = vmatpush1.bf16.msra.mxu0 %v3644_v40 }
 0x462   : >> { %v3233_v28 = vadd.f32 %v3232_v58, %v7506_v30  ;;  %v3529_v46 = vmax.f32 %v3231_v62, 0.0  ;;  %v3280_v47 = vadd.f32 %v3279_v41, %v7508_v39 }
 0x463   : >> { %v3281_v37 = vpop.f32.mrf.mxu1  ;;  %v3234_v11 = vpop.f32.mrf.mxu0 }
 0x464   : >> { %4380 = vmatpush1.bf16.msra.mxu1 %v3646_v59  ;;  %5687 = vmatmul.mubr.msk.bf16.vlgmr.msra.gmra.mxu0 %vm2352_vm5, %v8125_v0  ;;  %v3235_v12 = vadd.f32 %v3234_v11, %v7506_v30  ;;  %v3282_v53 = vadd.f32 %v3281_v37, %v7508_v39  ;;  %v3568_v51 = vmax.f32 %v3233_v28, 0.0  ;;  %v3530_v14 = vmax.f32 %v3280_v47, 0.0 }
 0x465   : >> { %v3283_v48 = vpop.f32.mrf.mxu1  ;;  %v3238_v2 = vpop.f32.mrf.mxu0  ;;  %4438 = vmatprep.mubr.bf16.mxu0 %v8073_v36 }
 0x466   : >> { %v3239_v9 = vadd.f32 %v3238_v2, %v7504_v55  ;;  %v3569_v7 = vmax.f32 %v3235_v12, 0.0  ;;  %v3284_v10 = vadd.f32 %v3283_v48, %v7506_v30  ;;  %v3531_v33 = vmax.f32 %v3282_v53, 0.0 }
 0x467   : >> { %v3285_v19 = vpop.f32.mrf.mxu1  ;;  %5689 = vmatmul.mubr.msk.bf16.vlgmr.msra.gmra.mxu1 %vm2352_vm5, %v8125_v0  ;;  %v3240_v29 = vpop.f32.mrf.mxu0  ;;  %v3648_v31 = vpack.c.bf16 %v3568_v51, %v3528_v49 }
 0x468   : >> { %v3241_v32 = vadd.f32 %v3240_v29, %v7504_v55  ;;  %4479 = vmatprep.mubr.bf16.mxu1 %v8073_v36  ;;  %v3608_v15 = vmax.f32 %v3239_v9, 0.0  ;;  %v3286_v27 = vadd.f32 %v3285_v19, %v7506_v30  ;;  %v3649_v21 = vpack.c.bf16 %v3569_v7, %v3529_v46 }
 0x469   : >> { %v3289_v45 = vpop.f32.mrf.mxu1  ;;  %v3242_v50 = vpop.f32.mrf.mxu0  ;;  %v3570_v40 = vmax.f32 %v3284_v10, 0.0 }
 0x46a   : >> { %v3290_v25 = vadd.f32 %v3289_v45, %v7504_v55  ;;  %v3609_v56 = vmax.f32 %v3241_v32, 0.0  ;;  %v3688_v16 = vpack.c.bf16 %v3608_v15, %v3608_v15  ;;  %v3571_v38 = vmax.f32 %v3286_v27, 0.0 }
 0x46b   : >> { %v3291_v24 = vpop.f32.mrf.mxu1  ;;  %v3243_v17 = vpop.f32.mrf.mxu0  ;;  %v3650_v59 = vpack.c.bf16 %v3570_v40, %v3530_v14 }
 0x46c   : >> { %v3610_v4 = vmax.f32 %v3290_v25, 0.0  ;;  %v3689_v63 = vpack.c.bf16 %v3609_v56, %v3609_v56  ;;  %v3292_v60 = vadd.f32 %v3291_v24, %v7504_v55  ;;  %v3797_v23 = vsel %vm2359_vm4, %v3688_v16, 0 }
 0x46d   : >> { %v3293_v43 = vpop.f32.mrf.mxu1  ;;  %v3651_v13 = vpack.c.bf16 %v3571_v38, %v3531_v33 }
 0x46e   : >> { %v3690_v3 = vpack.c.bf16 %v3610_v4, %v3610_v4  ;;  %v3611_v34 = vmax.f32 %v3292_v60, 0.0  ;;  %5690 = vmatprep.subr.msk.bf16.mxu0 %vm2359_vm4, %v3689_v63 }
 0x46f   : >> { %v3294_v1 = vpop.f32.mrf.mxu1  ;;  %4419 = vmatpush1.bf16.msra.mxu0 %v3797_v23 }
 0x470   : >> { %v3691_v42 = vpack.c.bf16 %v3611_v34, %v3611_v34  ;;  %4420 = vmatprep.subr.bf16.mxu0 %v3649_v21  ;;  %v3803_v54 = vsel %vm2359_vm4, %v3690_v3, 0 }
 0x472   : >> { %v3330_v22 = vpop.f32.mrf.mxu0  ;;  %5692 = vmatprep.subr.msk.bf16.mxu1 %vm2359_vm4, %v3691_v42 }
 0x473   : >> { %4460 = vmatpush1.bf16.msra.mxu1 %v3803_v54  ;;  %4421 = vmatpush1.bf16.msra.mxu0 %v3648_v31  ;;  %v3331_v51 = vadd.f32 %v3330_v22, %v7508_v39 }
 0x474   : >> { %v3332_v58 = vpop.f32.mrf.mxu0  ;;  %4461 = vmatprep.subr.bf16.mxu1 %v3651_v13 }
 0x475   : >> { %v3381_v41 = vpop.f32.mrf.mxu1  ;;  %v3333_v45 = vadd.f32 %v3332_v58, %v7508_v39  ;;  %v3532_v40 = vmax.f32 %v3331_v51, 0.0 }
 0x476   : >> { %v3334_v37 = vpop.f32.mrf.mxu0  ;;  %5691 = vmatmul.mubr.msk.bf16.vlgmr.msra.gmra.mxu0 %vm2352_vm5, %v8125_v0  ;;  %v3382_v38 = vadd.f32 %v3381_v41, %v7508_v39 }
 0x477   : >> { %v3383_v11 = vpop.f32.mrf.mxu1  ;;  %4462 = vmatpush1.bf16.msra.mxu1 %v3650_v59  ;;  %4520 = vmatprep.mubr.bf16.mxu0 %v8073_v36  ;;  %v3335_v18 = vadd.f32 %v3334_v37, %v7506_v30  ;;  %v3533_v3 = vmax.f32 %v3333_v45, 0.0 }
 0x478   : >> { %v3336_v48 = vpop.f32.mrf.mxu0  ;;  %v3384_v56 = vadd.f32 %v3383_v11, %v7508_v39  ;;  %v3534_v14 = vmax.f32 %v3382_v38, 0.0 }
 0x479   : >> { %v3385_v12 = vpop.f32.mrf.mxu1  ;;  %v3337_v9 = vadd.f32 %v3336_v48, %v7506_v30  ;;  %v3572_v47 = vmax.f32 %v3335_v18, 0.0 }
 0x47a   : >> { %5693 = vmatmul.mubr.msk.bf16.vlgmr.msra.gmra.mxu1 %vm2352_vm5, %v8125_v0  ;;  %v3386_v24 = vadd.f32 %v3385_v12, %v7506_v30  ;;  %v3535_v49 = vmax.f32 %v3384_v56, 0.0 }
 0x47b   : >> { %v3387_v2 = vpop.f32.mrf.mxu1  ;;  %v3340_v62 = vpop.f32.mrf.mxu0  ;;  %4561 = vmatprep.mubr.bf16.mxu1 %v8073_v36  ;;  %v3573_v17 = vmax.f32 %v3337_v9, 0.0  ;;  %v3652_v58 = vpack.c.bf16 %v3572_v47, %v3532_v40 }
 0x47c   : >> { %v3341_v19 = vadd.f32 %v3340_v62, %v7504_v55  ;;  %v3388_v28 = vadd.f32 %v3387_v2, %v7506_v30  ;;  %v3574_v33 = vmax.f32 %v3386_v24, 0.0 }
 0x47d   : >> { %v3391_v29 = vpop.f32.mrf.mxu1  ;;  %v3342_v32 = vpop.f32.mrf.mxu0  ;;  %v3653_v42 = vpack.c.bf16 %v3573_v17, %v3533_v3 }
 0x47e   : >> { %v3612_v7 = vmax.f32 %v3341_v19, 0.0  ;;  %v3392_v15 = vadd.f32 %v3391_v29, %v7504_v55  ;;  %v3343_v50 = vadd.f32 %v3342_v32, %v7504_v55  ;;  %v3575_v10 = vmax.f32 %v3388_v28, 0.0 }
 0x47f   : >> { %v3393_v27 = vpop.f32.mrf.mxu1  ;;  %v3344_v25 = vpop.f32.mrf.mxu0  ;;  %v3654_v41 = vpack.c.bf16 %v3574_v33, %v3534_v14 }
 0x480   : >> { %v3614_v46 = vmax.f32 %v3392_v15, 0.0  ;;  %v3394_v16 = vadd.f32 %v3393_v27, %v7504_v55  ;;  %v3692_v53 = vpack.c.bf16 %v3612_v7, %v3612_v7  ;;  %v3613_v4 = vmax.f32 %v3343_v50, 0.0 }
 0x481   : >> { %v3395_v63 = vpop.f32.mrf.mxu1  ;;  %v3345_v60 = vpop.f32.mrf.mxu0  ;;  %v3655_v13 = vpack.c.bf16 %v3575_v10, %v3535_v49 }
 0x482   : >> { %v3694_v21 = vpack.c.bf16 %v3614_v46, %v3614_v46  ;;  %v3615_v43 = vmax.f32 %v3394_v16, 0.0  ;;  %v3693_v34 = vpack.c.bf16 %v3613_v4, %v3613_v4  ;;  %v3809_v31 = vsel %vm2359_vm4, %v3692_v53, 0 }
 0x483   : >> { %v3396_v23 = vpop.f32.mrf.mxu1 }
 0x484   : >> { %v3695_v1 = vpack.c.bf16 %v3615_v43, %v3615_v43  ;;  %5694 = vmatprep.subr.msk.bf16.mxu0 %vm2359_vm4, %v3693_v34  ;;  %v3815_v54 = vsel %vm2359_vm4, %v3694_v21, 0 }
 0x485   : >> { %4501 = vmatpush1.bf16.msra.mxu0 %v3809_v31 }
 0x486   : >> { %v3432_v22 = vpop.f32.mrf.mxu0  ;;  %5696 = vmatprep.subr.msk.bf16.mxu1 %vm2359_vm4, %v3695_v1  ;;  %4502 = vmatprep.subr.bf16.mxu0 %v3653_v42 }
 0x487   : >> { %4542 = vmatpush1.bf16.msra.mxu1 %v3815_v54 }
 0x488   : >> { %v3434_v59 = vpop.f32.mrf.mxu0  ;;  %4543 = vmatprep.subr.bf16.mxu1 %v3655_v13 }
 0x489   : >> { %v3483_v37 = vpop.f32.mrf.mxu1  ;;  %4503 = vmatpush1.bf16.msra.mxu0 %v3652_v58  ;;  %v3435_v28 = vadd.f32 %v3434_v59, %v7508_v39 }
 0x48a   : >> { %v3436_v11 = vpop.f32.mrf.mxu0  ;;  %v3484_v23 = vadd.f32 %v3483_v37, %v7508_v39  ;;  %v1187_v37 = vld [vmem:[%s7732_s0] ss:$8 sm:$0xf0] }
 0x48b   : >> { %v3485_v48 = vpop.f32.mrf.mxu1  ;;  %4544 = vmatpush1.bf16.msra.mxu1 %v3654_v41  ;;  %v3437_v50 = vadd.f32 %v3436_v11, %v7506_v30  ;;  %v3537_v60 = vmax.f32 %v3435_v28, 0.0  ;;  %v1186_v41 = vld [vmem:[%s7732_s0] ss:$8 sm:$0xf] }
 0x48c   : >> { %v3438_v12 = vpop.f32.mrf.mxu0  ;;  %5695 = vmatmul.mubr.msk.bf16.vlgmr.msra.gmra.mxu0 %vm2352_vm5, %v8125_v0  ;;  %v3486_v17 = vadd.f32 %v3485_v48, %v7508_v39 }
 0x48d   : >> { %v3487_v2 = vpop.f32.mrf.mxu1  ;;  %4602 = vmatprep.mubr.bf16.mxu0 %v8073_v36  ;;  %v3439_v19 = vadd.f32 %v3438_v12, %v7506_v30  ;;  %v3576_v43 = vmax.f32 %v3437_v50, 0.0  ;;  %v3703_v12 = vpop.permute.xlu0 %3702 }
 0x48e   : >> { %v3442_v62 = vpop.f32.mrf.mxu0  ;;  %5697 = vmatmul.mubr.msk.bf16.vlgmr.msra.gmra.mxu1 %vm2352_vm5, %v8125_v0  ;;  %v3488_v51 = vadd.f32 %v3487_v2, %v7506_v30 }
 0x48f   : >> { %v3489_v9 = vpop.f32.mrf.mxu1  ;;  %v3443_v29 = vadd.f32 %v3442_v62, %v7504_v55  ;;  %4643 = vmatprep.mubr.bf16.mxu1 %v8073_v36  ;;  %v3577_v18 = vmax.f32 %v3439_v19, 0.0  ;;  %v3433_v36 = vadd.f32 %v3432_v22, %v7508_v39  ;;  %v3538_v39 = vmax.f32 %v3484_v23, 0.0 }
 0x490   : >> { %v3444_v32 = vpop.f32.mrf.mxu0  ;;  %v3490_v27 = vadd.f32 %v3489_v9, %v7506_v30  ;;  %v3578_v31 = vmax.f32 %v3488_v51, 0.0  ;;  %v1188_v19 = vor.u32 %v1187_v37, %v1186_v41  ;;  %v7737_v9 = vrot.slane %v3703_v12, %v8119_v57 }
 0x491   : >> { %v3616_v7 = vmax.f32 %v3443_v29, 0.0  ;;  %v3493_v15 = vpop.f32.mrf.mxu1  ;;  %v3445_v45 = vadd.f32 %v3444_v32, %v7504_v55  ;;  %v3657_v49 = vpack.c.bf16 %v3577_v18, %v3537_v60  ;;  %v3536_v33 = vmax.f32 %v3433_v36, 0.0 }
 0x492   : >> { %v3494_v25 = vadd.f32 %v3493_v15, %v7504_v55  ;;  %v3446_v56 = vpop.f32.mrf.mxu0  ;;  %v3579_v38 = vmax.f32 %v3490_v27, 0.0  ;;  %v3658_v22 = vpack.c.bf16 %v3578_v31, %v3538_v39  ;;  %v5802_v29 = vmov 1966171168  }
 0x493   : >> { %v3696_v46 = vpack.c.bf16 %v3616_v7, %v3616_v7  ;;  %v3617_v16 = vmax.f32 %v3445_v45, 0.0  ;;  %v3495_v24 = vpop.f32.mrf.mxu1  ;;  %v3656_v30 = vpack.c.bf16 %v3576_v43, %v3536_v33  ;;  %v4943_v32 = vunpack.c.l.s4 %v5802_v29 }
 0x494   : >> { %v3618_v53 = vmax.f32 %v3494_v25, 0.0  ;;  %v3496_v4 = vadd.f32 %v3495_v24, %v7504_v55  ;;  %v3447_v63 = vpop.f32.mrf.mxu0  ;;  %v3539_v55 = vmax.f32 %v3486_v17, 0.0  ;;  %v4664_v7 = vrot.slane %v1188_v19, %v8117_v44  ;;  %v8126_v17 = vld [vmem:[#allocation3_spill] sm:$0xff] }
 0x495   : >> { %v3697_v10 = vpack.c.bf16 %v3617_v16, %v3617_v16  ;;  %v3497_v21 = vpop.f32.mrf.mxu1  ;;  %v3821_v1 = vsel %vm2359_vm4, %v3696_v46, 0  ;;  %v4672_v45 = vrot.slane %v1188_v19, %v8118_v20  ;;  %v4660_v50 = vrot.slane %v1188_v19, %v8119_v57 }
 0x496   : >> { %v3698_v3 = vpack.c.bf16 %v3618_v53, %v3618_v53  ;;  %v3619_v34 = vmax.f32 %v3496_v4, 0.0  ;;  %v3659_v40 = vpack.c.bf16 %v3579_v38, %v3539_v55  ;;  %v4668_v56 = vrot.slane %v1188_v19, %v8120_v8 }
 0x497   : >> { %v3498_v47 = vpop.f32.mrf.mxu1  ;;  %5698 = vmatprep.subr.msk.bf16.mxu0 %vm2359_vm4, %v3697_v10  ;;  %v4944_v18 = vunpack.c.0.s8 %v4943_v32  ;;  %v4676_v60 = vrot.slane %v1188_v19, %v8123_v5  ;;  %v4684_v10 = vrot.slane %v1188_v19, %v8124_v61  ;;  %v4680_v21 = vrot.slane %v1188_v19, %v8121_v6 }
 0x498   : >> { %v3699_v42 = vpack.c.bf16 %v3619_v34, %v3619_v34  ;;  %4583 = vmatpush1.bf16.msra.mxu0 %v3821_v1  ;;  %v3827_v13 = vsel %vm2359_vm4, %v3698_v3, 0  ;;  %v4688_v23 = vrot.slane %v1188_v19, %v8122_v35 }
 0x499   : >> { %4584 = vmatprep.subr.bf16.mxu0 %v3657_v49  ;;  %v7748_v53 = vsub.s32 %v4944_v18, %v8126_v17 }
 0x49a   : >> { %5700 = vmatprep.subr.msk.bf16.mxu1 %vm2359_vm4, %v3699_v42 }
 0x49b   : >> { %4624 = vmatpush1.bf16.msra.mxu1 %v3827_v13 }
 0x49c   : >> { %4625 = vmatprep.subr.bf16.mxu1 %v3659_v40  ;;  %4585 = vmatpush1.bf16.msra.mxu0 %v3656_v30 }
 0x49f   : >> { %4626 = vmatpush1.bf16.msra.mxu1 %v3658_v22  ;;  %5699 = vmatmul.mubr.msk.bf16.vlgmr.msra.gmra.mxu0 %vm2352_vm5, %v8125_v0 }
 0x4a2   : >> { %5701 = vmatmul.mubr.msk.bf16.vlgmr.msra.gmra.mxu1 %vm2352_vm5, %v8125_v0 }
 0x4be   : >> { %v3866_v54 = vpop.f32.mrf.mxu0  ;;  %v3907_v14 = vpop.f32.mrf.mxu1 }
 0x4bf   : >> { %v3867_v27 = vadd.f32 %v3866_v54, %v7737_v9  ;;  %v3908_v25 = vadd.f32 %v3907_v14, %v7737_v9 }
 0x4c0   : >> { %v3868_v58 = vpop.f32.mrf.mxu0  ;;  %v3909_v59 = vpop.f32.mrf.mxu1 }
 0x4c1   : >> { %v3869_v28 = vadd.f32 %v3868_v58, %v7737_v9  ;;  %v3910_v15 = vadd.f32 %v3909_v59, %v7737_v9  ;;  %v4857_v24 = vmul.f32 %v4660_v50, %v3867_v27  ;;  %v4859_v36 = vmul.f32 %v4668_v56, %v3908_v25  ;;  %v5592_v50 = vld [vmem:[%s7732_s0 + $0x40] ss:$8 sm:$0xf0] }
 0x4c2   : >> { %v3870_v11 = vpop.f32.mrf.mxu0  ;;  %v3911_v48 = vpop.f32.mrf.mxu1 }
 0x4c3   : >> { %v4858_v46 = vmul.f32 %v4664_v7, %v3869_v28  ;;  %v4860_v16 = vmul.f32 %v4672_v45, %v3910_v15  ;;  %v5591_v45 = vld [vmem:[%s7732_s0 + $0x40] ss:$8 sm:$0xf] }
 0x4c4   : >> { %v3871_v2 = vpop.f32.mrf.mxu0  ;;  %v3912_v62 = vpop.f32.mrf.mxu1  ;;  %v1192_v25 = vor.u32 %v5592_v50, %v5591_v45 }
 0x4c5   : >> { %v4938_v43 = vcombine.low %v4857_v24, %v4858_v46  ;;  %v4939_v38 = vcombine.low %v4859_v36, %v4860_v16 }
 0x4c6   : >> { %v4696_v18 = vrot.slane %v1192_v25, %v8117_v44  ;;  %v4704_v16 = vrot.slane %v1192_v25, %v8118_v20  ;;  %v4692_v36 = vrot.slane %v1192_v25, %v8119_v57 }
 0x4c7   : >> { %v4948_v30 = vrot.slane %v4938_v43, %v7748_v53  ;;  %v4955_v40 = vrot.slane %v4939_v38, %v7748_v53  ;;  %v4712_v43 = vrot.slane %v1192_v25, %v8121_v6 }
 0x4c9   : >> { %v4970_v41 = vcombine.low %v4948_v30, %v4955_v40 }
 0x4cb   : >> { %v4978_v48 = vrot.slane %v4970_v41, %v7748_v53 }
 0x4ce   : >> { %v3948_v4 = vpop.f32.mrf.mxu0 }
 0x4cf   : >> { %v3949_v63 = vadd.f32 %v3948_v4, %v7737_v9  ;;  %v3989_v51 = vpop.f32.mrf.mxu1  ;;  %v4700_v4 = vrot.slane %v1192_v25, %v8120_v8 }
 0x4d0   : >> { %v3990_v3 = vadd.f32 %v3989_v51, %v7737_v9  ;;  %v3950_v34 = vpop.f32.mrf.mxu0 }
 0x4d1   : >> { %v3951_v49 = vadd.f32 %v3950_v34, %v7737_v9  ;;  %v3991_v47 = vpop.f32.mrf.mxu1  ;;  %v4861_v55 = vmul.f32 %v4676_v60, %v3949_v63 }
 0x4d2   : >> { %v3992_v1 = vadd.f32 %v3991_v47, %v7737_v9  ;;  %v3952_v33 = vpop.f32.mrf.mxu0  ;;  %v4863_v13 = vmul.f32 %v4684_v10, %v3990_v3 }
 0x4d3   : >> { %v4862_v42 = vmul.f32 %v4680_v21, %v3951_v49  ;;  %v3993_v31 = vpop.f32.mrf.mxu1  ;;  %v4708_v21 = vrot.slane %v1192_v25, %v8123_v5  ;;  %v4720_v33 = vrot.slane %v1192_v25, %v8122_v35 }
 0x4d4   : >> { %v4864_v39 = vmul.f32 %v4688_v23, %v3992_v1  ;;  %v3953_v22 = vpop.f32.mrf.mxu0  ;;  %v4716_v1 = vrot.slane %v1192_v25, %v8124_v61 }
 0x4d5   : >> { %v4940_v54 = vcombine.low %v4861_v55, %v4862_v42  ;;  %v3994_v14 = vpop.f32.mrf.mxu1 }
 0x4d6   : >> { %v4941_v58 = vcombine.low %v4863_v13, %v4864_v39 }
 0x4d7   : >> { %v4962_v59 = vrot.slane %v4940_v54, %v7748_v53 }
 0x4d8   : >> { %v4969_v37 = vrot.slane %v4941_v58, %v7748_v53 }
 0x4da   : >> { %v4971_v11 = vcombine.low %v4962_v59, %v4969_v37 }
 0x4dc   : >> { %v4985_v12 = vrot.slane %v4971_v11, %v7748_v53 }
 0x4de   : >> { %v4986_v2 = vcombine.low %v4978_v48, %v4985_v12  ;;  %v4030_v62 = vpop.f32.mrf.mxu0 }
 0x4df   : >> { %v4071_v19 = vpop.f32.mrf.mxu1  ;;  %v4031_v24 = vadd.f32 %v4030_v62, %v7737_v9 }
 0x4e0   : >> { %5189 = vst [vmem:[%s7765_s2] sm:$0xff] %v4986_v2  ;;  %v4032_v29 = vpop.f32.mrf.mxu0  ;;  %v4072_v17 = vadd.f32 %v4071_v19, %v7737_v9 }
 0x4e1   : >> { %v4073_v32 = vpop.f32.mrf.mxu1  ;;  %v4033_v56 = vadd.f32 %v4032_v29, %v7737_v9  ;;  %v4865_v38 = vmul.f32 %v4692_v36, %v4031_v24 }
 0x4e2   : >> { %v4034_v28 = vpop.f32.mrf.mxu0  ;;  %v4074_v46 = vadd.f32 %v4073_v32, %v7737_v9  ;;  %v4867_v34 = vmul.f32 %v4700_v4, %v4072_v17 }
 0x4e3   : >> { %v4075_v7 = vpop.f32.mrf.mxu1  ;;  %v4866_v63 = vmul.f32 %v4696_v18, %v4033_v56  ;;  %v5594_v18 = vld [vmem:[%s7732_s0 + $0x80] ss:$8 sm:$0xf] }
 0x4e4   : >> { %v4035_v15 = vpop.f32.mrf.mxu0  ;;  %v4868_v51 = vmul.f32 %v4704_v16, %v4074_v46  ;;  %v5595_v46 = vld [vmem:[%s7732_s0 + $0x80] ss:$8 sm:$0xf0] }
 0x4e5   : >> { %v4076_v27 = vpop.f32.mrf.mxu1  ;;  %v4987_v49 = vcombine.low %v4865_v38, %v4866_v63  ;;  %v1196_v24 = vor.u32 %v5595_v46, %v5594_v18 }
 0x4e6   : >> { %v4988_v42 = vcombine.low %v4867_v34, %v4868_v51 }
 0x4e7   : >> { %v4997_v58 = vrot.slane %v4987_v49, %v7748_v53  ;;  %v4728_v17 = vrot.slane %v1196_v24, %v8117_v44  ;;  %v4736_v63 = vrot.slane %v1196_v24, %v8118_v20  ;;  %v4724_v51 = vrot.slane %v1196_v24, %v8119_v57 }
 0x4e8   : >> { %v5004_v59 = vrot.slane %v4988_v42, %v7748_v53  ;;  %v4744_v49 = vrot.slane %v1196_v24, %v8121_v6 }
 0x4ea   : >> { %v5019_v2 = vcombine.low %v4997_v58, %v5004_v59 }
 0x4ec   : >> { %v5027_v29 = vrot.slane %v5019_v2, %v7748_v53 }
 0x4ee   : >> { %v4112_v60 = vpop.f32.mrf.mxu0 }
 0x4ef   : >> { %v4113_v10 = vadd.f32 %v4112_v60, %v7737_v9 }
 0x4f0   : >> { %v4114_v3 = vpop.f32.mrf.mxu0 }
 0x4f1   : >> { %v4115_v23 = vadd.f32 %v4114_v3, %v7737_v9  ;;  %v4869_v31 = vmul.f32 %v4708_v21, %v4113_v10  ;;  %v4732_v21 = vrot.slane %v1196_v24, %v8120_v8 }
 0x4f2   : >> { %v4153_v47 = vpop.f32.mrf.mxu1  ;;  %v4116_v55 = vpop.f32.mrf.mxu0 }
 0x4f3   : >> { %v4154_v30 = vadd.f32 %v4153_v47, %v7737_v9  ;;  %v4870_v40 = vmul.f32 %v4712_v43, %v4115_v23  ;;  %v4740_v23 = vrot.slane %v1196_v24, %v8123_v5 }
 0x4f4   : >> { %v4155_v13 = vpop.f32.mrf.mxu1  ;;  %v4117_v39 = vpop.f32.mrf.mxu0 }
 0x4f5   : >> { %v4989_v22 = vcombine.low %v4869_v31, %v4870_v40  ;;  %v4156_v54 = vadd.f32 %v4155_v13, %v7737_v9  ;;  %v4871_v41 = vmul.f32 %v4716_v1, %v4154_v30  ;;  %v4748_v30 = vrot.slane %v1196_v24, %v8124_v61 }
 0x4f6   : >> { %v4157_v14 = vpop.f32.mrf.mxu1  ;;  %v4752_v40 = vrot.slane %v1196_v24, %v8122_v35 }
 0x4f7   : >> { %v4872_v37 = vmul.f32 %v4720_v33, %v4156_v54  ;;  %v5011_v48 = vrot.slane %v4989_v22, %v7748_v53 }
 0x4f8   : >> { %v4158_v11 = vpop.f32.mrf.mxu1 }
 0x4f9   : >> { %v4990_v12 = vcombine.low %v4871_v41, %v4872_v37 }
 0x4fb   : >> { %v5018_v62 = vrot.slane %v4990_v12, %v7748_v53 }
 0x4fd   : >> { %v5020_v19 = vcombine.low %v5011_v48, %v5018_v62 }
 0x4ff   : >> { %v5034_v32 = vrot.slane %v5020_v19, %v7748_v53 }
 0x500   : >> { %v4194_v28 = vpop.f32.mrf.mxu0 }
 0x501   : >> { %v5035_v7 = vcombine.low %v5027_v29, %v5034_v32  ;;  %v4195_v60 = vadd.f32 %v4194_v28, %v7737_v9 }
 0x502   : >> { %v4196_v15 = vpop.f32.mrf.mxu0 }
 0x503   : >> { %5190 = vst [vmem:[%s7765_s2 + $0x8] sm:$0xff] %v5035_v7  ;;  %v4235_v45 = vpop.f32.mrf.mxu1  ;;  %v4197_v36 = vadd.f32 %v4196_v15, %v7737_v9  ;;  %v4873_v47 = vmul.f32 %v4724_v51, %v4195_v60 }
 0x504   : >> { %v4198_v50 = vpop.f32.mrf.mxu0  ;;  %v4236_v10 = vadd.f32 %v4235_v45, %v7737_v9 }
 0x505   : >> { %v4237_v27 = vpop.f32.mrf.mxu1  ;;  %v4874_v43 = vmul.f32 %v4728_v17, %v4197_v36  ;;  %v5597_v17 = vld [vmem:[%s7732_s0 + $0xc0] ss:$8 sm:$0xf] }
 0x506   : >> { %v4199_v25 = vpop.f32.mrf.mxu0  ;;  %v4238_v4 = vadd.f32 %v4237_v27, %v7737_v9  ;;  %v4875_v33 = vmul.f32 %v4732_v21, %v4236_v10 }
 0x507   : >> { %v4239_v56 = vpop.f32.mrf.mxu1  ;;  %v5036_v42 = vcombine.low %v4873_v47, %v4874_v43 }
 0x508   : >> { %v4876_v3 = vmul.f32 %v4736_v63, %v4238_v4  ;;  %v5598_v4 = vld [vmem:[%s7732_s0 + $0xc0] ss:$8 sm:$0xf0] }
 0x509   : >> { %v4240_v16 = vpop.f32.mrf.mxu1  ;;  %v5046_v48 = vrot.slane %v5036_v42, %v7748_v53  ;;  %v1200_v60 = vor.u32 %v5598_v4, %v5597_v17 }
 0x50a   : >> { %v5037_v39 = vcombine.low %v4875_v33, %v4876_v3 }
 0x50b   : >> { %v4760_v10 = vrot.slane %v1200_v60, %v8117_v44  ;;  %v4768_v43 = vrot.slane %v1200_v60, %v8118_v20  ;;  %v4756_v3 = vrot.slane %v1200_v60, %v8119_v57  ;;  %v4776_v42 = vrot.slane %v1200_v60, %v8121_v6 }
 0x50c   : >> { %v5053_v12 = vrot.slane %v5037_v39, %v7748_v53 }
 0x50e   : >> { %v5068_v28 = vcombine.low %v5046_v48, %v5053_v12 }
 0x510   : >> { %v5076_v45 = vrot.slane %v5068_v28, %v7748_v53 }
 0x512   : >> { %v4276_v38 = vpop.f32.mrf.mxu0 }
 0x513   : >> { %v4277_v34 = vadd.f32 %v4276_v38, %v7737_v9 }
 0x514   : >> { %v4278_v1 = vpop.f32.mrf.mxu0 }
 0x515   : >> { %v4279_v55 = vadd.f32 %v4278_v1, %v7737_v9  ;;  %v4877_v22 = vmul.f32 %v4740_v23, %v4277_v34  ;;  %v4764_v23 = vrot.slane %v1200_v60, %v8120_v8 }
 0x516   : >> { %v4317_v31 = vpop.f32.mrf.mxu1  ;;  %v4280_v13 = vpop.f32.mrf.mxu0 }
 0x517   : >> { %v4318_v54 = vadd.f32 %v4317_v31, %v7737_v9  ;;  %v4878_v14 = vmul.f32 %v4744_v49, %v4279_v55  ;;  %v4772_v55 = vrot.slane %v1200_v60, %v8123_v5 }
 0x518   : >> { %v4319_v58 = vpop.f32.mrf.mxu1  ;;  %v4281_v59 = vpop.f32.mrf.mxu0 }
 0x519   : >> { %v5038_v41 = vcombine.low %v4877_v22, %v4878_v14  ;;  %v4320_v37 = vadd.f32 %v4319_v58, %v7737_v9  ;;  %v4879_v2 = vmul.f32 %v4748_v30, %v4318_v54  ;;  %v4780_v54 = vrot.slane %v1200_v60, %v8124_v61 }
 0x51a   : >> { %v4321_v11 = vpop.f32.mrf.mxu1  ;;  %v4784_v14 = vrot.slane %v1200_v60, %v8122_v35 }
 0x51b   : >> { %v4880_v62 = vmul.f32 %v4752_v40, %v4320_v37  ;;  %v5060_v29 = vrot.slane %v5038_v41, %v7748_v53 }
 0x51c   : >> { %v4322_v19 = vpop.f32.mrf.mxu1 }
 0x51d   : >> { %v5039_v32 = vcombine.low %v4879_v2, %v4880_v62 }
 0x51f   : >> { %v5067_v7 = vrot.slane %v5039_v32, %v7748_v53 }
 0x521   : >> { %v5069_v15 = vcombine.low %v5060_v29, %v5067_v7 }
 0x523   : >> { %v5083_v50 = vrot.slane %v5069_v15, %v7748_v53 }
 0x524   : >> { %v4358_v27 = vpop.f32.mrf.mxu0 }
 0x525   : >> { %v5084_v25 = vcombine.low %v5076_v45, %v5083_v50  ;;  %v4359_v38 = vadd.f32 %v4358_v27, %v7737_v9 }
 0x526   : >> { %v4360_v56 = vpop.f32.mrf.mxu0 }
 0x527   : >> { %5191 = vst [vmem:[%s7765_s2 + $0x10] sm:$0xff] %v5084_v25  ;;  %v4399_v18 = vpop.f32.mrf.mxu1  ;;  %v4361_v51 = vadd.f32 %v4360_v56, %v7737_v9  ;;  %v4881_v31 = vmul.f32 %v4756_v3, %v4359_v38 }
 0x528   : >> { %v4362_v46 = vpop.f32.mrf.mxu0  ;;  %v4400_v34 = vadd.f32 %v4399_v18, %v7737_v9 }
 0x529   : >> { %v4401_v16 = vpop.f32.mrf.mxu1  ;;  %v4882_v49 = vmul.f32 %v4760_v10, %v4361_v51 }
 0x52a   : >> { %v4363_v24 = vpop.f32.mrf.mxu0  ;;  %v4402_v21 = vadd.f32 %v4401_v16, %v7737_v9  ;;  %v4883_v40 = vmul.f32 %v4764_v23, %v4400_v34 }
 0x52b   : >> { %v4403_v36 = vpop.f32.mrf.mxu1  ;;  %v5085_v39 = vcombine.low %v4881_v31, %v4882_v49 }
 0x52c   : >> { %v4884_v1 = vmul.f32 %v4768_v43, %v4402_v21  ;;  %v5600_v21 = vld [vmem:[%s7732_s0 + $0x100] ss:$8 sm:$0xf] }
 0x52d   : >> { %v4404_v63 = vpop.f32.mrf.mxu1  ;;  %v5095_v29 = vrot.slane %v5085_v39, %v7748_v53  ;;  %v5601_v43 = vld [vmem:[%s7732_s0 + $0x100] ss:$8 sm:$0xf0] }
 0x52e   : >> { %v5086_v59 = vcombine.low %v4883_v40, %v4884_v1  ;;  %v1204_v38 = vor.u32 %v5601_v43, %v5600_v21 }
 0x530   : >> { %v5102_v32 = vrot.slane %v5086_v59, %v7748_v53  ;;  %v4792_v34 = vrot.slane %v1204_v38, %v8117_v44  ;;  %v4800_v49 = vrot.slane %v1204_v38, %v8118_v20  ;;  %v4788_v1 = vrot.slane %v1204_v38, %v8119_v57 }
 0x531   : >> { %v4808_v44 = vrot.slane %v1204_v38, %v8121_v6 }
 0x532   : >> { %v5117_v27 = vcombine.low %v5095_v29, %v5102_v32 }
 0x534   : >> { %v5125_v18 = vrot.slane %v5117_v27, %v7748_v53 }
 0x536   : >> { %v4440_v47 = vpop.f32.mrf.mxu0 }
 0x537   : >> { %v4441_v33 = vadd.f32 %v4440_v47, %v7737_v9 }
 0x538   : >> { %v4442_v30 = vpop.f32.mrf.mxu0 }
 0x539   : >> { %v4443_v13 = vadd.f32 %v4442_v30, %v7737_v9  ;;  %v4885_v41 = vmul.f32 %v4772_v55, %v4441_v33  ;;  %v4796_v55 = vrot.slane %v1204_v38, %v8120_v8 }
 0x53a   : >> { %v4481_v22 = vpop.f32.mrf.mxu1  ;;  %v4444_v58 = vpop.f32.mrf.mxu0 }
 0x53b   : >> { %v4482_v37 = vadd.f32 %v4481_v22, %v7737_v9  ;;  %v4886_v11 = vmul.f32 %v4776_v42, %v4443_v13  ;;  %v4804_v13 = vrot.slane %v1204_v38, %v8123_v5 }
 0x53c   : >> { %v4483_v48 = vpop.f32.mrf.mxu1  ;;  %v4445_v12 = vpop.f32.mrf.mxu0 }
 0x53d   : >> { %v5087_v2 = vcombine.low %v4885_v41, %v4886_v11  ;;  %v4484_v62 = vadd.f32 %v4483_v48, %v7737_v9  ;;  %v4887_v28 = vmul.f32 %v4780_v54, %v4482_v37  ;;  %v4816_v41 = vrot.slane %v1204_v38, %v8122_v35 }
 0x53e   : >> { %v4485_v19 = vpop.f32.mrf.mxu1 }
 0x53f   : >> { %v4888_v7 = vmul.f32 %v4784_v14, %v4484_v62  ;;  %v5109_v45 = vrot.slane %v5087_v2, %v7748_v53  ;;  %v4812_v14 = vrot.slane %v1204_v38, %v8124_v61 }
 0x540   : >> { %v4486_v15 = vpop.f32.mrf.mxu1 }
 0x541   : >> { %v5088_v50 = vcombine.low %v4887_v28, %v4888_v7 }
 0x543   : >> { %v5116_v25 = vrot.slane %v5088_v50, %v7748_v53 }
 0x545   : >> { %v5118_v56 = vcombine.low %v5109_v45, %v5116_v25 }
 0x547   : >> { %v5132_v46 = vrot.slane %v5118_v56, %v7748_v53 }
 0x549   : >> { %v5133_v16 = vcombine.low %v5125_v18, %v5132_v46 }
 0x54b   : >> { %5192 = vst [vmem:[%s7765_s2 + $0x18] sm:$0xff] %v5133_v16  ;;  %v8127_v16 = vld [vmem:[#allocation22_spill] sm:$0xff] (%p1122_p4) }
 0x54c   : >> { %v4522_v24 = vpop.f32.mrf.mxu0 }
 0x54d   : >> { %v4523_v47 = vadd.f32 %v4522_v24, %v7737_v9  ;;  %v5195_v24 = vpack.c.bf16 (%p1122_p4), %v8127_v16, %v8127_v16 }
 0x54e   : >> { %v4563_v36 = vpop.f32.mrf.mxu1  ;;  %v4524_v17 = vpop.f32.mrf.mxu0 }
 0x54f   : >> { %v4525_v3 = vadd.f32 %v4524_v17, %v7737_v9  ;;  %v4564_v33 = vadd.f32 %v4563_v36, %v7737_v9  ;;  %v4889_v39 = vmul.f32 %v4788_v1, %v4523_v47  ;;  %v8128_v36 = vld [vmem:[#allocation23_spill] sm:$0xff] (%p1122_p4)  ;;  %5309 = vmatprep.mubr.bf16.mxu0 (%p1122_p4), %v5195_v24 }
 0x550   : >> { %v4565_v4 = vpop.f32.mrf.mxu1  ;;  %v4526_v63 = vpop.f32.mrf.mxu0  ;;  %v5197_v17 = vpack.c.bf16 (%p1122_p4), %v8128_v36, %v8128_v36 }
 0x551   : >> { %v4566_v23 = vadd.f32 %v4565_v4, %v7737_v9  ;;  %v4890_v42 = vmul.f32 %v4792_v34, %v4525_v3  ;;  %v4891_v22 = vmul.f32 %v4796_v55, %v4564_v33  ;;  %v5803_v4 = vmov (%p1122_p4), 0  }
 0x552   : >> { %v4567_v60 = vpop.f32.mrf.mxu1  ;;  %v4527_v51 = vpop.f32.mrf.mxu0  ;;  %5317 = vmatprep.subr.bf16.mxu1 (%p1122_p4), %v5803_v4  ;;  %5702 = vmatprep.mubr.msk.bf16.mxu1 (%p1122_p4), %vm5273_vm6, %v5197_v17 }
 0x553   : >> { %v4892_v31 = vmul.f32 %v4800_v49, %v4566_v23  ;;  %v5134_v58 = vcombine.low %v4889_v39, %v4890_v42 }
 0x554   : >> { %v4568_v10 = vpop.f32.mrf.mxu1 }
 0x555   : >> { %v5135_v59 = vcombine.low %v4891_v22, %v4892_v31  ;;  %v5144_v61 = vrot.slane %v5134_v58, %v7748_v53 }
 0x557   : >> { %v5151_v19 = vrot.slane %v5135_v59, %v7748_v53 }
 0x559   : >> { %v5166_v15 = vcombine.low %v5144_v61, %v5151_v19 }
 0x55f   : >> { %v4604_v30 = vpop.f32.mrf.mxu0 }
 0x560   : >> { %v4605_v40 = vadd.f32 %v4604_v30, %v7737_v9 }
 0x561   : >> { %v4606_v20 = vpop.f32.mrf.mxu0 }
 0x562   : >> { %v4645_v54 = vpop.f32.mrf.mxu1  ;;  %v4607_v57 = vadd.f32 %v4606_v20, %v7737_v9  ;;  %v4893_v11 = vmul.f32 %v4804_v13, %v4605_v40 }
 0x563   : >> { %v4646_v8 = vadd.f32 %v4645_v54, %v7737_v9  ;;  %v4608_v37 = vpop.f32.mrf.mxu0 }
 0x564   : >> { %v4894_v48 = vmul.f32 %v4808_v44, %v4607_v57  ;;  %v4647_v5 = vpop.f32.mrf.mxu1 }
 0x565   : >> { %v4648_v6 = vadd.f32 %v4647_v5, %v7737_v9  ;;  %v4609_v12 = vpop.f32.mrf.mxu0  ;;  %v4895_v29 = vmul.f32 %v4812_v14, %v4646_v8  ;;  %v5174_v9 = vrot.slane %v5166_v15, %v7748_v53 }
 0x566   : >> { %v5136_v2 = vcombine.low %v4893_v11, %v4894_v48  ;;  %v4649_v62 = vpop.f32.mrf.mxu1 }
 0x567   : >> { %v4896_v32 = vmul.f32 %v4816_v41, %v4648_v6 }
 0x568   : >> { %v4650_v28 = vpop.f32.mrf.mxu1  ;;  %v5158_v7 = vrot.slane %v5136_v2, %v7748_v53 }
 0x569   : >> { %v5137_v35 = vcombine.low %v4895_v29, %v4896_v32 }
 0x56b   : >> { %v5165_v45 = vrot.slane %v5137_v35, %v7748_v53 }
 0x56d   : >> { %v5167_v50 = vcombine.low %v5158_v7, %v5165_v45 }
 0x56f   : >> { %v5181_v27 = vrot.slane %v5167_v50, %v7748_v53  ;;  %1124 = sbr.rel (!%p1122_p4) target bundleno = 649 (0x289), region = 152 }
 0x571   : >> { %v5182_v25 = vcombine.low %v5174_v9, %v5181_v27 }
 0x573   : >> { %5193 = vst [vmem:[%s7765_s2 + $0x20] sm:$0xff] %v5182_v25 }
 0x57a   : > { %v5228_v56 = vld [vmem:[#allocation2 + $0xf0] sm:$0xff]  ;;  %v5229_v18 = vld [vmem:[#allocation2 + $0xf8] sm:$0xff]  ;;  %v5226_v43 = vld [vmem:[#allocation2 + $0xe0] sm:$0xff] }
 0x57b   : > { %v5244_v46 = vld [vmem:[#allocation2 + $0x170] sm:$0xff]  ;;  %v5263_v53 = vpack.c.bf16 %v5229_v18, %v5228_v56  ;;  %v5245_v63 = vld [vmem:[#allocation2 + $0x178] sm:$0xff]  ;;  %v5227_v52 = vld [vmem:[#allocation2 + $0xe8] sm:$0xff] }
 0x57c   : > { %v5212_v60 = vld [vmem:[#allocation2 + $0x70] sm:$0xff]  ;;  %v5213_v51 = vld [vmem:[#allocation2 + $0x78] sm:$0xff]  ;;  %v5271_v10 = vpack.c.bf16 %v5245_v63, %v5244_v46  ;;  %v5242_v26 = vld [vmem:[#allocation2 + $0x160] sm:$0xff]  ;;  %v5262_v0 = vpack.c.bf16 %v5227_v52, %v5226_v43 }
 0x57d   : > { %v5255_v21 = vpack.c.bf16 %v5213_v51, %v5212_v60  ;;  %5710 = vmatprep.subr.bf16.mxu0 %v5263_v53  ;;  %v5243_v38 = vld [vmem:[#allocation2 + $0x168] sm:$0xff]  ;;  %v5210_v3 = vld [vmem:[#allocation2 + $0x60] sm:$0xff]  ;;  %v5224_v47 = vld [vmem:[#allocation2 + $0xd0] sm:$0xff] }
 0x57e   : > { %v5211_v34 = vld [vmem:[#allocation2 + $0x68] sm:$0xff]  ;;  %5318 = vmatpush1.bf16.msra.mxu1 %v5271_v10  ;;  %v5270_v23 = vpack.c.bf16 %v5243_v38, %v5242_v26  ;;  %v5225_v1 = vld [vmem:[#allocation2 + $0xd8] sm:$0xff]  ;;  %v5240_v33 = vld [vmem:[#allocation2 + $0x150] sm:$0xff] }
 0x57f   : > { %5711 = vmatpush3.bf16.msra.mxu0 %v5255_v21  ;;  %v5254_v49 = vpack.c.bf16 %v5211_v34, %v5210_v3  ;;  %5319 = vmatprep.subr.bf16.mxu1 %v5803_v4  ;;  %v5261_v55 = vpack.c.bf16 %v5225_v1, %v5224_v47  ;;  %v5241_v42 = vld [vmem:[#allocation2 + $0x158] sm:$0xff]  ;;  %v5208_v31 = vld [vmem:[#allocation2 + $0x50] sm:$0xff]  ;;  %v5222_v40 = vld [vmem:[#allocation2 + $0xc0] sm:$0xff] }
 0x580   : > { %5712 = vmatprep.subr.bf16.mxu0 %v5262_v0  ;;  %v5209_v30 = vld [vmem:[#allocation2 + $0x58] sm:$0xff]  ;;  %v5223_v13 = vld [vmem:[#allocation2 + $0xc8] sm:$0xff]  ;;  %v5269_v44 = vpack.c.bf16 %v5241_v42, %v5240_v33  ;;  %v5238_v22 = vld [vmem:[#allocation2 + $0x140] sm:$0xff] }
 0x581   : > { %v5253_v39 = vpack.c.bf16 %v5209_v30, %v5208_v31  ;;  %v5260_v20 = vpack.c.bf16 %v5223_v13, %v5222_v40  ;;  %v5239_v54 = vld [vmem:[#allocation2 + $0x148] sm:$0xff]  ;;  %v5206_v14 = vld [vmem:[#allocation2 + $0x40] sm:$0xff]  ;;  %v5220_v58 = vld [vmem:[#allocation2 + $0xb0] sm:$0xff] }
 0x582   : > { %5320 = vmatpush1.bf16.msra.mxu1 %v5270_v23  ;;  %v5207_v57 = vld [vmem:[#allocation2 + $0x48] sm:$0xff]  ;;  %v5221_v59 = vld [vmem:[#allocation2 + $0xb8] sm:$0xff]  ;;  %v5268_v8 = vpack.c.bf16 %v5239_v54, %v5238_v22  ;;  %v5236_v37 = vld [vmem:[#allocation2 + $0x130] sm:$0xff] }
 0x583   : > { %5713 = vmatpush3.bf16.msra.mxu0 %v5254_v49  ;;  %5321 = vmatprep.subr.bf16.mxu1 %v5803_v4  ;;  %v5252_v41 = vpack.c.bf16 %v5207_v57, %v5206_v14  ;;  %v5259_v11 = vpack.c.bf16 %v5221_v59, %v5220_v58  ;;  %v5237_v48 = vld [vmem:[#allocation2 + $0x138] sm:$0xff]  ;;  %v5204_v5 = vld [vmem:[#allocation2 + $0x30] sm:$0xff]  ;;  %v5218_v12 = vld [vmem:[#allocation2 + $0xa0] sm:$0xff] }
 0x584   : > { %5714 = vmatprep.subr.bf16.mxu0 %v5261_v55  ;;  %v5205_v6 = vld [vmem:[#allocation2 + $0x38] sm:$0xff]  ;;  %v5219_v2 = vld [vmem:[#allocation2 + $0xa8] sm:$0xff]  ;;  %v5267_v62 = vpack.c.bf16 %v5237_v48, %v5236_v37  ;;  %v5234_v19 = vld [vmem:[#allocation2 + $0x120] sm:$0xff] }
 0x585   : > { %v5251_v61 = vpack.c.bf16 %v5205_v6, %v5204_v5  ;;  %v5258_v29 = vpack.c.bf16 %v5219_v2, %v5218_v12  ;;  %v5235_v32 = vld [vmem:[#allocation2 + $0x128] sm:$0xff]  ;;  %v5202_v28 = vld [vmem:[#allocation2 + $0x20] sm:$0xff]  ;;  %v5216_v35 = vld [vmem:[#allocation2 + $0x90] sm:$0xff] }
 0x586   : > { %5322 = vmatpush1.bf16.msra.mxu1 %v5269_v44  ;;  %v5203_v7 = vld [vmem:[#allocation2 + $0x28] sm:$0xff]  ;;  %v5217_v15 = vld [vmem:[#allocation2 + $0x98] sm:$0xff]  ;;  %v5266_v45 = vpack.c.bf16 %v5235_v32, %v5234_v19  ;;  %v5232_v9 = vld [vmem:[#allocation2 + $0x110] sm:$0xff] }
 0x587   : > { %5715 = vmatpush3.bf16.msra.mxu0 %v5253_v39  ;;  %5323 = vmatprep.subr.bf16.mxu1 %v5803_v4  ;;  %v5250_v50 = vpack.c.bf16 %v5203_v7, %v5202_v28  ;;  %v5257_v27 = vpack.c.bf16 %v5217_v15, %v5216_v35  ;;  %v5233_v25 = vld [vmem:[#allocation2 + $0x118] sm:$0xff]  ;;  %v5200_v56 = vld [vmem:[#allocation2 + $0x10] sm:$0xff]  ;;  %v5214_v46 = vld [vmem:[#allocation2 + $0x80] sm:$0xff] }
 0x588   : > { %5716 = vmatprep.subr.bf16.mxu0 %v5260_v20  ;;  %v5201_v18 = vld [vmem:[#allocation2 + $0x18] sm:$0xff]  ;;  %v5215_v16 = vld [vmem:[#allocation2 + $0x88] sm:$0xff]  ;;  %v5265_v24 = vpack.c.bf16 %v5233_v25, %v5232_v9  ;;  %v5230_v17 = vld [vmem:[#allocation2 + $0x100] sm:$0xff] }
 0x589   : > { %v5249_v36 = vpack.c.bf16 %v5201_v18, %v5200_v56  ;;  %v5256_v53 = vpack.c.bf16 %v5215_v16, %v5214_v46  ;;  %v5231_v63 = vld [vmem:[#allocation2 + $0x108] sm:$0xff]  ;;  %v5198_v60 = vld [vmem:[#allocation2] sm:$0xff]  ;;  %v8129_v26 = vld [vmem:[#allocation20_spill] sm:$0xff] }
 0x58a   : > { %5324 = vmatpush1.bf16.msra.mxu1 %v5268_v8  ;;  %v5199_v51 = vld [vmem:[#allocation2 + $0x8] sm:$0xff]  ;;  %v5264_v10 = vpack.c.bf16 %v5231_v63, %v5230_v17  ;;  %v5246_v43 = vld [vmem:[#allocation2 + $0x180] sm:$0xff]  ;;  %v5194_v0 = vpack.c.bf16 %v8129_v26, %v8129_v26 }
 0x58b   : > { %5717 = vmatpush3.bf16.msra.mxu0 %v5252_v41  ;;  %5325 = vmatprep.subr.bf16.mxu1 %v5803_v4  ;;  %v5248_v21 = vpack.c.bf16 %v5199_v51, %v5198_v60  ;;  %v5247_v52 = vld [vmem:[#allocation2 + $0x188] sm:$0xff]  ;;  %v8130_v3 = vld [vmem:[#allocation21_spill] sm:$0xff] }
 0x58c   : > { %5718 = vmatprep.subr.bf16.mxu0 %v5259_v11  ;;  %v5272_v38 = vpack.c.bf16 %v5247_v52, %v5246_v43  ;;  %v5196_v34 = vpack.c.bf16 %v8130_v3, %v8130_v3 }
 0x58e   : > { %5326 = vmatpush1.bf16.msra.mxu1 %v5267_v62 }
 0x58f   : > { %5719 = vmatpush3.bf16.msra.mxu0 %v5251_v61  ;;  %5327 = vmatprep.subr.bf16.mxu1 %v5803_v4 }
 0x590   : > { %5720 = vmatprep.subr.bf16.mxu0 %v5258_v29 }
 0x592   : > { %5328 = vmatpush1.bf16.msra.mxu1 %v5266_v45 }
 0x593   : > { %5721 = vmatpush3.bf16.msra.mxu0 %v5250_v50  ;;  %5329 = vmatprep.subr.bf16.mxu1 %v5803_v4 }
 0x594   : > { %5722 = vmatprep.subr.bf16.mxu0 %v5257_v27 }
 0x596   : > { %5330 = vmatpush1.bf16.msra.mxu1 %v5265_v24 }
 0x597   : > { %5723 = vmatpush3.bf16.msra.mxu0 %v5249_v36  ;;  %5331 = vmatprep.subr.bf16.mxu1 %v5803_v4 }
 0x598   : > { %5724 = vmatprep.subr.bf16.mxu0 %v5256_v53 }
 0x59a   : > { %5332 = vmatpush1.bf16.msra.mxu1 %v5264_v10 }
 0x59b   : > { %5725 = vmatpush3.bf16.msra.mxu0 %v5248_v21  ;;  %5347 = vmatprep.subr.bf16.mxu1 %v5803_v4 }
 0x59e   : > { %5310 = vmatmul.mubr.bf16.vlgmr.msra.gmra.mxu0 %v5194_v0  ;;  %5348 = vmatpush2.bf16.msra.mxu1 %v5272_v38 }
 0x5a1   : > { %5350 = vmatmul.mubr.bf16.vlgmr.msra.gmra.mxu1 %v5196_v34 }
 0x65e   : > { %v5726_v23 = vpop.f32.mrf.mxu0 }
 0x660   : > { %v5727_v49 = vpop.f32.mrf.mxu0 }
 0x661   : > { %v5728_v47 = vadd.f32 %v5727_v49, %v5726_v23  ;;  %v5351_v1 = vpop.f32.mrf.mxu1 }
 0x662   : > { %v5729_v33 = vpop.f32.mrf.mxu0 }
 0x663   : > { %v5352_v55 = vadd.f32 %v5728_v47, %v5351_v1  ;;  %v5353_v42 = vpop.f32.mrf.mxu1 }
 0x664   : > { %v5730_v31 = vpop.f32.mrf.mxu0 }
 0x665   : > { %v5357_v30 = vand.u32 2147483647, %v5352_v55  ;;  %v5354_v40 = vpop.f32.mrf.mxu1  ;;  %vm5363_vm7 = vcmp.ge.f32.partialorder %v5352_v55, 0.0 }
 0x667   : > { %v5358_v13 = vsub.f32 0.0, %v5357_v30  ;;  %v5355_v44 = vpop.f32.mrf.mxu1 }
 0x669   : > { %v5359_v4 = vmul.f32 1.442695, %v5358_v13 }
 0x66b   : > { %5778 = vpow2.f32 %v5359_v4 }
 0x678   : > { %v5779_v39 = vpop.eup %5778 }
 0x679   : > { %v5361_v22 = vadd.f32 1.0, %v5779_v39 }
 0x67b   : > { %5780 = vrcp.f32 %v5361_v22 }
 0x688   : > { %v5781_v20 = vpop.eup %5780 }
 0x689   : > { %v5364_v54 = vmul.f32 %v5781_v20, %v5779_v39 }
 0x68b   : > { %v5365_v14 = vsel %vm5363_vm7, %v5781_v20, %v5364_v54 }
 0x68c   : > { %5366 = vst [vmem:[%s5945_s30] sm:$0x3] %v5365_v14 }
 0x68d PF: > { %s26_s21 = sadd.s32 1, %s5792_s21  }
 0x68e   : > { %p23_p5 = scmp.ge.s32.totalorder %s26_s21, 4  }
 0x690   :  { %25 = sbr.rel (!%p23_p5) target bundleno = 6 (0x6), region = 163 }

</bundles_post_ra>
